<compile_context>
chip_gen: v6e
topology: v6e:2x2x1
jax: 0.10.0
libtpu: 0.0.40
codegen_flags: <defaults>
</compile_context>

<pallas_src>
import jax
import jax.numpy as jnp
from jax.experimental import pallas as pl
from jax.experimental.pallas import tpu as pltpu

# ---------------- model hyper-parameters (module defaults) ----------------
INPUT_DIM = 4        # input_dim (free choice, small)
EMBED_DIM = 128      # embed_dim default
NUM_HEADS = 4        # num_heads default
NUM_LAYERS = 3       # num_layers default
DIM_FF = 2048        # nn.TransformerEncoderLayer default dim_feedforward
LN_EPS = 1e-5        # layer_norm_eps default
BATCH = 2
SEQ = 8              # T
FF_CHUNKS = 4        # dim_feedforward processed in 4 chunks of 512


# ------------------------------ kernel -------------------------------------
def _layer_norm(x, gamma, beta, eps=LN_EPS):
    mu = jnp.mean(x, axis=-1, keepdims=True)
    var = jnp.mean((x - mu) ** 2, axis=-1, keepdims=True)
    return (x - mu) * jax.lax.rsqrt(var + eps) * gamma + beta


def fused_forward_kernel(x_ref, pe_ref, we_ref, bmask_ref, hmask_ref,
                         wqkv_ref, wo_ref, w1_ref, w2_ref, bvec_ref,
                         o_ref, act_ref):
    """One grid step == one encoder layer. act_ref (VMEM scratch) carries the
    (B*T, D) activation across layers; step 0 also does embedding + positional
    encoding and the last step also does the temporal mean."""
    layer = pl.program_id(0)
    bt, d = act_ref.shape
    b = o_ref.shape[0]
    t = bt // b
    dh = d // NUM_HEADS
    dff = w1_ref.shape[1]
    fc = dff // FF_CHUNKS

    # consolidated per-layer vectors: one (1, 9D + DFF) f32 row, sliced at
    # 128-lane-aligned offsets (loaded lazily to keep live vregs small).
    def bv(lo, n):
        return bvec_ref[:, pl.ds(lo, n)]                       # (1, n) f32

    # ---- step 0: pointwise Conv1d embedding + positional encoding ----------
    @pl.when(layer == 0)
    def _embed():
        emb = jnp.dot(x_ref[...], we_ref[...],
                      preferred_element_type=jnp.float32)
        act_ref[...] = emb + pe_ref[...]        # pe already includes conv bias

    x = act_ref[...]                                           # (B*T, D) f32

    # ---- multi-head self-attention (flattened batch*time) ------------------
    qkv = jnp.dot(x.astype(jnp.bfloat16), wqkv_ref[...],
                  preferred_element_type=jnp.float32) + bv(0, 3 * d)
    q = qkv[:, :d].astype(jnp.bfloat16)         # 128-lane-aligned slices
    k = qkv[:, d:2 * d].astype(jnp.bfloat16)
    v = qkv[:, 2 * d:].astype(jnp.bfloat16)

    scale = 1.0 / float(dh) ** 0.5
    bmask = bmask_ref[...]                      # (B*T, B*T) f32, 0 / -1e30
    hmask = hmask_ref[...]                      # (H, D) bf16 one-hot lanes

    attn = jnp.zeros((bt, d), jnp.float32)
    for h in range(NUM_HEADS):                  # static loop, full-width ops
        hm = hmask[h:h + 1, :]                  # (1, D) bf16
        kh = k * hm                             # zero lanes outside head h
        vh = v * hm
        # bf16 operands, f32 accumulation; mask/softmax stay in f32.
        s = jnp.einsum('qc,kc->qk', q, kh,
                       preferred_element_type=jnp.float32) * scale + bmask
        s = s - jnp.max(s, axis=-1, keepdims=True)
        p = jnp.exp(s)
        p = p * pl.reciprocal(jnp.sum(p, axis=-1, keepdims=True), approx=True)
        attn = attn + jnp.dot(p.astype(jnp.bfloat16), vh,
                              preferred_element_type=jnp.float32)

    attn = jnp.dot(attn.astype(jnp.bfloat16), wo_ref[...],
                   preferred_element_type=jnp.float32) + bv(3 * d, d)

    x1 = _layer_norm(x + attn, bv(4 * d, d), bv(5 * d, d))      # post-norm 1

    # ---- feed-forward, chunked over dim_feedforward ------------------------
    x1_bf = x1.astype(jnp.bfloat16)
    ff = jnp.zeros((bt, d), jnp.float32)
    for c in range(FF_CHUNKS):                  # static loop of 4 x 512
        lo = c * fc
        h1 = jnp.dot(x1_bf, w1_ref[:, pl.ds(lo, fc)],
                     preferred_element_type=jnp.float32) + bv(6 * d + lo, fc)
        h1 = jnp.maximum(h1, 0.0).astype(jnp.bfloat16)
        ff = ff + jnp.dot(h1, w2_ref[pl.ds(lo, fc), :],
                          preferred_element_type=jnp.float32)
    ff = ff + bv(6 * d + dff, d)

    x2 = _layer_norm(x1 + ff, bv(7 * d + dff, d), bv(8 * d + dff, d))
    act_ref[...] = x2

    # ---- last step: temporal mean (cheap sublane reduction) -----------------
    @pl.when(layer == pl.num_programs(0) - 1)
    def _pool():
        means = [jnp.sum(x2[i * t:(i + 1) * t, :], axis=0, keepdims=True)
                 for i in range(b)]
        o_ref[...] = jnp.concatenate(means, axis=0) * (1.0 / t)


# ------------------------------ wrapper -------------------------------------
def _const(shape):
    nz = len(shape)
    return pl.BlockSpec(shape, lambda l, _n=nz: (0,) * _n)


def _per_layer(shape):
    nz = len(shape)
    return pl.BlockSpec((None,) + shape, lambda l, _n=nz: (l,) + (0,) * _n)


@jax.jit
def transformer_encoder_forward(x_nct, params):
    """x_nct: (B, input_dim, T) in PyTorch NCT layout. Returns (B, embed_dim)."""
    b, cin, t = x_nct.shape
    d = params["w_emb"].shape[1]
    dff = params["w1"].shape[2]
    num_layers = params["wqkv"].shape[0]
    bt = b * t

    x_flat = jnp.transpose(x_nct, (0, 2, 1)).reshape(bt, cin).astype(jnp.float32)
    # positional encoding tiled over batch, conv bias folded in (saves an input)
    pe_flat = (jnp.tile(params["pe"][:t], (b, 1)) +
               params["b_emb"]).astype(jnp.float32)
    # block-diagonal additive mask (batch isolation), built once on host
    row_b = jnp.repeat(jnp.arange(b), t)
    bmask = jnp.where(row_b[:, None] == row_b[None, :], 0.0, -1e30
                      ).astype(jnp.float32)
    # per-head lane one-hot masks (H, D), bf16 so the masked k/v stay bf16
    head_id = jnp.arange(d) // (d // NUM_HEADS)
    hmask = (head_id[None, :] == jnp.arange(NUM_HEADS)[:, None]
             ).astype(jnp.bfloat16)
    # single consolidated per-layer vector bundle: (L, 1, 9D + DFF) f32
    bvec = jnp.concatenate(
        [params["bqkv"], params["bo"], params["g1"], params["be1"],
         params["bb1"], params["bb2"], params["g2"], params["be2"]], axis=2)

    grid_spec = pltpu.PrefetchScalarGridSpec(
        num_scalar_prefetch=0,
        grid=(num_layers,),
        in_specs=[
            _const((bt, cin)),             # x (flattened NTC)
            _const((bt, d)),               # positional encoding + conv bias
            _const((cin, d)),              # embedding weight
            _const((bt, bt)),              # block-diagonal batch mask
            _const((NUM_HEADS, d)),        # head lane masks (bf16)
            _per_layer((d, 3 * d)),        # wqkv (bf16)
            _per_layer((d, d)),            # wo   (bf16)
            _per_layer((d, dff)),          # w1   (bf16)
            _per_layer((dff, d)),          # w2   (bf16)
            _per_layer((1, 9 * d + dff)),  # consolidated biases / LN params
        ],
        out_specs=pl.BlockSpec((b, d), lambda l: (0, 0)),
        scratch_shapes=[pltpu.VMEM((bt, d), jnp.float32)],
    )

    return pl.pallas_call(
        fused_forward_kernel,
        out_shape=jax.ShapeDtypeStruct((b, d), jnp.float32),
        grid_spec=grid_spec,
        compiler_params=pltpu.CompilerParams(
            dimension_semantics=("arbitrary",)),
    )(x_flat, pe_flat, params["w_emb"], bmask, hmask,
      params["wqkv"], params["wo"], params["w1"], params["w2"], bvec)


# ------------------------------ params --------------------------------------
def _positional_encoding(t, d):
    pos = jnp.arange(t, dtype=jnp.float32)[:, None]
    div = jnp.exp(jnp.arange(0, d, 2, dtype=jnp.float32) *
                  (-jnp.log(10000.0) / d))
    pe = jnp.zeros((t, d), jnp.float32)
    pe = pe.at[:, 0::2].set(jnp.sin(pos * div))
    pe = pe.at[:, 1::2].set(jnp.cos(pos * div))
    return pe


def init_params(key):
    k_emb, k_bemb, k_qkv, k_o, k_1, k_2 = jax.random.split(key, 6)
    s = 0.02
    L, D, F = NUM_LAYERS, EMBED_DIM, DIM_FF
    return {
        # Conv1d(kernel_size=1) weight (D, Cin, 1) stored transposed as (Cin, D)
        "w_emb": s * jax.random.normal(k_emb, (INPUT_DIM, D), jnp.float32),
        "b_emb": s * jax.random.normal(k_bemb, (1, D), jnp.float32),
        "pe": _positional_encoding(SEQ, D),   # precomputed once (buffer)
        # per-layer weights stacked on a leading L axis; matrices kept in bf16
        "wqkv": (s * jax.random.normal(k_qkv, (L, D, 3 * D), jnp.float32)
                 ).astype(jnp.bfloat16),
        "bqkv": jnp.zeros((L, 1, 3 * D), jnp.float32),
        "wo": (s * jax.random.normal(k_o, (L, D, D), jnp.float32)
               ).astype(jnp.bfloat16),
        "bo": jnp.zeros((L, 1, D), jnp.float32),
        "g1": jnp.ones((L, 1, D), jnp.float32),
        "be1": jnp.zeros((L, 1, D), jnp.float32),
        "w1": (s * jax.random.normal(k_1, (L, D, F), jnp.float32)
               ).astype(jnp.bfloat16),
        "bb1": jnp.zeros((L, 1, F), jnp.float32),
        "w2": (s * jax.random.normal(k_2, (L, F, D), jnp.float32)
               ).astype(jnp.bfloat16),
        "bb2": jnp.zeros((L, 1, D), jnp.float32),
        "g2": jnp.ones((L, 1, D), jnp.float32),
        "be2": jnp.zeros((L, 1, D), jnp.float32),
    }


# ------------------------------ main ----------------------------------------
if __name__ == "__main__":
    key = jax.random.PRNGKey(0)
    k_in, k_par = jax.random.split(key)
    x = jax.random.normal(k_in, (BATCH, INPUT_DIM, SEQ), jnp.float32)  # NCT
    params = init_params(k_par)

    out = transformer_encoder_forward(x, params)
    out = jax.block_until_ready(out)
    assert out.shape == (BATCH, EMBED_DIM), out.shape
    assert bool(jnp.all(jnp.isfinite(out)))
    print("KERNEL_OK")
</pallas_src>

<mosaic_0001>
module attributes {stable_mosaic.version = 11 : i64} {
  func.func @fused_forward_kernel(%arg0: i32, %arg1: memref<16x4xf32, #tpu.memory_space<vmem>>, %arg2: memref<16x128xf32, #tpu.memory_space<vmem>>, %arg3: memref<4x128xf32, #tpu.memory_space<vmem>>, %arg4: memref<16x16xf32, #tpu.memory_space<vmem>>, %arg5: memref<4x128xbf16, #tpu.memory_space<vmem>>, %arg6: memref<1x128x384xbf16, #tpu.memory_space<vmem>>, %arg7: memref<1x128x128xbf16, #tpu.memory_space<vmem>>, %arg8: memref<1x128x2048xbf16, #tpu.memory_space<vmem>>, %arg9: memref<1x2048x128xbf16, #tpu.memory_space<vmem>>, %arg10: memref<1x1x3200xf32, #tpu.memory_space<vmem>>, %arg11: memref<2x128xf32, #tpu.memory_space<vmem>>, %arg12: memref<16x128xf32, #tpu.memory_space<vmem>>) attributes {dimension_semantics = [#tpu.dimension_semantics<arbitrary>], iteration_bounds = array<i64: 3>, scalar_prefetch = 0 : i64, scratch_operands = 1 : i64, tpu.core_type = #tpu.core_type<tc>, window_params = [{pipeline_mode = #tpu.pipeline_mode<synchronous>, transform_indices = @transform_0, window_bounds = array<i64: 16, 4>}, {pipeline_mode = #tpu.pipeline_mode<synchronous>, transform_indices = @transform_1, window_bounds = array<i64: 16, 128>}, {pipeline_mode = #tpu.pipeline_mode<synchronous>, transform_indices = @transform_2, window_bounds = array<i64: 4, 128>}, {pipeline_mode = #tpu.pipeline_mode<synchronous>, transform_indices = @transform_3, window_bounds = array<i64: 16, 16>}, {pipeline_mode = #tpu.pipeline_mode<synchronous>, transform_indices = @transform_4, window_bounds = array<i64: 4, 128>}, {transform_indices = @transform_5, window_bounds = array<i64: 1, 128, 384>}, {transform_indices = @transform_6, window_bounds = array<i64: 1, 128, 128>}, {transform_indices = @transform_7, window_bounds = array<i64: 1, 128, 2048>}, {transform_indices = @transform_8, window_bounds = array<i64: 1, 2048, 128>}, {transform_indices = @transform_9, window_bounds = array<i64: 1, 1, 3200>}, {pipeline_mode = #tpu.pipeline_mode<synchronous>, transform_indices = @transform_10, window_bounds = array<i64: 2, 128>}]} {
    %c0_i32 = arith.constant 0 : i32
    %0 = arith.cmpi eq, %arg0, %c0_i32 : i32
    %1 = arith.extui %0 : i1 to i32
    %c0_i32_0 = arith.constant 0 : i32
    %2 = arith.cmpi ne, %1, %c0_i32_0 : i32
    scf.if %2 {
      %c0_105 = arith.constant 0 : index
      %c0_106 = arith.constant 0 : index
      %237 = vector.load %arg1[%c0_105, %c0_106] : memref<16x4xf32, #tpu.memory_space<vmem>>, vector<16x4xf32>
      %c0_107 = arith.constant 0 : index
      %c0_108 = arith.constant 0 : index
      %238 = vector.load %arg3[%c0_107, %c0_108] : memref<4x128xf32, #tpu.memory_space<vmem>>, vector<4x128xf32>
      %cst_109 = arith.constant dense<0.000000e+00> : vector<16x128xf32>
      %239 = tpu.matmul %237, %238, %cst_109 {dimension_numbers = #tpu.dot_dimension_numbers<[1], [0], [0], [1], [0, 0, 1, 1], [], []>} : vector<16x4xf32>, vector<4x128xf32>, vector<16x128xf32> -> vector<16x128xf32>
      %c0_110 = arith.constant 0 : index
      %c0_111 = arith.constant 0 : index
      %240 = vector.load %arg2[%c0_110, %c0_111] : memref<16x128xf32, #tpu.memory_space<vmem>>, vector<16x128xf32>
      %241 = arith.addf %239, %240 : vector<16x128xf32>
      %c0_112 = arith.constant 0 : index
      %c0_113 = arith.constant 0 : index
      %242 = vector.load %arg12[%c0_112, %c0_113] : memref<16x128xf32, #tpu.memory_space<vmem>>, vector<16x128xf32>
      tpu.vector_store %arg12[%c0_112, %c0_113], %241 {strides = array<i32>} : memref<16x128xf32, #tpu.memory_space<vmem>>, vector<16x128xf32>,
    } else {
    }
    %c0 = arith.constant 0 : index
    %c0_1 = arith.constant 0 : index
    %3 = vector.load %arg12[%c0, %c0_1] : memref<16x128xf32, #tpu.memory_space<vmem>>, vector<16x128xf32>
    %4 = arith.truncf %3 : vector<16x128xf32> to vector<16x128xbf16>
    %c0_2 = arith.constant 0 : index
    %c0_3 = arith.constant 0 : index
    %c0_4 = arith.constant 0 : index
    %5 = vector.load %arg6[%c0_2, %c0_3, %c0_4] : memref<1x128x384xbf16, #tpu.memory_space<vmem>>, vector<1x128x384xbf16>
    %6 = vector.shape_cast %5 : vector<1x128x384xbf16> to vector<128x384xbf16>
    %cst = arith.constant dense<0.000000e+00> : vector<16x384xf32>
    %7 = tpu.matmul %4, %6, %cst {dimension_numbers = #tpu.dot_dimension_numbers<[1], [0], [0], [1], [0, 0, 1, 1], [], []>} : vector<16x128xbf16>, vector<128x384xbf16>, vector<16x384xf32> -> vector<16x384xf32>
    %c0_5 = arith.constant 0 : index
    %c0_6 = arith.constant 0 : index
    %c0_7 = arith.constant 0 : index
    %8 = vector.load %arg10[%c0_5, %c0_6, %c0_7] : memref<1x1x3200xf32, #tpu.memory_space<vmem>>, vector<1x1x384xf32>
    %9 = vector.shape_cast %8 : vector<1x1x384xf32> to vector<1x384xf32>
    %10 = vector.broadcast %9 : vector<1x384xf32> to vector<16x384xf32>
    %11 = arith.addf %7, %10 : vector<16x384xf32>
    %12 = vector.extract_strided_slice %11 {offsets = [0, 0], sizes = [16, 128], strides = [1, 1]} : vector<16x384xf32> to vector<16x128xf32>
    %13 = arith.truncf %12 : vector<16x128xf32> to vector<16x128xbf16>
    %14 = vector.extract_strided_slice %11 {offsets = [0, 128], sizes = [16, 128], strides = [1, 1]} : vector<16x384xf32> to vector<16x128xf32>
    %15 = arith.truncf %14 : vector<16x128xf32> to vector<16x128xbf16>
    %16 = vector.extract_strided_slice %11 {offsets = [0, 256], sizes = [16, 128], strides = [1, 1]} : vector<16x384xf32> to vector<16x128xf32>
    %17 = arith.truncf %16 : vector<16x128xf32> to vector<16x128xbf16>
    %c0_8 = arith.constant 0 : index
    %c0_9 = arith.constant 0 : index
    %18 = vector.load %arg4[%c0_8, %c0_9] : memref<16x16xf32, #tpu.memory_space<vmem>>, vector<16x16xf32>
    %c0_10 = arith.constant 0 : index
    %c0_11 = arith.constant 0 : index
    %19 = vector.load %arg5[%c0_10, %c0_11] : memref<4x128xbf16, #tpu.memory_space<vmem>>, vector<4x128xbf16>
    %cst_12 = arith.constant 0.000000e+00 : f32
    %20 = vector.broadcast %cst_12 : f32 to vector<16x128xf32>
    %21 = vector.extract_strided_slice %19 {offsets = [0, 0], sizes = [1, 128], strides = [1, 1]} : vector<4x128xbf16> to vector<1x128xbf16>
    %22 = vector.broadcast %21 : vector<1x128xbf16> to vector<16x128xbf16>
    %23 = arith.mulf %15, %22 : vector<16x128xbf16>
    %24 = vector.broadcast %21 : vector<1x128xbf16> to vector<16x128xbf16>
    %25 = arith.mulf %17, %24 : vector<16x128xbf16>
    "tpu.trace_start"() <{level = 10 : i32, message = "qc,kc->qk"}> : () -> ()
    %cst_13 = arith.constant dense<0.000000e+00> : vector<16x16xf32>
    %26 = tpu.matmul %13, %23, %cst_13 {dimension_numbers = #tpu.dot_dimension_numbers<[1], [1], [0], [0], [0, 0, 1, 0], [], []>} : vector<16x128xbf16>, vector<16x128xbf16>, vector<16x16xf32> -> vector<16x16xf32>
    "tpu.trace_stop"() : () -> ()
    %cst_14 = arith.constant 0.176776692 : f32
    %27 = vector.broadcast %cst_14 : f32 to vector<16x16xf32>
    %28 = arith.mulf %26, %27 : vector<16x16xf32>
    %29 = arith.addf %28, %18 : vector<16x16xf32>
    %cst_15 = arith.constant dense<0xFF800000> : vector<16xf32>
    %30 = vector.multi_reduction <maximumf>, %29, %cst_15 [1] : vector<16x16xf32> to vector<16xf32>
    %31 = vector.shape_cast %30 : vector<16xf32> to vector<16x1xf32>
    %32 = vector.broadcast %31 : vector<16x1xf32> to vector<16x16xf32>
    %33 = arith.subf %29, %32 : vector<16x16xf32>
    %34 = math.exp %33 : vector<16x16xf32>
    %cst_16 = arith.constant dense<0.000000e+00> : vector<16xf32>
    %35 = vector.multi_reduction <add>, %34, %cst_16 [1] : vector<16x16xf32> to vector<16xf32>
    %36 = vector.shape_cast %35 : vector<16xf32> to vector<16x1xf32>
    %37 = tpu.reciprocal %36 {approx = true} : vector<16x1xf32> -> vector<16x1xf32>
    %38 = vector.broadcast %37 : vector<16x1xf32> to vector<16x16xf32>
    %39 = arith.mulf %34, %38 : vector<16x16xf32>
    %40 = arith.truncf %39 : vector<16x16xf32> to vector<16x16xbf16>
    %cst_17 = arith.constant dense<0.000000e+00> : vector<16x128xf32>
    %41 = tpu.matmul %40, %25, %cst_17 {dimension_numbers = #tpu.dot_dimension_numbers<[1], [0], [0], [1], [0, 0, 1, 1], [], []>} : vector<16x16xbf16>, vector<16x128xbf16>, vector<16x128xf32> -> vector<16x128xf32>
    %42 = arith.addf %20, %41 : vector<16x128xf32>
    %43 = vector.extract_strided_slice %19 {offsets = [1, 0], sizes = [1, 128], strides = [1, 1]} : vector<4x128xbf16> to vector<1x128xbf16>
    %44 = vector.broadcast %43 : vector<1x128xbf16> to vector<16x128xbf16>
    %45 = arith.mulf %15, %44 : vector<16x128xbf16>
    %46 = vector.broadcast %43 : vector<1x128xbf16> to vector<16x128xbf16>
    %47 = arith.mulf %17, %46 : vector<16x128xbf16>
    "tpu.trace_start"() <{level = 10 : i32, message = "qc,kc->qk"}> : () -> ()
    %cst_18 = arith.constant dense<0.000000e+00> : vector<16x16xf32>
    %48 = tpu.matmul %13, %45, %cst_18 {dimension_numbers = #tpu.dot_dimension_numbers<[1], [1], [0], [0], [0, 0, 1, 0], [], []>} : vector<16x128xbf16>, vector<16x128xbf16>, vector<16x16xf32> -> vector<16x16xf32>
    "tpu.trace_stop"() : () -> ()
    %cst_19 = arith.constant 0.176776692 : f32
    %49 = vector.broadcast %cst_19 : f32 to vector<16x16xf32>
    %50 = arith.mulf %48, %49 : vector<16x16xf32>
    %51 = arith.addf %50, %18 : vector<16x16xf32>
    %cst_20 = arith.constant dense<0xFF800000> : vector<16xf32>
    %52 = vector.multi_reduction <maximumf>, %51, %cst_20 [1] : vector<16x16xf32> to vector<16xf32>
    %53 = vector.shape_cast %52 : vector<16xf32> to vector<16x1xf32>
    %54 = vector.broadcast %53 : vector<16x1xf32> to vector<16x16xf32>
    %55 = arith.subf %51, %54 : vector<16x16xf32>
    %56 = math.exp %55 : vector<16x16xf32>
    %cst_21 = arith.constant dense<0.000000e+00> : vector<16xf32>
    %57 = vector.multi_reduction <add>, %56, %cst_21 [1] : vector<16x16xf32> to vector<16xf32>
    %58 = vector.shape_cast %57 : vector<16xf32> to vector<16x1xf32>
    %59 = tpu.reciprocal %58 {approx = true} : vector<16x1xf32> -> vector<16x1xf32>
    %60 = vector.broadcast %59 : vector<16x1xf32> to vector<16x16xf32>
    %61 = arith.mulf %56, %60 : vector<16x16xf32>
    %62 = arith.truncf %61 : vector<16x16xf32> to vector<16x16xbf16>
    %cst_22 = arith.constant dense<0.000000e+00> : vector<16x128xf32>
    %63 = tpu.matmul %62, %47, %cst_22 {dimension_numbers = #tpu.dot_dimension_numbers<[1], [0], [0], [1], [0, 0, 1, 1], [], []>} : vector<16x16xbf16>, vector<16x128xbf16>, vector<16x128xf32> -> vector<16x128xf32>
    %64 = arith.addf %42, %63 : vector<16x128xf32>
    %65 = vector.extract_strided_slice %19 {offsets = [2, 0], sizes = [1, 128], strides = [1, 1]} : vector<4x128xbf16> to vector<1x128xbf16>
    %66 = vector.broadcast %65 : vector<1x128xbf16> to vector<16x128xbf16>
    %67 = arith.mulf %15, %66 : vector<16x128xbf16>
    %68 = vector.broadcast %65 : vector<1x128xbf16> to vector<16x128xbf16>
    %69 = arith.mulf %17, %68 : vector<16x128xbf16>
    "tpu.trace_start"() <{level = 10 : i32, message = "qc,kc->qk"}> : () -> ()
    %cst_23 = arith.constant dense<0.000000e+00> : vector<16x16xf32>
    %70 = tpu.matmul %13, %67, %cst_23 {dimension_numbers = #tpu.dot_dimension_numbers<[1], [1], [0], [0], [0, 0, 1, 0], [], []>} : vector<16x128xbf16>, vector<16x128xbf16>, vector<16x16xf32> -> vector<16x16xf32>
    "tpu.trace_stop"() : () -> ()
    %cst_24 = arith.constant 0.176776692 : f32
    %71 = vector.broadcast %cst_24 : f32 to vector<16x16xf32>
    %72 = arith.mulf %70, %71 : vector<16x16xf32>
    %73 = arith.addf %72, %18 : vector<16x16xf32>
    %cst_25 = arith.constant dense<0xFF800000> : vector<16xf32>
    %74 = vector.multi_reduction <maximumf>, %73, %cst_25 [1] : vector<16x16xf32> to vector<16xf32>
    %75 = vector.shape_cast %74 : vector<16xf32> to vector<16x1xf32>
    %76 = vector.broadcast %75 : vector<16x1xf32> to vector<16x16xf32>
    %77 = arith.subf %73, %76 : vector<16x16xf32>
    %78 = math.exp %77 : vector<16x16xf32>
    %cst_26 = arith.constant dense<0.000000e+00> : vector<16xf32>
    %79 = vector.multi_reduction <add>, %78, %cst_26 [1] : vector<16x16xf32> to vector<16xf32>
    %80 = vector.shape_cast %79 : vector<16xf32> to vector<16x1xf32>
    %81 = tpu.reciprocal %80 {approx = true} : vector<16x1xf32> -> vector<16x1xf32>
    %82 = vector.broadcast %81 : vector<16x1xf32> to vector<16x16xf32>
    %83 = arith.mulf %78, %82 : vector<16x16xf32>
    %84 = arith.truncf %83 : vector<16x16xf32> to vector<16x16xbf16>
    %cst_27 = arith.constant dense<0.000000e+00> : vector<16x128xf32>
    %85 = tpu.matmul %84, %69, %cst_27 {dimension_numbers = #tpu.dot_dimension_numbers<[1], [0], [0], [1], [0, 0, 1, 1], [], []>} : vector<16x16xbf16>, vector<16x128xbf16>, vector<16x128xf32> -> vector<16x128xf32>
    %86 = arith.addf %64, %85 : vector<16x128xf32>
    %87 = vector.extract_strided_slice %19 {offsets = [3, 0], sizes = [1, 128], strides = [1, 1]} : vector<4x128xbf16> to vector<1x128xbf16>
    %88 = vector.broadcast %87 : vector<1x128xbf16> to vector<16x128xbf16>
    %89 = arith.mulf %15, %88 : vector<16x128xbf16>
    %90 = vector.broadcast %87 : vector<1x128xbf16> to vector<16x128xbf16>
    %91 = arith.mulf %17, %90 : vector<16x128xbf16>
    "tpu.trace_start"() <{level = 10 : i32, message = "qc,kc->qk"}> : () -> ()
    %cst_28 = arith.constant dense<0.000000e+00> : vector<16x16xf32>
    %92 = tpu.matmul %13, %89, %cst_28 {dimension_numbers = #tpu.dot_dimension_numbers<[1], [1], [0], [0], [0, 0, 1, 0], [], []>} : vector<16x128xbf16>, vector<16x128xbf16>, vector<16x16xf32> -> vector<16x16xf32>
    "tpu.trace_stop"() : () -> ()
    %cst_29 = arith.constant 0.176776692 : f32
    %93 = vector.broadcast %cst_29 : f32 to vector<16x16xf32>
    %94 = arith.mulf %92, %93 : vector<16x16xf32>
    %95 = arith.addf %94, %18 : vector<16x16xf32>
    %cst_30 = arith.constant dense<0xFF800000> : vector<16xf32>
    %96 = vector.multi_reduction <maximumf>, %95, %cst_30 [1] : vector<16x16xf32> to vector<16xf32>
    %97 = vector.shape_cast %96 : vector<16xf32> to vector<16x1xf32>
    %98 = vector.broadcast %97 : vector<16x1xf32> to vector<16x16xf32>
    %99 = arith.subf %95, %98 : vector<16x16xf32>
    %100 = math.exp %99 : vector<16x16xf32>
    %cst_31 = arith.constant dense<0.000000e+00> : vector<16xf32>
    %101 = vector.multi_reduction <add>, %100, %cst_31 [1] : vector<16x16xf32> to vector<16xf32>
    %102 = vector.shape_cast %101 : vector<16xf32> to vector<16x1xf32>
    %103 = tpu.reciprocal %102 {approx = true} : vector<16x1xf32> -> vector<16x1xf32>
    %104 = vector.broadcast %103 : vector<16x1xf32> to vector<16x16xf32>
    %105 = arith.mulf %100, %104 : vector<16x16xf32>
    %106 = arith.truncf %105 : vector<16x16xf32> to vector<16x16xbf16>
    %cst_32 = arith.constant dense<0.000000e+00> : vector<16x128xf32>
    %107 = tpu.matmul %106, %91, %cst_32 {dimension_numbers = #tpu.dot_dimension_numbers<[1], [0], [0], [1], [0, 0, 1, 1], [], []>} : vector<16x16xbf16>, vector<16x128xbf16>, vector<16x128xf32> -> vector<16x128xf32>
    %108 = arith.addf %86, %107 : vector<16x128xf32>
    %109 = arith.truncf %108 : vector<16x128xf32> to vector<16x128xbf16>
    %c0_33 = arith.constant 0 : index
    %c0_34 = arith.constant 0 : index
    %c0_35 = arith.constant 0 : index
    %110 = vector.load %arg7[%c0_33, %c0_34, %c0_35] : memref<1x128x128xbf16, #tpu.memory_space<vmem>>, vector<1x128x128xbf16>
    %111 = vector.shape_cast %110 : vector<1x128x128xbf16> to vector<128x128xbf16>
    %cst_36 = arith.constant dense<0.000000e+00> : vector<16x128xf32>
    %112 = tpu.matmul %109, %111, %cst_36 {dimension_numbers = #tpu.dot_dimension_numbers<[1], [0], [0], [1], [0, 0, 1, 1], [], []>} : vector<16x128xbf16>, vector<128x128xbf16>, vector<16x128xf32> -> vector<16x128xf32>
    %c0_37 = arith.constant 0 : index
    %c0_38 = arith.constant 0 : index
    %c384 = arith.constant 384 : index
    %113 = vector.load %arg10[%c0_37, %c0_38, %c384] : memref<1x1x3200xf32, #tpu.memory_space<vmem>>, vector<1x1x128xf32>
    %114 = vector.shape_cast %113 : vector<1x1x128xf32> to vector<1x128xf32>
    %115 = vector.broadcast %114 : vector<1x128xf32> to vector<16x128xf32>
    %116 = arith.addf %112, %115 : vector<16x128xf32>
    %117 = arith.addf %3, %116 : vector<16x128xf32>
    %c0_39 = arith.constant 0 : index
    %c0_40 = arith.constant 0 : index
    %c512 = arith.constant 512 : index
    %118 = vector.load %arg10[%c0_39, %c0_40, %c512] : memref<1x1x3200xf32, #tpu.memory_space<vmem>>, vector<1x1x128xf32>
    %119 = vector.shape_cast %118 : vector<1x1x128xf32> to vector<1x128xf32>
    %c0_41 = arith.constant 0 : index
    %c0_42 = arith.constant 0 : index
    %c640 = arith.constant 640 : index
    %120 = vector.load %arg10[%c0_41, %c0_42, %c640] : memref<1x1x3200xf32, #tpu.memory_space<vmem>>, vector<1x1x128xf32>
    %121 = vector.shape_cast %120 : vector<1x1x128xf32> to vector<1x128xf32>
    %cst_43 = arith.constant dense<0.000000e+00> : vector<16xf32>
    %122 = vector.multi_reduction <add>, %117, %cst_43 [1] : vector<16x128xf32> to vector<16xf32>
    %123 = vector.shape_cast %122 : vector<16xf32> to vector<16x1xf32>
    %cst_44 = arith.constant 1.280000e+02 : f32
    %124 = vector.broadcast %cst_44 : f32 to vector<16x1xf32>
    %125 = arith.divf %123, %124 : vector<16x1xf32>
    %126 = vector.broadcast %125 : vector<16x1xf32> to vector<16x128xf32>
    %127 = arith.subf %117, %126 : vector<16x128xf32>
    %128 = arith.mulf %127, %127 : vector<16x128xf32>
    %cst_45 = arith.constant dense<0.000000e+00> : vector<16xf32>
    %129 = vector.multi_reduction <add>, %128, %cst_45 [1] : vector<16x128xf32> to vector<16xf32>
    %130 = vector.shape_cast %129 : vector<16xf32> to vector<16x1xf32>
    %cst_46 = arith.constant 1.280000e+02 : f32
    %131 = vector.broadcast %cst_46 : f32 to vector<16x1xf32>
    %132 = arith.divf %130, %131 : vector<16x1xf32>
    %133 = vector.broadcast %125 : vector<16x1xf32> to vector<16x128xf32>
    %134 = arith.subf %117, %133 : vector<16x128xf32>
    %cst_47 = arith.constant 9.99999974E-6 : f32
    %135 = vector.broadcast %cst_47 : f32 to vector<16x1xf32>
    %136 = arith.addf %132, %135 : vector<16x1xf32>
    %137 = math.rsqrt %136 : vector<16x1xf32>
    %138 = vector.broadcast %137 : vector<16x1xf32> to vector<16x128xf32>
    %139 = arith.mulf %134, %138 : vector<16x128xf32>
    %140 = vector.broadcast %119 : vector<1x128xf32> to vector<16x128xf32>
    %141 = arith.mulf %139, %140 : vector<16x128xf32>
    %142 = vector.broadcast %121 : vector<1x128xf32> to vector<16x128xf32>
    %143 = arith.addf %141, %142 : vector<16x128xf32>
    %144 = arith.truncf %143 : vector<16x128xf32> to vector<16x128xbf16>
    %cst_48 = arith.constant 0.000000e+00 : f32
    %145 = vector.broadcast %cst_48 : f32 to vector<16x128xf32>
    %c0_49 = arith.constant 0 : index
    %c0_50 = arith.constant 0 : index
    %c0_51 = arith.constant 0 : index
    %146 = vector.load %arg8[%c0_49, %c0_50, %c0_51] : memref<1x128x2048xbf16, #tpu.memory_space<vmem>>, vector<1x128x512xbf16>
    %147 = vector.shape_cast %146 : vector<1x128x512xbf16> to vector<128x512xbf16>
    %cst_52 = arith.constant dense<0.000000e+00> : vector<16x512xf32>
    %148 = tpu.matmul %144, %147, %cst_52 {dimension_numbers = #tpu.dot_dimension_numbers<[1], [0], [0], [1], [0, 0, 1, 1], [], []>} : vector<16x128xbf16>, vector<128x512xbf16>, vector<16x512xf32> -> vector<16x512xf32>
    %c0_53 = arith.constant 0 : index
    %c0_54 = arith.constant 0 : index
    %c768 = arith.constant 768 : index
    %149 = vector.load %arg10[%c0_53, %c0_54, %c768] : memref<1x1x3200xf32, #tpu.memory_space<vmem>>, vector<1x1x512xf32>
    %150 = vector.shape_cast %149 : vector<1x1x512xf32> to vector<1x512xf32>
    %151 = vector.broadcast %150 : vector<1x512xf32> to vector<16x512xf32>
    %152 = arith.addf %148, %151 : vector<16x512xf32>
    %cst_55 = arith.constant 0.000000e+00 : f32
    %153 = vector.broadcast %cst_55 : f32 to vector<16x512xf32>
    %154 = arith.maximumf %152, %153 : vector<16x512xf32>
    %155 = arith.truncf %154 : vector<16x512xf32> to vector<16x512xbf16>
    %c0_56 = arith.constant 0 : index
    %c0_57 = arith.constant 0 : index
    %c0_58 = arith.constant 0 : index
    %156 = vector.load %arg9[%c0_56, %c0_57, %c0_58] : memref<1x2048x128xbf16, #tpu.memory_space<vmem>>, vector<1x512x128xbf16>
    %157 = vector.shape_cast %156 : vector<1x512x128xbf16> to vector<512x128xbf16>
    %cst_59 = arith.constant dense<0.000000e+00> : vector<16x128xf32>
    %158 = tpu.matmul %155, %157, %cst_59 {dimension_numbers = #tpu.dot_dimension_numbers<[1], [0], [0], [1], [0, 0, 1, 1], [], []>} : vector<16x512xbf16>, vector<512x128xbf16>, vector<16x128xf32> -> vector<16x128xf32>
    %159 = arith.addf %145, %158 : vector<16x128xf32>
    %c0_60 = arith.constant 0 : index
    %c0_61 = arith.constant 0 : index
    %c512_62 = arith.constant 512 : index
    %160 = vector.load %arg8[%c0_60, %c0_61, %c512_62] : memref<1x128x2048xbf16, #tpu.memory_space<vmem>>, vector<1x128x512xbf16>
    %161 = vector.shape_cast %160 : vector<1x128x512xbf16> to vector<128x512xbf16>
    %cst_63 = arith.constant dense<0.000000e+00> : vector<16x512xf32>
    %162 = tpu.matmul %144, %161, %cst_63 {dimension_numbers = #tpu.dot_dimension_numbers<[1], [0], [0], [1], [0, 0, 1, 1], [], []>} : vector<16x128xbf16>, vector<128x512xbf16>, vector<16x512xf32> -> vector<16x512xf32>
    %c0_64 = arith.constant 0 : index
    %c0_65 = arith.constant 0 : index
    %c1280 = arith.constant 1280 : index
    %163 = vector.load %arg10[%c0_64, %c0_65, %c1280] : memref<1x1x3200xf32, #tpu.memory_space<vmem>>, vector<1x1x512xf32>
    %164 = vector.shape_cast %163 : vector<1x1x512xf32> to vector<1x512xf32>
    %165 = vector.broadcast %164 : vector<1x512xf32> to vector<16x512xf32>
    %166 = arith.addf %162, %165 : vector<16x512xf32>
    %cst_66 = arith.constant 0.000000e+00 : f32
    %167 = vector.broadcast %cst_66 : f32 to vector<16x512xf32>
    %168 = arith.maximumf %166, %167 : vector<16x512xf32>
    %169 = arith.truncf %168 : vector<16x512xf32> to vector<16x512xbf16>
    %c0_67 = arith.constant 0 : index
    %c512_68 = arith.constant 512 : index
    %c0_69 = arith.constant 0 : index
    %170 = vector.load %arg9[%c0_67, %c512_68, %c0_69] : memref<1x2048x128xbf16, #tpu.memory_space<vmem>>, vector<1x512x128xbf16>
    %171 = vector.shape_cast %170 : vector<1x512x128xbf16> to vector<512x128xbf16>
    %cst_70 = arith.constant dense<0.000000e+00> : vector<16x128xf32>
    %172 = tpu.matmul %169, %171, %cst_70 {dimension_numbers = #tpu.dot_dimension_numbers<[1], [0], [0], [1], [0, 0, 1, 1], [], []>} : vector<16x512xbf16>, vector<512x128xbf16>, vector<16x128xf32> -> vector<16x128xf32>
    %173 = arith.addf %159, %172 : vector<16x128xf32>
    %c0_71 = arith.constant 0 : index
    %c0_72 = arith.constant 0 : index
    %c1024 = arith.constant 1024 : index
    %174 = vector.load %arg8[%c0_71, %c0_72, %c1024] : memref<1x128x2048xbf16, #tpu.memory_space<vmem>>, vector<1x128x512xbf16>
    %175 = vector.shape_cast %174 : vector<1x128x512xbf16> to vector<128x512xbf16>
    %cst_73 = arith.constant dense<0.000000e+00> : vector<16x512xf32>
    %176 = tpu.matmul %144, %175, %cst_73 {dimension_numbers = #tpu.dot_dimension_numbers<[1], [0], [0], [1], [0, 0, 1, 1], [], []>} : vector<16x128xbf16>, vector<128x512xbf16>, vector<16x512xf32> -> vector<16x512xf32>
    %c0_74 = arith.constant 0 : index
    %c0_75 = arith.constant 0 : index
    %c1792 = arith.constant 1792 : index
    %177 = vector.load %arg10[%c0_74, %c0_75, %c1792] : memref<1x1x3200xf32, #tpu.memory_space<vmem>>, vector<1x1x512xf32>
    %178 = vector.shape_cast %177 : vector<1x1x512xf32> to vector<1x512xf32>
    %179 = vector.broadcast %178 : vector<1x512xf32> to vector<16x512xf32>
    %180 = arith.addf %176, %179 : vector<16x512xf32>
    %cst_76 = arith.constant 0.000000e+00 : f32
    %181 = vector.broadcast %cst_76 : f32 to vector<16x512xf32>
    %182 = arith.maximumf %180, %181 : vector<16x512xf32>
    %183 = arith.truncf %182 : vector<16x512xf32> to vector<16x512xbf16>
    %c0_77 = arith.constant 0 : index
    %c1024_78 = arith.constant 1024 : index
    %c0_79 = arith.constant 0 : index
    %184 = vector.load %arg9[%c0_77, %c1024_78, %c0_79] : memref<1x2048x128xbf16, #tpu.memory_space<vmem>>, vector<1x512x128xbf16>
    %185 = vector.shape_cast %184 : vector<1x512x128xbf16> to vector<512x128xbf16>
    %cst_80 = arith.constant dense<0.000000e+00> : vector<16x128xf32>
    %186 = tpu.matmul %183, %185, %cst_80 {dimension_numbers = #tpu.dot_dimension_numbers<[1], [0], [0], [1], [0, 0, 1, 1], [], []>} : vector<16x512xbf16>, vector<512x128xbf16>, vector<16x128xf32> -> vector<16x128xf32>
    %187 = arith.addf %173, %186 : vector<16x128xf32>
    %c0_81 = arith.constant 0 : index
    %c0_82 = arith.constant 0 : index
    %c1536 = arith.constant 1536 : index
    %188 = vector.load %arg8[%c0_81, %c0_82, %c1536] : memref<1x128x2048xbf16, #tpu.memory_space<vmem>>, vector<1x128x512xbf16>
    %189 = vector.shape_cast %188 : vector<1x128x512xbf16> to vector<128x512xbf16>
    %cst_83 = arith.constant dense<0.000000e+00> : vector<16x512xf32>
    %190 = tpu.matmul %144, %189, %cst_83 {dimension_numbers = #tpu.dot_dimension_numbers<[1], [0], [0], [1], [0, 0, 1, 1], [], []>} : vector<16x128xbf16>, vector<128x512xbf16>, vector<16x512xf32> -> vector<16x512xf32>
    %c0_84 = arith.constant 0 : index
    %c0_85 = arith.constant 0 : index
    %c2304 = arith.constant 2304 : index
    %191 = vector.load %arg10[%c0_84, %c0_85, %c2304] : memref<1x1x3200xf32, #tpu.memory_space<vmem>>, vector<1x1x512xf32>
    %192 = vector.shape_cast %191 : vector<1x1x512xf32> to vector<1x512xf32>
    %193 = vector.broadcast %192 : vector<1x512xf32> to vector<16x512xf32>
    %194 = arith.addf %190, %193 : vector<16x512xf32>
    %cst_86 = arith.constant 0.000000e+00 : f32
    %195 = vector.broadcast %cst_86 : f32 to vector<16x512xf32>
    %196 = arith.maximumf %194, %195 : vector<16x512xf32>
    %197 = arith.truncf %196 : vector<16x512xf32> to vector<16x512xbf16>
    %c0_87 = arith.constant 0 : index
    %c1536_88 = arith.constant 1536 : index
    %c0_89 = arith.constant 0 : index
    %198 = vector.load %arg9[%c0_87, %c1536_88, %c0_89] : memref<1x2048x128xbf16, #tpu.memory_space<vmem>>, vector<1x512x128xbf16>
    %199 = vector.shape_cast %198 : vector<1x512x128xbf16> to vector<512x128xbf16>
    %cst_90 = arith.constant dense<0.000000e+00> : vector<16x128xf32>
    %200 = tpu.matmul %197, %199, %cst_90 {dimension_numbers = #tpu.dot_dimension_numbers<[1], [0], [0], [1], [0, 0, 1, 1], [], []>} : vector<16x512xbf16>, vector<512x128xbf16>, vector<16x128xf32> -> vector<16x128xf32>
    %201 = arith.addf %187, %200 : vector<16x128xf32>
    %c0_91 = arith.constant 0 : index
    %c0_92 = arith.constant 0 : index
    %c2816 = arith.constant 2816 : index
    %202 = vector.load %arg10[%c0_91, %c0_92, %c2816] : memref<1x1x3200xf32, #tpu.memory_space<vmem>>, vector<1x1x128xf32>
    %203 = vector.shape_cast %202 : vector<1x1x128xf32> to vector<1x128xf32>
    %204 = vector.broadcast %203 : vector<1x128xf32> to vector<16x128xf32>
    %205 = arith.addf %201, %204 : vector<16x128xf32>
    %206 = arith.addf %143, %205 : vector<16x128xf32>
    %c0_93 = arith.constant 0 : index
    %c0_94 = arith.constant 0 : index
    %c2944 = arith.constant 2944 : index
    %207 = vector.load %arg10[%c0_93, %c0_94, %c2944] : memref<1x1x3200xf32, #tpu.memory_space<vmem>>, vector<1x1x128xf32>
    %208 = vector.shape_cast %207 : vector<1x1x128xf32> to vector<1x128xf32>
    %c0_95 = arith.constant 0 : index
    %c0_96 = arith.constant 0 : index
    %c3072 = arith.constant 3072 : index
    %209 = vector.load %arg10[%c0_95, %c0_96, %c3072] : memref<1x1x3200xf32, #tpu.memory_space<vmem>>, vector<1x1x128xf32>
    %210 = vector.shape_cast %209 : vector<1x1x128xf32> to vector<1x128xf32>
    %cst_97 = arith.constant dense<0.000000e+00> : vector<16xf32>
    %211 = vector.multi_reduction <add>, %206, %cst_97 [1] : vector<16x128xf32> to vector<16xf32>
    %212 = vector.shape_cast %211 : vector<16xf32> to vector<16x1xf32>
    %cst_98 = arith.constant 1.280000e+02 : f32
    %213 = vector.broadcast %cst_98 : f32 to vector<16x1xf32>
    %214 = arith.divf %212, %213 : vector<16x1xf32>
    %215 = vector.broadcast %214 : vector<16x1xf32> to vector<16x128xf32>
    %216 = arith.subf %206, %215 : vector<16x128xf32>
    %217 = arith.mulf %216, %216 : vector<16x128xf32>
    %cst_99 = arith.constant dense<0.000000e+00> : vector<16xf32>
    %218 = vector.multi_reduction <add>, %217, %cst_99 [1] : vector<16x128xf32> to vector<16xf32>
    %219 = vector.shape_cast %218 : vector<16xf32> to vector<16x1xf32>
    %cst_100 = arith.constant 1.280000e+02 : f32
    %220 = vector.broadcast %cst_100 : f32 to vector<16x1xf32>
    %221 = arith.divf %219, %220 : vector<16x1xf32>
    %222 = vector.broadcast %214 : vector<16x1xf32> to vector<16x128xf32>
    %223 = arith.subf %206, %222 : vector<16x128xf32>
    %cst_101 = arith.constant 9.99999974E-6 : f32
    %224 = vector.broadcast %cst_101 : f32 to vector<16x1xf32>
    %225 = arith.addf %221, %224 : vector<16x1xf32>
    %226 = math.rsqrt %225 : vector<16x1xf32>
    %227 = vector.broadcast %226 : vector<16x1xf32> to vector<16x128xf32>
    %228 = arith.mulf %223, %227 : vector<16x128xf32>
    %229 = vector.broadcast %208 : vector<1x128xf32> to vector<16x128xf32>
    %230 = arith.mulf %228, %229 : vector<16x128xf32>
    %231 = vector.broadcast %210 : vector<1x128xf32> to vector<16x128xf32>
    %232 = arith.addf %230, %231 : vector<16x128xf32>
    %c0_102 = arith.constant 0 : index
    %c0_103 = arith.constant 0 : index
    %233 = vector.load %arg12[%c0_102, %c0_103] : memref<16x128xf32, #tpu.memory_space<vmem>>, vector<16x128xf32>
    tpu.vector_store %arg12[%c0_102, %c0_103], %232 {strides = array<i32>} : memref<16x128xf32, #tpu.memory_space<vmem>>, vector<16x128xf32>,
    %c2_i32 = arith.constant 2 : i32
    %234 = arith.cmpi eq, %arg0, %c2_i32 : i32
    %235 = arith.extui %234 : i1 to i32
    %c0_i32_104 = arith.constant 0 : i32
    %236 = arith.cmpi ne, %235, %c0_i32_104 : i32
    scf.if %236 {
      %237 = vector.extract_strided_slice %232 {offsets = [0, 0], sizes = [8, 128], strides = [1, 1]} : vector<16x128xf32> to vector<8x128xf32>
      %cst_105 = arith.constant dense<0.000000e+00> : vector<128xf32>
      %238 = vector.multi_reduction <add>, %237, %cst_105 [0] : vector<8x128xf32> to vector<128xf32>
      %239 = vector.shape_cast %238 : vector<128xf32> to vector<1x128xf32>
      %240 = vector.extract_strided_slice %232 {offsets = [8, 0], sizes = [8, 128], strides = [1, 1]} : vector<16x128xf32> to vector<8x128xf32>
      %cst_106 = arith.constant dense<0.000000e+00> : vector<128xf32>
      %241 = vector.multi_reduction <add>, %240, %cst_106 [0] : vector<8x128xf32> to vector<128xf32>
      %242 = vector.shape_cast %241 : vector<128xf32> to vector<1x128xf32>
      %243 = tpu.concatenate %239, %242 in 0 : vector<1x128xf32>, vector<1x128xf32> -> vector<2x128xf32>
      %cst_107 = arith.constant 1.250000e-01 : f32
      %244 = vector.broadcast %cst_107 : f32 to vector<2x128xf32>
      %245 = arith.mulf %243, %244 : vector<2x128xf32>
      %c0_108 = arith.constant 0 : index
      %c0_109 = arith.constant 0 : index
      %246 = vector.load %arg11[%c0_108, %c0_109] : memref<2x128xf32, #tpu.memory_space<vmem>>, vector<2x128xf32>
      tpu.vector_store %arg11[%c0_108, %c0_109], %245 {strides = array<i32>} : memref<2x128xf32, #tpu.memory_space<vmem>>, vector<2x128xf32>,
    } else {
    }
    return
  }
  func.func @transform_0(%arg0: i32) -> (i32, i32) {
    %c0_i32 = arith.constant 0 : i32
    %c0_i32_0 = arith.constant 0 : i32
    %c0_i32_1 = arith.constant 0 : i32
    return %c0_i32, %c0_i32_0 : i32, i32
  }
  func.func @transform_1(%arg0: i32) -> (i32, i32) {
    %c0_i32 = arith.constant 0 : i32
    %c0_i32_0 = arith.constant 0 : i32
    %c0_i32_1 = arith.constant 0 : i32
    return %c0_i32, %c0_i32_0 : i32, i32
  }
  func.func @transform_2(%arg0: i32) -> (i32, i32) {
    %c0_i32 = arith.constant 0 : i32
    %c0_i32_0 = arith.constant 0 : i32
    %c0_i32_1 = arith.constant 0 : i32
    return %c0_i32, %c0_i32_0 : i32, i32
  }
  func.func @transform_3(%arg0: i32) -> (i32, i32) {
    %c0_i32 = arith.constant 0 : i32
    %c0_i32_0 = arith.constant 0 : i32
    %c0_i32_1 = arith.constant 0 : i32
    return %c0_i32, %c0_i32_0 : i32, i32
  }
  func.func @transform_4(%arg0: i32) -> (i32, i32) {
    %c0_i32 = arith.constant 0 : i32
    %c0_i32_0 = arith.constant 0 : i32
    %c0_i32_1 = arith.constant 0 : i32
    return %c0_i32, %c0_i32_0 : i32, i32
  }
  func.func @transform_5(%arg0: i32) -> (i32, i32, i32) {
    %c0_i32 = arith.constant 0 : i32
    %c0_i32_0 = arith.constant 0 : i32
    %c0_i32_1 = arith.constant 0 : i32
    return %arg0, %c0_i32, %c0_i32_0 : i32, i32, i32
  }
  func.func @transform_6(%arg0: i32) -> (i32, i32, i32) {
    %c0_i32 = arith.constant 0 : i32
    %c0_i32_0 = arith.constant 0 : i32
    %c0_i32_1 = arith.constant 0 : i32
    return %arg0, %c0_i32, %c0_i32_0 : i32, i32, i32
  }
  func.func @transform_7(%arg0: i32) -> (i32, i32, i32) {
    %c0_i32 = arith.constant 0 : i32
    %c0_i32_0 = arith.constant 0 : i32
    %c0_i32_1 = arith.constant 0 : i32
    return %arg0, %c0_i32, %c0_i32_0 : i32, i32, i32
  }
  func.func @transform_8(%arg0: i32) -> (i32, i32, i32) {
    %c0_i32 = arith.constant 0 : i32
    %c0_i32_0 = arith.constant 0 : i32
    %c0_i32_1 = arith.constant 0 : i32
    return %arg0, %c0_i32, %c0_i32_0 : i32, i32, i32
  }
  func.func @transform_9(%arg0: i32) -> (i32, i32, i32) {
    %c0_i32 = arith.constant 0 : i32
    %c0_i32_0 = arith.constant 0 : i32
    %c0_i32_1 = arith.constant 0 : i32
    return %arg0, %c0_i32, %c0_i32_0 : i32, i32, i32
  }
  func.func @transform_10(%arg0: i32) -> (i32, i32) {
    %c0_i32 = arith.constant 0 : i32
    %c0_i32_0 = arith.constant 0 : i32
    %c0_i32_1 = arith.constant 0 : i32
    return %c0_i32, %c0_i32_0 : i32, i32
  }
}

</mosaic_0001>

<bundles_post_ra>
// kernel: eq.15
= control target key start
LH: loop header
LB: loop body
LE: loop exit
PB: predicated region body
PF: predicated region fallthrough
CT: control target
= control target key end

     0   :  { %vm8_vm0 = vcmask 64512   ;;  %vm14_vm1 = vcmask 130112   ;;  %s42_s0 = inlined_call_operand.vmem [shape: s32[2,8], index: 0, kind: input, shape index: {}]   ;;  %s43_s1 = inlined_call_operand.vmem [shape: s32[16], index: 1, kind: output, shape index: {}]  }
   0x1   :  { %v5_v0 = vld [vmem:[%s42_s0] sm:$0x3]  ;;  %s25_s0 = smov 8  }
   0x2   :  { %6 = vst [vmem:[#allocation1] sm:$0x3] %v5_v0 }
   0x9   :  { %v11_v1 = vld [vmem:[#allocation1 + $0x1] sm:$0x1]   ;;  %v7_v2 = vld [vmem:[#allocation1] sm:$0x1]  }
   0xa   :  { %12 = vrot.lane.b32.xlu0 %v11_v1, %s25_s0  ;;  %9 = vst.msk [vmem:[#allocation0] sm:$0x1] %vm8_vm0, %v7_v2  }
  0x7c   :  { %v13_v3 = vpop.permute.xlu0 %12  }
  0x7d   :  { %15 = vst.msk [vmem:[#allocation0] sm:$0x1] %vm14_vm1, %v13_v3  }
  0x84   :  { %v20_v4 = vld [vmem:[#allocation0] sm:$0x1] }
  0x85   :  { %23 = vst [vmem:[%s43_s1] sm:$0x1] %v20_v4 }

// kernel: transformer_encoder_forward.1
= control target key start
LH: loop header
LB: loop body
LE: loop exit
PB: predicated region body
PF: predicated region fallthrough
CT: control target
= control target key end

     0   :  { %s6350_s0 = inlined_call_operand.vmem [shape: f32[16,4], index: 0, kind: input, shape index: {}]   ;;  %s6351_s1 = inlined_call_operand.vmem [shape: f32[16,128], index: 1, kind: input, shape index: {}]   ;;  %s6352_s2 = inlined_call_operand.hbm [shape: f32[4,128], index: 2, kind: input, shape index: {}]   ;;  %s6353_s3 = inlined_call_operand.vmem [shape: f32[16,16], index: 3, kind: input, shape index: {}]   ;;  %s6354_s4 = inlined_call_operand.vmem [shape: bf16[4,128], index: 4, kind: input, shape index: {}]   ;;  %s6355_s5 = inlined_call_operand.hbm [shape: bf16[3,128,384], index: 5, kind: input, shape index: {}]   ;;  %s6356_s6 = inlined_call_operand.hbm [shape: bf16[3,128,128], index: 6, kind: input, shape index: {}]   ;;  %s6357_s7 = inlined_call_operand.hbm [shape: bf16[3,128,2048], index: 7, kind: input, shape index: {}]   ;;  %s6358_s8 = inlined_call_operand.hbm [shape: bf16[3,2048,128], index: 8, kind: input, shape index: {}]   ;;  %s6359_s9 = inlined_call_operand.vmem [shape: f32[3,1,3200], index: 9, kind: input, shape index: {}]   ;;  %s6360_s10 = inlined_call_operand.hbm [shape: f32[2,128], index: 10, kind: output, shape index: {}]  }
   0x1   :  { %6370 = sst [smem:[#allocation20_spill]] %s6355_s5 }
   0x2   :  { %6371 = sst [smem:[#allocation21_spill]] %s6357_s7 }
   0x3   :  { %15 = vsyncpa [#allocation4], 0 }
   0x4   :  { %16 = vsyncpa [#allocation7], 0 }
   0x5   :  { %18 = vsyncpa [#allocation7 + $0x1], 0 }
   0x6   :  { %19 = vsyncpa [#allocation10], 0 }
   0x7   :  { %21 = vsyncpa [#allocation10 + $0x1], 0 }
   0x8   :  { %22 = vsyncpa [#allocation5], 0  ;;  %s5547_s13 = smov 0   ;;  %s5549_s14 = smov 0  }
   0x9   :  { %s5551_s15 = smov 0   ;;  %s5553_s16 = smov 0  }
   0xa LB: > { %6372 = sst [smem:[#allocation17_spill]] %s5472_s15  ;;  %s5568_s17 = sadd.s32 1, %s5476_s16   ;;  %s5476_s16 = sphi %s5553_s16, %s6389_s16   ;;  %s5472_s15 = sphi %s5551_s15, %s6391_s15   ;;  %s5468_s14 = sphi %s5549_s14, %s6393_s14   ;;  %s5464_s13 = sphi %s5547_s13, %s6392_s13  }
   0xb   : > { %6373 = sst [smem:[#allocation18_spill]] %s5568_s17  ;;  %s140_s18 = sadd.s32 1, %s5472_s15 }
   0xc   : > { %s137_s19 = ssub.s32 %s5476_s16, %s5568_s17  ;;  %p147_p0 = scmp.ne.s32.totalorder %s5472_s15, %s5468_s14 }
   0xd   : > { %p138_p1 = scmp.eq.s32.totalorder %s137_s19, 0  ;;  %p148_p2 = scmp.eq.s32.totalorder %s5476_s16, 0 }
   0xe   : > { %p5012_p3 = scmp.lt.s32.totalorder %s5476_s16, 3  ;;  %s6361_s21 = sand.u32 1, %s5476_s16  }
   0xf   : > { %s5578_s20 = scalar_select %p138_p1, %s5472_s15, %s140_s18  }
  0x10   : > { %p149_p4 = por %p148_p2, %p147_p0  ;;  %s5582_s22 = sand.u32 1, %s5472_s15  }
  0x11   : > { %6374 = sst [smem:[#allocation19_spill]] %s5578_s20  ;;  %s4974_s23 = smul.u32 192, %s5582_s22 }
  0x12   : > { %p5585_p5 = pnand %p5012_p3, %p149_p4  ;;  %s4975_s25 = smul.u32 3072, %s5476_s16 }
  0x13   : > { %s6376_s5 = sld [smem:[#allocation20_spill]]  ;;  %s329_s29 = scalar_lea.vmem [#allocation6], %s4974_s23 }
  0x14   : > { %s336_s30 = sshll.u32 %s329_s29, 4  ;;  %s5599_s11 = scalar_lea.sflag [#allocation7], %s6361_s21  ;;  %s5595_s30 = int_to_ptr.vmem [resolvable:$true] %s336_s30 }
  0x15   : > { %p5605_p7 = pneg %p5585_p5 }
  0x19   : > { %s5593_s28 = scalar_lea.hbm %s6376_s5, %s4975_s25  ;;  %s5273_s23 = scalar_lea.hbm %s6376_s5, 9216 }
  0x1a   : > { %s5268_s12 = scalar_lea.hbm %s5593_s28, 3072  ;;  %p5274_p10 = scmp.lt.s32.totalorder %s5593_s28, %s6376_s5 }
  0x1b   : > { %p5269_p6 = scmp.ne.s32.totalorder %s5593_s28, %s5268_s12  ;;  %p5275_p11 = scmp.lt.s32.totalorder %s5273_s23, %s5268_s12 }
  0x1d   : > { %p5271_p8 = pnand %p5605_p7, %p5269_p6  ;;  %p5276_p12 = por %p5275_p11, %p5274_p10 }
  0x1f   : > { %p5272_p9 = pneg %p5271_p8 }
  0x21   : > { %p5277_p13 = pnand %p5276_p12, %p5272_p9 }
  0x23   : > { %5280 = shalt.err (!%p5277_p13)
}
  0x24   : > { %s5281_s29 = scalar_lea.vmem %s5595_s30, 3072  ;;  %s5478_s21 = smov [#allocation6]  }
  0x25   : > { %p5282_p0 = scmp.ne.s32.totalorder %s5595_s30, %s5281_s29  ;;  %s5286_s19 = sshll.u32 %s5478_s21, 4  ;;  %s5287_s19 = int_to_ptr.vmem [resolvable:$false] %s5286_s19 }
  0x26   : > { %s5288_s25 = scalar_lea.vmem %s5287_s19, 6144  ;;  %p5289_p3 = scmp.lt.s32.totalorder %s5595_s30, %s5287_s19 }
  0x27   : > { %p5284_p1 = pnand %p5282_p0, %p5605_p7  ;;  %p5290_p4 = scmp.lt.s32.totalorder %s5288_s25, %s5281_s29 }
  0x29   : > { %p5285_p2 = pneg %p5284_p1  ;;  %p5291_p6 = por %p5290_p4, %p5289_p3 }
  0x2b   : > { %p5292_p8 = pnand %p5291_p6, %p5285_p2 }
  0x2d   : > { %5295 = shalt.err (!%p5292_p8)
}
  0x2e   : > { %s5479_s12 = smov 192   ;;  %s5480_s23 = smov 12  }
  0x2f   : > { %5001 = dma.hbm_to_vmem [thread:$0]  (!%p5585_p5), %s5593_s28, 3072, %s5595_s30, %s5599_s11, %s5479_s12, %s5479_s12, %s5480_s23  }
  0x30   : > { %s4347_s21 = sshll.u32 %s5582_s22, 10  ;;  %s4666_s26 = sshll.u32 %s5476_s16, 14 }
  0x31   : > { %s6378_s7 = sld [smem:[#allocation21_spill]]  ;;  %s371_s25 = scalar_lea.vmem [#allocation9], %s4347_s21 }
  0x32   : > { %s378_s5 = sshll.u32 %s371_s25, 4  ;;  %s6379_s20 = sand.u32 1, %s5476_s16   ;;  %s5639_s5 = int_to_ptr.vmem [resolvable:$true] %s378_s5 }
  0x33   : > { %s5643_s15 = scalar_lea.sflag [#allocation10], %s6379_s20 }
  0x37   : > { %s5635_s19 = scalar_lea.hbm %s6378_s7, %s4666_s26  ;;  %s5301_s23 = scalar_lea.hbm %s6378_s7, 49152 }
  0x38   : > { %s5296_s28 = scalar_lea.hbm %s5635_s19, 16384  ;;  %p5302_p12 = scmp.lt.s32.totalorder %s5635_s19, %s6378_s7 }
  0x39   : > { %p5297_p9 = scmp.ne.s32.totalorder %s5635_s19, %s5296_s28  ;;  %p5303_p13 = scmp.lt.s32.totalorder %s5301_s23, %s5296_s28 }
  0x3b   : > { %p5299_p10 = pnand %p5297_p9, %p5605_p7  ;;  %p5304_p0 = por %p5303_p13, %p5302_p12 }
  0x3d   : > { %p5300_p11 = pneg %p5299_p10 }
  0x3f   : > { %p5305_p1 = pnand %p5304_p0, %p5300_p11 }
  0x41   : > { %5308 = shalt.err (!%p5305_p1)
}
  0x42   : > { %s5309_s20 = scalar_lea.vmem %s5639_s5, 16384  ;;  %s5481_s25 = smov [#allocation9]  }
  0x43   : > { %p5310_p2 = scmp.ne.s32.totalorder %s5639_s5, %s5309_s20  ;;  %s5314_s30 = sshll.u32 %s5481_s25, 4  ;;  %s5315_s30 = int_to_ptr.vmem [resolvable:$false] %s5314_s30 }
  0x44   : > { %s5316_s12 = scalar_lea.vmem %s5315_s30, 32768  ;;  %p5317_p6 = scmp.lt.s32.totalorder %s5639_s5, %s5315_s30 }
  0x45   : > { %p5312_p3 = pnand %p5310_p2, %p5605_p7  ;;  %p5318_p8 = scmp.lt.s32.totalorder %s5316_s12, %s5309_s20 }
  0x47   : > { %p5313_p4 = pneg %p5312_p3  ;;  %p5319_p9 = por %p5318_p8, %p5317_p6 }
  0x49   : > { %p5320_p10 = pnand %p5319_p9, %p5313_p4 }
  0x4b   : > { %5323 = shalt.err (!%p5320_p10)
}
  0x4c   : > { %s5482_s28 = smov 1024   ;;  %s6363_s23 = smov 64  }
  0x4d   : > { %5007 = dma.hbm_to_vmem [thread:$0]  (!%p5585_p5), %s5635_s19, 16384, %s5639_s5, %s5643_s15, %s5482_s28, %s5482_s28, %s6363_s23  }
  0x4e   : > { %s5672_s20 = scalar_lea.hbm %s6358_s8, %s4666_s26  ;;  %s392_s25 = scalar_lea.vmem [#allocation11], %s4347_s21 }
  0x4f   : > { %s399_s30 = sshll.u32 %s392_s25, 4  ;;  %s5679_s12 = sadd.s32 4294967295, %s5476_s16   ;;  %s5676_s30 = int_to_ptr.vmem [resolvable:$true] %s399_s30 }
  0x50   : > { %p153_p11 = scmp.ne.s32.totalorder %s5468_s14, %s5464_s13  ;;  %p6367_p12 = scmp.eq.s32.totalorder %s5679_s12, 0 }
  0x51   : > { %p4340_p13 = scmp.ge.s32.totalorder %s5476_s16, 1  ;;  %p289_p0 = scmp.lt.s32.totalorder %s5476_s16, 4 }
  0x52   : > { %p5688_p1 = por %p6367_p12, %p153_p11  ;;  %s5484_s26 = smov [#allocation3]  }
  0x53   : > { %p5693_p3 = pnand %p4340_p13, %p289_p0  ;;  %s308_s19 = sshll.u32 %s5484_s26, 4  ;;  %s309_s19 = int_to_ptr.vmem [resolvable:$true] %s308_s19 }
  0x54   : > { %s6380_s5 = scalar_select %p5688_p1, 1, 0 }
  0x55   : > { %s6381_s21 = scalar_select %p5693_p3, 1, 0 }
  0x56   : > { %s4344_s28 = sshll.u32 %s5582_s22, 6  ;;  %p4994_p4 = pneg %p5693_p3 }
  0x57   : > { %s4665_s13 = sshll.u32 %s5476_s16, 10  ;;  %s350_s7 = scalar_lea.vmem [#allocation8], %s4344_s28 }
  0x58   : > { %p5703_p6 = pnand %p4994_p4, %p6367_p12  ;;  %s5710_s23 = scalar_lea.hbm %s6356_s6, %s4665_s13 }
  0x59   : > { %s357_s17 = sshll.u32 %s350_s7, 4  ;;  %s5335_s22 = scalar_lea.vmem %s309_s19, 64  ;;  %s5712_s17 = int_to_ptr.vmem [resolvable:$true] %s357_s17 }
  0x5a   : > { %p5326_p8 = pneg %p5703_p6  ;;  %p5336_p9 = scmp.ne.s32.totalorder %s309_s19, %s5335_s22 }
  0x5b   : > { %p5343_p13 = scmp.lt.s32.totalorder %s309_s19, %s309_s19  ;;  %p5344_p0 = scmp.lt.s32.totalorder %s5335_s22, %s5335_s22 }
  0x5c   : > { %p5338_p10 = pnand %p5336_p9, %p5326_p8 }
  0x5d   : > { %p5345_p4 = por %p5344_p0, %p5343_p13 }
  0x5e   : > { %p5339_p11 = pneg %p5338_p10 }
  0x60   : > { %p5346_p2 = pnand %p5345_p4, %p5339_p11 }
  0x62   : > { %5349 = shalt.err (!%p5346_p2)
}
  0x63   : > { %4997 = dma.hbm_to_vmem [thread:$0]  (!%p5703_p6), %s6352_s2, 64, %s309_s19, [#allocation4]  }
  0x64   : > { %s5350_s7 = scalar_lea.hbm %s5710_s23, 1024  ;;  %s5355_s29 = scalar_lea.hbm %s6356_s6, 3072 }
  0x65   : > { %p5351_p12 = scmp.ne.s32.totalorder %s5710_s23, %s5350_s7  ;;  %p5356_p2 = scmp.lt.s32.totalorder %s5710_s23, %s6356_s6 }
  0x66   : > { %p5357_p10 = scmp.lt.s32.totalorder %s5355_s29, %s5350_s7 }
  0x67   : > { %p5353_p8 = pnand %p5351_p12, %p5605_p7 }
  0x68   : > { %p5358_p11 = por %p5357_p10, %p5356_p2 }
  0x69   : > { %p5354_p9 = pneg %p5353_p8 }
  0x6b   : > { %p5359_p13 = pnand %p5358_p11, %p5354_p9 }
  0x6d   : > { %5362 = shalt.err (!%p5359_p13)
}
  0x6e   : > { %s5363_s19 = scalar_lea.vmem %s5712_s17, 1024  ;;  %s5485_s27 = smov [#allocation8]  }
  0x6f   : > { %p5364_p6 = scmp.ne.s32.totalorder %s5712_s17, %s5363_s19  ;;  %s5368_s16 = sshll.u32 %s5485_s27, 4  ;;  %s5369_s16 = int_to_ptr.vmem [resolvable:$false] %s5368_s16 }
  0x70   : > { %s5370_s26 = scalar_lea.vmem %s5369_s16, 2048  ;;  %p5371_p4 = scmp.lt.s32.totalorder %s5712_s17, %s5369_s16 }
  0x71   : > { %p5366_p12 = pnand %p5364_p6, %p5605_p7  ;;  %p5372_p8 = scmp.lt.s32.totalorder %s5370_s26, %s5363_s19 }
  0x73   : > { %p5367_p0 = pneg %p5366_p12  ;;  %p5373_p1 = por %p5372_p8, %p5371_p4 }
  0x75   : > { %p5374_p3 = pnand %p5373_p1, %p5367_p0 }
  0x77   : > { %5377 = shalt.err (!%p5374_p3)
}
  0x78   : > { %s5486_s7 = smov 4   ;;  %s6383_s28 = smov 64  }
  0x79   : > { %5004 = dma.hbm_to_vmem [thread:$0]  (!%p5585_p5), %s5710_s23, 1024, %s5712_s17, %s5599_s11, %s6383_s28, %s6383_s28, %s5486_s7  }
  0x7a   : > { %s5378_s13 = scalar_lea.hbm %s5672_s20, 16384  ;;  %s5383_s22 = scalar_lea.hbm %s6358_s8, 49152 }
  0x7b   : > { %p5379_p9 = scmp.ne.s32.totalorder %s5672_s20, %s5378_s13  ;;  %p5384_p3 = scmp.lt.s32.totalorder %s5672_s20, %s6358_s8 }
  0x7c   : > { %p5385_p10 = scmp.lt.s32.totalorder %s5383_s22, %s5378_s13 }
  0x7d   : > { %p5381_p2 = pnand %p5379_p9, %p5605_p7 }
  0x7e   : > { %p5386_p11 = por %p5385_p10, %p5384_p3 }
  0x7f   : > { %p5382_p1 = pneg %p5381_p2 }
  0x81   : > { %p5387_p13 = pnand %p5386_p11, %p5382_p1 }
  0x83   : > { %5390 = shalt.err (!%p5387_p13)
}
  0x84   : > { %s5391_s17 = scalar_lea.vmem %s5676_s30, 16384  ;;  %s5487_s11 = smov [#allocation11]  }
  0x85   : > { %p5392_p6 = scmp.ne.s32.totalorder %s5676_s30, %s5391_s17  ;;  %s5396_s23 = sshll.u32 %s5487_s11, 4  ;;  %s5397_s23 = int_to_ptr.vmem [resolvable:$false] %s5396_s23 }
  0x86   : > { %s5398_s16 = scalar_lea.vmem %s5397_s23, 32768  ;;  %p5399_p4 = scmp.lt.s32.totalorder %s5676_s30, %s5397_s23 }
  0x87   : > { %p5394_p12 = pnand %p5392_p6, %p5605_p7  ;;  %p5400_p8 = scmp.lt.s32.totalorder %s5398_s16, %s5391_s17 }
  0x89   : > { %p5395_p0 = pneg %p5394_p12  ;;  %p5401_p9 = por %p5400_p8, %p5399_p4 }
  0x8b   : > { %p5402_p2 = pnand %p5401_p9, %p5395_p0 }
  0x8d   : > { %5405 = shalt.err (!%p5402_p2)
}
  0x8e   : > { %5010 = dma.hbm_to_vmem [thread:$0]  (!%p5585_p5), %s5672_s20, 16384, %s5676_s30, %s5643_s15, %s6383_s28, %s6383_s28, %s5486_s7  }
  0x8f   : > { %p6384_p7 = scmp.ne.s32.totalorder %s6381_s21, 0 }
  0x90   : > { %p6385_p1 = scmp.eq.s32.totalorder (!%p6384_p7), %s5679_s12, 0 }
  0x91   : > { %418 = sbr.rel (%p6384_p7) target bundleno = 3165 (0xc5d), region = 60 }
  0x96   : > { %5447 = dma.done.wait (%p6385_p1), [#allocation4], 64   ;;  %p6386_p3 = pmov %p6385_p1 }
  0x97   : > { %s424_s24 = sand.u32 1, %s5679_s12   ;;  %s426_s18 = sand.u32 1, %s5468_s14  }
  0x98   : > { %5449 = vsyncadd (%p6386_p3), [#allocation4], 4294967232  ;;  %s4976_s26 = smul.u32 192, %s426_s18  ;;  %s425_s13 = scalar_lea.sflag [#allocation7], %s424_s24 }
  0x99   : > { %p6387_p10 = scmp.ne.s32.totalorder %s6380_s5, 0 }
  0x9a   : > { %s5777_s29 = scalar_lea.vmem [#allocation6], %s4976_s26 }
  0x9b   : > { %5451 = dma.done.wait (%p6387_p10), %s425_s13, 4096  }
  0x9c   : > { %5453 = vsyncadd (%p6387_p10), %s425_s13, 4294963200  ;;  %s4355_s15 = sshll.u32 %s426_s18, 6  ;;  %s4356_s20 = sshll.u32 %s426_s18, 10 }
  0x9d   : > { %s5783_s30 = scalar_lea.vmem [#allocation8], %s4355_s15  ;;  %s443_s21 = scalar_lea.sflag [#allocation10], %s424_s24 }
  0x9e   : > { %s5785_s7 = scalar_lea.vmem [#allocation9], %s4356_s20 }
  0x9f   : > { %5455 = dma.done.wait (%p6387_p10), %s443_s21, 32768  }
  0xa0   : > { %5457 = vsyncadd (%p6387_p10), %s443_s21, 4294934528  ;;  %p506_p5 = scmp.lt.s32.totalorder %s5679_s12, 2  ;;  %s5798_s17 = scalar_lea.vmem [#allocation11], %s4356_s20 }
  0xa1   : > { %p6388_p11 = scmp.ne.s32.totalorder %s5679_s12, 0 }
  0xa2   : > { %s507_s28 = scalar_select %p506_p5, %s5679_s12, 2 }
  0xa3   : > { %514 = sbr.rel (%p6388_p11) target bundleno = 369 (0x171), region = 84 }
  0xa4   : > { %s4977_s25 = smul.u32 25, %s507_s28 }
  0xa6   : > { %s5796_s27 = scalar_lea.vmem %s6359_s9, %s4977_s25 }
  0xa8   : > { %v517_v0 = vld [vmem:[#allocation3] sm:$0xf]  ;;  %vm527_vm0 = vcmask 1043456   ;;  %v515_v1 = vld [vmem:[%s6350_s0] sm:$0xff]  ;;  %vm520_vm1 = vcmask 31744   ;;  %v516_v2 = vld [vmem:[%s6350_s0 + $0x8] sm:$0xff] }
  0xa9   : > { %4881 = vmatprep.subr.msk.mxu0 %vm527_vm0, %v517_v0  ;;  %4883 = vmatprep.mubr.msk.f32.mxu0 %vm520_vm1, %v515_v1  ;;  %v519_v3 = vld [vmem:[%s6351_s1 + $0x8] sm:$0xff]  ;;  %v518_v5 = vld [vmem:[%s6351_s1] sm:$0xff] }
  0xaa   : > { %4882 = vmatpush3.msk.msra.mxu0 %vm527_vm0, %v517_v0 }
  0xab   : > { %4884 = vmatmul.mubr.msk.f32.vlgmr.msra.gmra.mxu0 %vm520_vm1, %v516_v2 }
 0x16b   : > { %v4885_v4 = vpop.f32.mrf.mxu0 }
 0x16c   : > { %v603_v6 = vadd.f32 %v4885_v4, %v519_v3 }
 0x16d   : > { %v597_v7 = vpop.f32.mrf.mxu0 }
 0x16e   : > { %607 = vst [vmem:[#allocation2 + $0x8] sm:$0xff] %v603_v6  ;;  %v598_v8 = vadd.f32 %v597_v7, %v518_v5 }
 0x170   : > { %606 = vst [vmem:[#allocation2] sm:$0xff] %v598_v8 }
 0x171 PF: > { %v5058_v9 = vld [vmem:[%s5777_s29 + $0xac] ss:$12 sps:$4 sm:$0xff]   ;;  %v5060_v10 = vld [vmem:[%s5777_s29 + $0xa8] ss:$12 sps:$4 sm:$0xff]   ;;  %v5488_v11 = vmov 0   ;;  %v5489_v12 = vmov 0.0   ;;  %v645_v38 = vlaneseq }
 0x172   : > { %820 = vmatprep.mubr.bf16.mxu0 %v5488_v11  ;;  %4886 = vmatprep.subr.bf16.mxu1 %v5489_v12  ;;  %v5061_v13 = vld [vmem:[%s5777_s29 + $0x94] ss:$12 sps:$4 sm:$0xff]   ;;  %v5063_v14 = vld [vmem:[%s5777_s29 + $0x90] ss:$12 sps:$4 sm:$0xff]   ;;  %v5066_v16 = vld [vmem:[%s5777_s29 + $0x78] ss:$12 sps:$4 sm:$0xff]  }
 0x173   : > { %788 = vmatprep.subr.bf16.mxu0 %v5058_v9  ;;  %v5064_v15 = vld [vmem:[%s5777_s29 + $0x7c] ss:$12 sps:$4 sm:$0xff]   ;;  %v5067_v17 = vld [vmem:[%s5777_s29 + $0x64] ss:$12 sps:$4 sm:$0xff]   ;;  %v5069_v18 = vld [vmem:[%s5777_s29 + $0x60] ss:$12 sps:$4 sm:$0xff]  }
 0x174   : > { %789 = vmatpush1.bf16.msra.mxu0 %v5060_v10  ;;  %v5070_v19 = vld [vmem:[%s5777_s29 + $0x4c] ss:$12 sps:$4 sm:$0xff]   ;;  %v5082_v20 = vld [vmem:[%s5777_s29 + $0xb0] ss:$12 sps:$4 sm:$0xff]   ;;  %v5072_v22 = vld [vmem:[%s5777_s29 + $0x48] ss:$12 sps:$4 sm:$0xff]  }
 0x175   : > { %790 = vmatprep.subr.bf16.mxu0 %v5061_v13  ;;  %4887 = vmatpush3.bf16.msra.mxu1 %v5082_v20  ;;  %v5083_v21 = vld [vmem:[%s5777_s29 + $0x98] ss:$12 sps:$4 sm:$0xff]   ;;  %v5073_v23 = vld [vmem:[%s5777_s29 + $0x34] ss:$12 sps:$4 sm:$0xff]   ;;  %v5075_v24 = vld [vmem:[%s5777_s29 + $0x30] ss:$12 sps:$4 sm:$0xff]  }
 0x176   : > { %4888 = vmatprep.subr.bf16.mxu1 %v5489_v12  ;;  %v5084_v25 = vld [vmem:[%s5777_s29 + $0x80] ss:$12 sps:$4 sm:$0xff]   ;;  %v5076_v26 = vld [vmem:[%s5777_s29 + $0x1c] ss:$12 sps:$4 sm:$0xff]   ;;  %v5078_v28 = vld [vmem:[%s5777_s29 + $0x18] ss:$12 sps:$4 sm:$0xff]  }
 0x177   : > { %v5085_v27 = vld [vmem:[%s5777_s29 + $0x68] ss:$12 sps:$4 sm:$0xff]   ;;  %v5079_v29 = vld [vmem:[%s5777_s29 + $0x4] ss:$12 sps:$4 sm:$0xff]   ;;  %v5081_v31 = vld [vmem:[%s5777_s29] ss:$12 sps:$4 sm:$0xff]  }
 0x178   : > { %791 = vmatpush1.bf16.msra.mxu0 %v5063_v14  ;;  %v5086_v30 = vld [vmem:[%s5777_s29 + $0x50] ss:$12 sps:$4 sm:$0xff]   ;;  %v609_v33 = vld [vmem:[#allocation2 + $0x8] sm:$0xff]  ;;  %v5088_v36 = vld [vmem:[%s5777_s29 + $0x20] ss:$12 sps:$4 sm:$0xff]   ;;  %vm5490_vm2 = vmmov 0  }
 0x179   : > { %792 = vmatprep.subr.bf16.mxu0 %v5064_v15  ;;  %4889 = vmatpush3.bf16.msra.mxu1 %v5083_v21  ;;  %v608_v32 = vld [vmem:[#allocation2] sm:$0xff]  ;;  %v5087_v34 = vld [vmem:[%s5777_s29 + $0x38] ss:$12 sps:$4 sm:$0xff]   ;;  %v5089_v37 = vld [vmem:[%s5777_s29 + $0x8] ss:$12 sps:$4 sm:$0xff]   ;;  %v5855_v39 = vshrl.u32 %v645_v38, 7 }
 0x17a   : > { %4890 = vmatprep.subr.bf16.mxu1 %v5489_v12  ;;  %v610_v35 = vpack.c.bf16 %v609_v33, %v608_v32  ;;  %4902 = vmatprep.mubr.msk.bf16.mxu1 %vm5490_vm2, %v5489_v12  ;;  %v643_v42 = vld [vmem:[%s5796_s27] sm:$0x7]  ;;  %vm932_vm3 = vcmask 130048   ;;  %p4660_p13 = scmp.ne.s32.totalorder %s5679_s12, 2 }
 0x17b   : > { %v5858_v40 = vsub.s32 1, %v5855_v39  ;;  %v877_v44 = vld [vmem:[%s6354_s4] sm:$0x3]  ;;  %v5866_v48 = vsub.s32 0, %v5855_v39  ;;  %v5895_v3 = vsub.s32 2, %v5855_v39 }
 0x17c   : > { %793 = vmatpush1.bf16.msra.mxu0 %v5066_v16  ;;  %v879_v46 = vpack.i.b16 %v877_v44, %v877_v44  ;;  %v956_v50 = vshrl.u32 %v877_v44, 16 }
 0x17d   : > { %794 = vmatprep.subr.bf16.mxu0 %v5067_v17  ;;  %4891 = vmatpush3.bf16.msra.mxu1 %v5084_v25  ;;  %v652_v45 = vrot.slane %v643_v42, %v5858_v40  ;;  %v648_v59 = vrot.slane %v643_v42, %v5866_v48  ;;  %v656_v4 = vrot.slane %v643_v42, %v5895_v3  ;;  %v875_v17 = vld [vmem:[%s6353_s3] sm:$0xff] }
 0x17e   : > { %4892 = vmatprep.subr.bf16.mxu1 %v5489_v12  ;;  %v5869_v53 = vrot.slane %v879_v46, %v5866_v48  ;;  %v5872_v54 = vrot.slane %v879_v46, %v5858_v40  ;;  %v957_v58 = vpack.i.b16 %v956_v50, %v956_v50 }
 0x180   : > { %795 = vmatpush1.bf16.msra.mxu0 %v5069_v18  ;;  %v962_v61 = vrot.slane %v957_v58, %v5866_v48  ;;  %v5881_v62 = vrot.slane %v957_v58, %v5858_v40 }
 0x181   : > { %796 = vmatprep.subr.bf16.mxu0 %v5070_v19  ;;  %4893 = vmatpush3.bf16.msra.mxu1 %v5085_v27 }
 0x182   : > { %4894 = vmatprep.subr.bf16.mxu1 %v5489_v12 }
 0x184   : > { %797 = vmatpush1.bf16.msra.mxu0 %v5072_v22 }
 0x185   : > { %798 = vmatprep.subr.bf16.mxu0 %v5073_v23  ;;  %4895 = vmatpush3.bf16.msra.mxu1 %v5086_v30 }
 0x186   : > { %4896 = vmatprep.subr.bf16.mxu1 %v5489_v12 }
 0x188   : > { %799 = vmatpush1.bf16.msra.mxu0 %v5075_v24  ;;  %v876_v24 = vld [vmem:[%s6353_s3 + $0x8] sm:$0xff] }
 0x189   : > { %800 = vmatprep.subr.bf16.mxu0 %v5076_v26  ;;  %4897 = vmatpush3.bf16.msra.mxu1 %v5087_v34 }
 0x18a   : > { %4898 = vmatprep.subr.bf16.mxu1 %v5489_v12 }
 0x18c   : > { %801 = vmatpush1.bf16.msra.mxu0 %v5078_v28 }
 0x18d   : > { %802 = vmatprep.subr.bf16.mxu0 %v5079_v29  ;;  %4899 = vmatpush3.bf16.msra.mxu1 %v5088_v36 }
 0x18e   : > { %4900 = vmatprep.subr.bf16.mxu1 %v5489_v12 }
 0x190   : > { %803 = vmatpush1.bf16.msra.mxu0 %v5081_v31 }
 0x191   : > { %4930 = vmatprep.subr.bf16.mxu0 %v5489_v12  ;;  %4901 = vmatpush3.bf16.msra.mxu1 %v5089_v37 }
 0x192   : > { %4906 = vmatprep.subr.bf16.mxu1 %v5489_v12 }
 0x193   : > { %821 = vmatmul.mubr.bf16.vlgmr.msra.gmra.mxu0 %v610_v35 }
 0x194   : > { %4932 = vmatprep.mubr.msk.bf16.mxu0 %vm5490_vm2, %v5489_v12  ;;  %4903 = vmatmul.mubr.bf16.vlgmr.msra.gmra.mxu1 %v610_v35 }
 0x195   : > { %4908 = vmatprep.mubr.msk.bf16.mxu1 %vm5490_vm2, %v5489_v12 }
 0x253   : > { %v822_v41 = vpop.f32.mrf.mxu0 }
 0x254   : > { %v823_v63 = vadd.f32 %v822_v41, %v648_v59  ;;  %v865_v5 = vpop.f32.mrf.mxu1 }
 0x255   : > { %v824_v43 = vpop.f32.mrf.mxu0  ;;  %v866_v7 = vadd.f32 %v865_v5, %v656_v4 }
 0x256   : > { %v825_v51 = vadd.f32 %v824_v43, %v652_v45  ;;  %v4904_v6 = vpop.f32.mrf.mxu1 }
 0x257   : > { %v826_v47 = vpop.f32.mrf.mxu0 }
 0x258   : > { %v827_v60 = vadd.f32 %v826_v47, %v648_v59  ;;  %v868_v8 = vpop.f32.mrf.mxu1 }
 0x259   : > { %v828_v49 = vpop.f32.mrf.mxu0  ;;  %v869_v9 = vadd.f32 %v868_v8, %v656_v4 }
 0x25a   : > { %v829_v52 = vadd.f32 %v828_v49, %v652_v45  ;;  %v872_v0 = vpack.c.bf16 %v827_v60, %v823_v63  ;;  %v4905_v10 = vpop.f32.mrf.mxu1 }
 0x25b   : > { %v5898_v13 = vpack.c.bf16 %v869_v9, %v866_v7 }
 0x25c   : > { %v873_v55 = vpack.c.bf16 %v829_v52, %v825_v51 }
 0x25d   : > { %v964_v14 = vmul.bf16 %v962_v61, %v5898_v13 }
 0x25e   : > { %v885_v56 = vmul.bf16 %v5869_v53, %v873_v55  ;;  %v1125_v57 = vmul.bf16 %v5872_v54, %v873_v55  ;;  %v963_v1 = vmul.bf16 %v962_v61, %v873_v55  ;;  %v1245_v2 = vmul.bf16 %v5881_v62, %v873_v55 }
 0x260   : > { %4907 = vmatpush3.bf16.xpose.msra.mxu1 %v885_v56  ;;  %4931 = vmatpush3.bf16.xpose.msra.mxu0 %v1125_v57 }
 0x261   : > { %4912 = vmatprep.subr.bf16.mxu1 %v5489_v12  ;;  %4942 = vmatprep.subr.bf16.mxu0 %v5489_v12 }
 0x267   : > { %4909 = vmatmul.mubr.bf16.vlgmr.msra.gmra.mxu1 %v872_v0  ;;  %4933 = vmatmul.mubr.bf16.vlgmr.msra.gmra.mxu0 %v872_v0 }
 0x268   : > { %4913 = vmatpush3.bf16.xpose.msra.mxu1 %v963_v1  ;;  %4943 = vmatpush3.bf16.xpose.msra.mxu0 %v1245_v2 }
 0x269   : > { %4914 = vmatprep.mubr.msk.bf16.mxu1 %vm5490_vm2, %v5489_v12  ;;  %4944 = vmatprep.mubr.msk.bf16.mxu0 %vm5490_vm2, %v5489_v12 }
 0x26a   : > { %4918 = vmatprep.subr.bf16.mxu1 %v5489_v12  ;;  %4954 = vmatprep.subr.bf16.mxu0 %v5489_v12 }
 0x26f   : > { %4915 = vmatmul.mubr.bf16.vlgmr.msra.gmra.mxu1 %v872_v0  ;;  %4945 = vmatmul.mubr.bf16.vlgmr.msra.gmra.mxu0 %v872_v0 }
 0x270   : > { %4920 = vmatprep.mubr.msk.bf16.mxu1 %vm5490_vm2, %v5489_v12  ;;  %4970 = vmatprep.mubr.msk.bf16.mxu0 %vm5490_vm2, %v5489_v12 }
 0x271   : > { %4919 = vmatpush3.bf16.msra.mxu1 %v964_v14 }
 0x272   : > { %4924 = vmatprep.subr.bf16.mxu1 %v5489_v12 }
 0x327   : > { %v921_v15 = vpop.f32.mrf.mxu1  ;;  %v1161_v16 = vpop.f32.mrf.mxu0 }
 0x328   : > { %v928_v18 = vmul.f32 0.17677669, %v921_v15  ;;  %v1168_v41 = vmul.f32 0.17677669, %v1161_v16 }
 0x329   : > { %v4910_v19 = vpop.f32.mrf.mxu1  ;;  %v4934_v20 = vpop.f32.mrf.mxu0 }
 0x32a   : > { %v930_v21 = vadd.f32 %v928_v18, %v875_v17  ;;  %v1170_v58 = vadd.f32 %v1168_v41, %v875_v17 }
 0x32b   : > { %v924_v22 = vpop.f32.mrf.mxu1  ;;  %v1164_v23 = vpop.f32.mrf.mxu0 }
 0x32c   : > { %v929_v25 = vmul.f32 0.17677669, %v924_v22  ;;  %v1169_v26 = vmul.f32 0.17677669, %v1164_v23  ;;  %v933_v27 = vsel %vm932_vm3, %v930_v21, -inf  ;;  %v1172_v59 = vsel %vm932_vm3, %v1170_v58, -inf }
 0x32d   : > { %v4935_v28 = vpop.f32.mrf.mxu0  ;;  %934 = vmax.xlane.f32.xlu1 %v933_v27  ;;  %v4911_v29 = vpop.f32.mrf.mxu1 }
 0x32e   : > { %v931_v30 = vadd.f32 %v929_v25, %v876_v24  ;;  %v1171_v35 = vadd.f32 %v1169_v26, %v876_v24 }
 0x32f   : > { %v999_v31 = vpop.f32.mrf.mxu1  ;;  %v1281_v32 = vpop.f32.mrf.mxu0 }
 0x330   : > { %v1006_v33 = vmul.f32 0.17677669, %v999_v31  ;;  %v936_v34 = vsel %vm932_vm3, %v931_v30, -inf  ;;  %v1175_v46 = vsel %vm932_vm3, %v1171_v35, -inf  ;;  %v1288_v55 = vmul.f32 0.17677669, %v1281_v32 }
 0x331   : > { %v4946_v36 = vpop.f32.mrf.mxu0  ;;  %937 = vmax.xlane.f32.xlu1 %v936_v34  ;;  %v4916_v37 = vpop.f32.mrf.mxu1 }
 0x332   : > { %v1008_v38 = vadd.f32 %v1006_v33, %v875_v17  ;;  %v1290_v60 = vadd.f32 %v1288_v55, %v875_v17 }
 0x333   : > { %v1002_v42 = vpop.f32.mrf.mxu1  ;;  %v1284_v43 = vpop.f32.mrf.mxu0 }
 0x334   : > { %v1007_v44 = vmul.f32 0.17677669, %v1002_v42  ;;  %v1289_v45 = vmul.f32 0.17677669, %v1284_v43  ;;  %v1010_v47 = vsel %vm932_vm3, %v1008_v38, -inf  ;;  %v1292_v61 = vsel %vm932_vm3, %v1290_v60, -inf }
 0x335   : > { %v4947_v49 = vpop.f32.mrf.mxu0  ;;  %1176 = vmax.xlane.f32.xlu1 %v1175_v46  ;;  %1011 = vmax.xlane.f32.xlu0 %v1010_v47  ;;  %v4917_v50 = vpop.f32.mrf.mxu1 }
 0x336   : > { %v1291_v51 = vadd.f32 %v1289_v45, %v876_v24  ;;  %v1009_v52 = vadd.f32 %v1007_v44, %v876_v24 }
 0x338   : > { %v1295_v56 = vsel %vm932_vm3, %v1291_v51, -inf  ;;  %v1013_v57 = vsel %vm932_vm3, %v1009_v52, -inf }
 0x339   : > { %1296 = vmax.xlane.f32.xlu1 %v1295_v56  ;;  %1014 = vmax.xlane.f32.xlu0 %v1013_v57 }
 0x33d   : > { %1173 = vmax.xlane.f32.xlu0 %v1172_v59 }
 0x341   : > { %1293 = vmax.xlane.f32.xlu0 %v1292_v61  ;;  %v886_v61 = vmul.bf16 %v5869_v53, %v5898_v13 }
 0x3b6   : > { %v935_v63 = vpop.xlane.xlu1 %934 }
 0x3b7   : > { %v939_v1 = vsub.f32 %v930_v21, %v935_v63 }
 0x3b9   : > { %v941_v7 = vmul.f32 1.442695, %v939_v1 }
 0x3ba   : > { %v938_v0 = vpop.xlane.xlu1 %937 }
 0x3bb   : > { %v940_v8 = vsub.f32 %v931_v30, %v938_v0 }
 0x3bd   : > { %v943_v15 = vmul.f32 1.442695, %v940_v8 }
 0x3be   : > { %v1012_v2 = vpop.xlane.xlu0 %1011  ;;  %v1177_v5 = vpop.xlane.xlu1 %1176 }
 0x3bf   : > { %v1016_v4 = vsub.f32 %v1008_v38, %v1012_v2  ;;  %v1179_v16 = vsub.f32 %v1171_v35, %v1177_v5 }
 0x3c1   : > { %v1018_v6 = vmul.f32 1.442695, %v1016_v4  ;;  %v1182_v21 = vmul.f32 1.442695, %v1179_v16 }
 0x3c2   : > { %v1015_v9 = vpop.xlane.xlu0 %1014  ;;  %v1297_v18 = vpop.xlane.xlu1 %1296 }
 0x3c3   : > { %v1017_v10 = vsub.f32 %v1009_v52, %v1015_v9  ;;  %5226 = vpow2.f32 %v1018_v6  ;;  %v1299_v22 = vsub.f32 %v1291_v51, %v1297_v18  ;;  %v1126_v6 = vmul.bf16 %v5872_v54, %v5898_v13  ;;  %v5090_v18 = vld [vmem:[%s5783_s30 + $0x38] sm:$0xff]  }
 0x3c4   : > { %5228 = vpow2.f32 %v941_v7  ;;  %4955 = vmatpush3.bf16.msra.mxu0 %v5090_v18  ;;  %v1544_v18 = vld [vmem:[%s5785_s7 + $0x340] sm:$0xff] }
 0x3c5   : > { %v1020_v14 = vmul.f32 1.442695, %v1017_v10  ;;  %v1302_v26 = vmul.f32 1.442695, %v1299_v22  ;;  %4956 = vmatprep.subr.bf16.mxu0 %v5489_v12  ;;  %v5096_v22 = vld [vmem:[%s5783_s30 + $0x8] sm:$0xff]  }
 0x3c6   : > { %v1174_v17 = vpop.xlane.xlu0 %1173 }
 0x3c7   : > { %v1178_v19 = vsub.f32 %v1170_v58, %v1174_v17  ;;  %5230 = vpow2.f32 %v1020_v14  ;;  %v1246_v14 = vmul.bf16 %v5881_v62, %v5898_v13  ;;  %v5091_v62 = vld [vmem:[%s5783_s30 + $0x30] sm:$0xff]   ;;  %v5092_v13 = vld [vmem:[%s5783_s30 + $0x28] sm:$0xff]  }
 0x3c8   : > { %5232 = vpow2.f32 %v943_v15  ;;  %4957 = vmatpush3.bf16.msra.mxu0 %v5091_v62  ;;  %v1543_v62 = vld [vmem:[%s5785_s7 + $0x308] sm:$0xff] }
 0x3c9   : > { %v1180_v20 = vmul.f32 1.442695, %v1178_v19  ;;  %4958 = vmatprep.subr.bf16.mxu0 %v5489_v12  ;;  %v5093_v19 = vld [vmem:[%s5783_s30 + $0x20] sm:$0xff]  }
 0x3ca   : > { %v1294_v23 = vpop.xlane.xlu0 %1293 }
 0x3cb   : > { %5234 = vpow2.f32 %v1180_v20  ;;  %v1298_v24 = vsub.f32 %v1290_v60, %v1294_v23  ;;  %v5094_v20 = vld [vmem:[%s5783_s30 + $0x18] sm:$0xff]   ;;  %v5097_v23 = vld [vmem:[%s5783_s30] sm:$0xff]  }
 0x3cc   : > { %5236 = vpow2.f32 %v1182_v21  ;;  %4959 = vmatpush3.bf16.msra.mxu0 %v5092_v13  ;;  %v5095_v21 = vld [vmem:[%s5783_s30 + $0x10] sm:$0xff]  }
 0x3cd   : > { %v1300_v25 = vmul.f32 1.442695, %v1298_v24  ;;  %4960 = vmatprep.subr.bf16.mxu0 %v5489_v12 }
 0x3cf   : > { %5238 = vpow2.f32 %v1300_v25 }
 0x3d0   : > { %v5227_v27 = vpop.eup %5226  ;;  %5240 = vpow2.f32 %v1302_v26  ;;  %4961 = vmatpush3.bf16.msra.mxu0 %v5093_v19  ;;  %v1545_v19 = vld [vmem:[%s5785_s7 + $0x348] sm:$0xff] }
 0x3d1   : > { %v1022_v28 = vsel %vm932_vm3, %v5227_v27, 0.0  ;;  %v5229_v29 = vpop.eup %5228  ;;  %4962 = vmatprep.subr.bf16.mxu0 %v5489_v12 }
 0x3d2   : > { %1023 = vadd.xlane.f32.xlu0 %v1022_v28  ;;  %v945_v31 = vsel %vm932_vm3, %v5229_v29, 0.0 }
 0x3d4   : > { %v5231_v30 = vpop.eup %5230  ;;  %4963 = vmatpush3.bf16.msra.mxu0 %v5094_v20 }
 0x3d5   : > { %v1025_v32 = vsel %vm932_vm3, %v5231_v30, 0.0  ;;  %v5233_v33 = vpop.eup %5232  ;;  %4964 = vmatprep.subr.bf16.mxu0 %v5489_v12 }
 0x3d6   : > { %946 = vadd.xlane.f32.xlu0 %v945_v31  ;;  %1026 = vadd.xlane.f32.xlu1 %v1025_v32  ;;  %v948_v36 = vsel %vm932_vm3, %v5233_v33, 0.0 }
 0x3d8   : > { %v5235_v34 = vpop.eup %5234  ;;  %4965 = vmatpush3.bf16.msra.mxu0 %v5095_v21  ;;  %v4427_v21 = vcombine.low %v1543_v62, %v1545_v19 }
 0x3d9   : > { %v1184_v35 = vsel %vm932_vm3, %v5235_v34, 0.0  ;;  %v5237_v37 = vpop.eup %5236  ;;  %4966 = vmatprep.subr.bf16.mxu0 %v5489_v12 }
 0x3da   : > { %949 = vadd.xlane.f32.xlu1 %v948_v36  ;;  %1185 = vadd.xlane.f32.xlu0 %v1184_v35  ;;  %v1187_v42 = vsel %vm932_vm3, %v5237_v37, 0.0 }
 0x3dc   : > { %v5239_v38 = vpop.eup %5238  ;;  %4967 = vmatpush3.bf16.msra.mxu0 %v5096_v22  ;;  %v4428_v22 = vcombine.high %v1543_v62, %v1545_v19  ;;  %v1925_v19 = vld [vmem:[%s5785_s7 + $0x3d8] sm:$0xff] }
 0x3dd   : > { %v1304_v41 = vsel %vm932_vm3, %v5239_v38, 0.0  ;;  %v5241_v43 = vpop.eup %5240  ;;  %4968 = vmatprep.subr.bf16.mxu0 %v5489_v12 }
 0x3de   : > { %1188 = vadd.xlane.f32.xlu1 %v1187_v42  ;;  %1305 = vadd.xlane.f32.xlu0 %v1304_v41  ;;  %v1307_v44 = vsel %vm932_vm3, %v5241_v43, 0.0 }
 0x3e0   : > { %4969 = vmatpush3.bf16.msra.mxu0 %v5097_v23  ;;  %v1538_v23 = vld [vmem:[%s5785_s7 + $0x280] sm:$0xff] }
 0x3e2   : > { %1308 = vadd.xlane.f32.xlu1 %v1307_v44 }
 0x45b   : > { %v1024_v45 = vpop.xlane.xlu0 %1023 }
 0x45c   : > { %5242 = vrcp.f32 %v1024_v45 }
 0x45f   : > { %v1027_v46 = vpop.xlane.xlu1 %1026  ;;  %v947_v47 = vpop.xlane.xlu0 %946 }
 0x460   : > { %5244 = vrcp.f32 %v1027_v46 }
 0x463   : > { %v950_v49 = vpop.xlane.xlu1 %949  ;;  %v1186_v52 = vpop.xlane.xlu0 %1185 }
 0x464   : > { %5246 = vrcp.f32 %v950_v49  ;;  %v4390_v49 = vld [vmem:[%s5796_s27 + $0x3] ss:$0 sm:$0xff] }
 0x465   : > { %5248 = vrcp.f32 %v947_v47 }
 0x467   : > { %v1189_v50 = vpop.xlane.xlu1 %1188  ;;  %v1306_v0 = vpop.xlane.xlu0 %1305 }
 0x468   : > { %5250 = vrcp.f32 %v1189_v50 }
 0x469   : > { %v5243_v51 = vpop.eup %5242  ;;  %5252 = vrcp.f32 %v1186_v52 }
 0x46a   : > { %v1030_v56 = vmul.f32 %v5243_v51, %v5227_v27 }
 0x46b   : > { %v1309_v60 = vpop.xlane.xlu1 %1308 }
 0x46c   : > { %5254 = vrcp.f32 %v1309_v60  ;;  %v5267_v60 = vld [vmem:[#allocation2 + $0x8] sm:$0xff] }
 0x46d   : > { %v5245_v55 = vpop.eup %5244  ;;  %5256 = vrcp.f32 %v1306_v0  ;;  %v1548_v0 = vld [vmem:[%s5785_s7 + $0x3c0] sm:$0xff] }
 0x46e   : > { %v1031_v57 = vmul.f32 %v5245_v55, %v5231_v30  ;;  %v5266_v55 = vld [vmem:[#allocation2] sm:$0xff] }
 0x470   : > { %v1032_v58 = vpack.c.bf16 %v1031_v57, %v1030_v56 }
 0x471   : > { %v5247_v59 = vpop.eup %5246 }
 0x472   : > { %4921 = vmatmul.mubr.msk.bf16.vlgmr.msra.gmra.mxu1 %vm932_vm3, %v1032_v58  ;;  %v5249_v63 = vpop.eup %5248  ;;  %v954_v1 = vmul.f32 %v5247_v59, %v5233_v33 }
 0x473   : > { %4925 = vmatpush3.bf16.msra.mxu1 %v886_v61  ;;  %4926 = vmatprep.mubr.msk.bf16.mxu1 %vm5490_vm2, %v5489_v12  ;;  %v953_v2 = vmul.f32 %v5249_v63, %v5229_v29  ;;  %v1546_v63 = vld [vmem:[%s5785_s7 + $0x380] sm:$0xff] }
 0x474   : > { %4936 = vmatprep.subr.bf16.mxu1 %v5489_v12 }
 0x475   : > { %v955_v4 = vpack.c.bf16 %v954_v1, %v953_v2  ;;  %v5251_v5 = vpop.eup %5250  ;;  %v1547_v1 = vld [vmem:[%s5785_s7 + $0x388] sm:$0xff]  ;;  %v4429_v2 = vcombine.low %v1546_v63, %v1548_v0 }
 0x476   : > { %v5253_v53 = vpop.eup %5252  ;;  %v1193_v7 = vmul.f32 %v5251_v5, %v5237_v37  ;;  %v1549_v5 = vld [vmem:[%s5785_s7 + $0x3c8] sm:$0xff] }
 0x477   : > { %v1192_v8 = vmul.f32 %v5253_v53, %v5235_v34  ;;  %v4432_v53 = vcombine.high %v1547_v1, %v1549_v5 }
 0x479   : > { %v1194_v9 = vpack.c.bf16 %v1193_v7, %v1192_v8  ;;  %v5255_v10 = vpop.eup %5254  ;;  %1775 = vmatprep.subr.bf16.mxu0 %v4432_v53  ;;  %v1519_v53 = vld [vmem:[%s5785_s7 + $0x8] sm:$0xff] }
 0x47a   : > { %4927 = vmatmul.mubr.msk.bf16.vlgmr.msra.gmra.mxu1 %vm932_vm3, %v955_v4  ;;  %v5257_v54 = vpop.eup %5256  ;;  %v1313_v15 = vmul.f32 %v5255_v10, %v5241_v43  ;;  %v4430_v4 = vcombine.high %v1546_v63, %v1548_v0  ;;  %v1525_v0 = vld [vmem:[%s5785_s7 + $0xc8] sm:$0xff] }
 0x47b   : > { %4937 = vmatpush3.bf16.msra.mxu1 %v1126_v6  ;;  %4938 = vmatprep.mubr.msk.bf16.mxu1 %vm5490_vm2, %v5489_v12  ;;  %v1312_v16 = vmul.f32 %v5257_v54, %v5239_v38  ;;  %v4431_v6 = vcombine.low %v1547_v1, %v1549_v5  ;;  %v1518_v5 = vld [vmem:[%s5785_s7] sm:$0xff] }
 0x47c   : > { %4948 = vmatprep.subr.bf16.mxu1 %v5489_v12 }
 0x47d   : > { %v1314_v17 = vpack.c.bf16 %v1313_v15, %v1312_v16 }
 0x482   : > { %4939 = vmatmul.mubr.msk.bf16.vlgmr.msra.gmra.mxu1 %vm932_vm3, %v1194_v9 }
 0x483   : > { %4949 = vmatpush3.bf16.msra.mxu1 %v1246_v14  ;;  %4950 = vmatprep.mubr.msk.bf16.mxu1 %vm5490_vm2, %v5489_v12 }
 0x484   : > { %1732 = vmatprep.subr.bf16.mxu1 %v4430_v4 }
 0x48a   : > { %4951 = vmatmul.mubr.msk.bf16.vlgmr.msra.gmra.mxu1 %vm932_vm3, %v1314_v17  ;;  %v1542_v17 = vld [vmem:[%s5785_s7 + $0x300] sm:$0xff] }
 0x48b   : > { %1764 = vmatprep.mubr.bf16.mxu1 %v5488_v11  ;;  %1733 = vmatpush1.bf16.msra.mxu1 %v4429_v2  ;;  %v4426_v13 = vcombine.high %v1542_v17, %v1544_v18  ;;  %v4425_v20 = vcombine.low %v1542_v17, %v1544_v18  ;;  %v1924_v17 = vld [vmem:[%s5785_s7 + $0x3d0] sm:$0xff]  ;;  %v1923_v18 = vld [vmem:[%s5785_s7 + $0x398] sm:$0xff] }
 0x48d   : > { %1734 = vmatprep.subr.bf16.mxu1 %v4426_v13 }
 0x48f   : > { %1735 = vmatpush1.bf16.msra.mxu1 %v4425_v20  ;;  %v4463_v20 = vcombine.low %v1923_v18, %v1925_v19 }
 0x532   : > { %v1070_v24 = vpop.f32.mrf.mxu1 }
 0x534   : > { %v4922_v25 = vpop.f32.mrf.mxu1 }
 0x535   : > { %v1539_v25 = vld [vmem:[%s5785_s7 + $0x288] sm:$0xff] }
 0x536   : > { %v1073_v26 = vpop.f32.mrf.mxu1 }
 0x538   : > { %v4923_v27 = vpop.f32.mrf.mxu1 }
 0x539   : > { %v1541_v27 = vld [vmem:[%s5785_s7 + $0x2c8] sm:$0xff] }
 0x53a   : > { %v1114_v28 = vpop.f32.mrf.mxu1 }
 0x53b   : > { %v1115_v37 = vadd.f32 %v1114_v28, %v1070_v24  ;;  %v1540_v24 = vld [vmem:[%s5785_s7 + $0x2c0] sm:$0xff] }
 0x53c   : > { %v4928_v29 = vpop.f32.mrf.mxu1  ;;  %v4421_v28 = vcombine.low %v1538_v23, %v1540_v24 }
 0x53d   : > { %v4423_v29 = vcombine.low %v1539_v25, %v1541_v27 }
 0x53e   : > { %v1117_v30 = vpop.f32.mrf.mxu1 }
 0x53f   : > { %v1118_v38 = vadd.f32 %v1117_v30, %v1073_v26  ;;  %v4422_v26 = vcombine.high %v1538_v23, %v1540_v24  ;;  %v4424_v30 = vcombine.high %v1539_v25, %v1541_v27 }
 0x540   : > { %v4929_v31 = vpop.f32.mrf.mxu1 }
 0x541   : > { %1736 = vmatprep.subr.bf16.mxu1 %v4422_v26  ;;  %v1534_v31 = vld [vmem:[%s5785_s7 + $0x200] sm:$0xff] }
 0x542   : > { %v1232_v32 = vpop.f32.mrf.mxu1  ;;  %1737 = vmatpush1.bf16.msra.mxu1 %v4421_v28 }
 0x543   : > { %v1239_v12 = vadd.f32 %v1232_v32, %v1115_v37  ;;  %v1536_v32 = vld [vmem:[%s5785_s7 + $0x240] sm:$0xff] }
 0x544   : > { %v4940_v33 = vpop.f32.mrf.mxu1 }
 0x545   : > { %v1535_v33 = vld [vmem:[%s5785_s7 + $0x208] sm:$0xff] }
 0x546   : > { %v1235_v34 = vpop.f32.mrf.mxu1 }
 0x547   : > { %v1240_v42 = vadd.f32 %v1235_v34, %v1118_v38  ;;  %v4418_v34 = vcombine.high %v1534_v31, %v1536_v32 }
 0x548   : > { %v4941_v35 = vpop.f32.mrf.mxu1 }
 0x549   : > { %v1537_v35 = vld [vmem:[%s5785_s7 + $0x248] sm:$0xff]  ;;  %1738 = vmatprep.subr.bf16.mxu1 %v4418_v34  ;;  %v4400_v34 = vld [vmem:[%s5796_s27 + $0x5] ss:$0 sm:$0xff] }
 0x54a   : > { %v1352_v36 = vpop.f32.mrf.mxu1  ;;  %v4419_v37 = vcombine.low %v1535_v33, %v1537_v35  ;;  %v4420_v38 = vcombine.high %v1535_v33, %v1537_v35 }
 0x54b   : > { %v1359_v44 = vadd.f32 %v1352_v36, %v1239_v12  ;;  %v4417_v36 = vcombine.low %v1534_v31, %v1536_v32  ;;  %v1532_v12 = vld [vmem:[%s5785_s7 + $0x1c0] sm:$0xff] }
 0x54c   : > { %v4952_v41 = vpop.f32.mrf.mxu1 }
 0x54d   : > { %1739 = vmatpush1.bf16.msra.mxu1 %v4417_v36  ;;  %v1530_v41 = vld [vmem:[%s5785_s7 + $0x180] sm:$0xff]  ;;  %v1918_v36 = vld [vmem:[%s5785_s7 + $0x310] sm:$0xff] }
 0x54e   : > { %v1355_v43 = vpop.f32.mrf.mxu1 }
 0x54f   : > { %v1360_v45 = vadd.f32 %v1355_v43, %v1240_v42  ;;  %v1531_v42 = vld [vmem:[%s5785_s7 + $0x188] sm:$0xff]  ;;  %v4414_v43 = vcombine.high %v1530_v41, %v1532_v12 }
 0x550   : > { %v4953_v46 = vpop.f32.mrf.mxu1 }
 0x551   : > { %v1361_v47 = vpack.c.bf16 %v1360_v45, %v1359_v44  ;;  %v1533_v44 = vld [vmem:[%s5785_s7 + $0x1c8] sm:$0xff]  ;;  %v4413_v45 = vcombine.low %v1530_v41, %v1532_v12  ;;  %1740 = vmatprep.subr.bf16.mxu1 %v4414_v43  ;;  %v1921_v41 = vld [vmem:[%s5785_s7 + $0x358] sm:$0xff] }
 0x552   : > { %v4415_v46 = vcombine.low %v1531_v42, %v1533_v44 }
 0x553   : > { %4971 = vmatmul.mubr.bf16.vlgmr.msra.gmra.mxu0 %v1361_v47  ;;  %v4416_v47 = vcombine.high %v1531_v42, %v1533_v44  ;;  %1741 = vmatpush1.bf16.msra.mxu1 %v4413_v45  ;;  %v1914_v45 = vld [vmem:[%s5785_s7 + $0x290] sm:$0xff] }
 0x554   : > { %1807 = vmatprep.mubr.bf16.mxu0 %v5488_v11  ;;  %1776 = vmatpush1.bf16.msra.mxu0 %v4431_v6  ;;  %v1520_v6 = vld [vmem:[%s5785_s7 + $0x40] sm:$0xff] }
 0x555   : > { %1777 = vmatprep.subr.bf16.mxu0 %v4428_v22 }
 0x558   : > { %1778 = vmatpush1.bf16.msra.mxu0 %v4427_v21  ;;  %v4464_v21 = vcombine.high %v1923_v18, %v1925_v19  ;;  %v1900_v19 = vld [vmem:[%s5785_s7 + $0xd0] sm:$0xff] }
 0x559   : > { %1779 = vmatprep.subr.bf16.mxu0 %v4424_v30  ;;  %v4399_v30 = vld [vmem:[%s5796_s27 + $0x4] ss:$0 sm:$0xff] }
 0x55c   : > { %1780 = vmatpush1.bf16.msra.mxu0 %v4423_v29 }
 0x55d   : > { %1781 = vmatprep.subr.bf16.mxu0 %v4420_v38  ;;  %v1919_v38 = vld [vmem:[%s5785_s7 + $0x318] sm:$0xff] }
 0x55e   : > { %v4460_v44 = vcombine.high %v1919_v38, %v1921_v41 }
 0x560   : > { %1782 = vmatpush1.bf16.msra.mxu0 %v4419_v37  ;;  %v1920_v37 = vld [vmem:[%s5785_s7 + $0x350] sm:$0xff] }
 0x561   : > { %1783 = vmatprep.subr.bf16.mxu0 %v4416_v47  ;;  %v4458_v43 = vcombine.high %v1918_v36, %v1920_v37  ;;  %v1917_v47 = vld [vmem:[%s5785_s7 + $0x2d8] sm:$0xff] }
 0x564   : > { %1784 = vmatpush1.bf16.msra.mxu0 %v4415_v46  ;;  %v1915_v46 = vld [vmem:[%s5785_s7 + $0x298] sm:$0xff] }
 0x613   : > { %v1467_v50 = vpop.f32.mrf.mxu0 }
 0x614   : > { %v1468_v51 = vadd.f32 %v4390_v49, %v1467_v50  ;;  %v1528_v50 = vld [vmem:[%s5785_s7 + $0x140] sm:$0xff] }
 0x615   : > { %v4972_v52 = vpop.f32.mrf.mxu0 }
 0x616   : > { %v1474_v56 = vadd.f32 %v5266_v55, %v1468_v51  ;;  %v1527_v51 = vld [vmem:[%s5785_s7 + $0x108] sm:$0xff] }
 0x617   : > { %v1470_v57 = vpop.f32.mrf.mxu0  ;;  %v1529_v55 = vld [vmem:[%s5785_s7 + $0x148] sm:$0xff] }
 0x618   : > { %v1471_v58 = vadd.f32 %v4390_v49, %v1470_v57  ;;  %1478 = vadd.xlane.f32.xlu0 %v1474_v56  ;;  %v1526_v49 = vld [vmem:[%s5785_s7 + $0x100] sm:$0xff]  ;;  %v4411_v57 = vcombine.low %v1527_v51, %v1529_v55 }
 0x619   : > { %v4973_v59 = vpop.f32.mrf.mxu0  ;;  %v4410_v52 = vcombine.high %v1526_v49, %v1528_v50 }
 0x61a   : > { %v1475_v61 = vadd.f32 %v5267_v60, %v1471_v58  ;;  %v4412_v58 = vcombine.high %v1527_v51, %v1529_v55  ;;  %v1522_v59 = vld [vmem:[%s5785_s7 + $0x80] sm:$0xff]  ;;  %v1910_v55 = vld [vmem:[%s5785_s7 + $0x210] sm:$0xff] }
 0x61b   : > { %1742 = vmatprep.subr.bf16.mxu1 %v4410_v52  ;;  %v1524_v60 = vld [vmem:[%s5785_s7 + $0xc0] sm:$0xff]  ;;  %v4456_v52 = vcombine.high %v1915_v46, %v1917_v47 }
 0x61c   : > { %1480 = vadd.xlane.f32.xlu1 %v1475_v61  ;;  %1785 = vmatprep.subr.bf16.mxu0 %v4412_v58  ;;  %v4406_v63 = vcombine.high %v1522_v59, %v1524_v60  ;;  %v4405_v1 = vcombine.low %v1522_v59, %v1524_v60  ;;  %v1913_v58 = vld [vmem:[%s5785_s7 + $0x258] sm:$0xff]  ;;  %v4455_v60 = vcombine.low %v1915_v46, %v1917_v47  ;;  %v5106_v46 = vld [vmem:[%s5798_s17 + $0x168] sm:$0xff]  }
 0x61d   : > { %1786 = vmatpush1.bf16.msra.mxu0 %v4411_v57  ;;  %v1911_v57 = vld [vmem:[%s5785_s7 + $0x218] sm:$0xff]  ;;  %v5107_v47 = vld [vmem:[%s5798_s17 + $0x1e8] sm:$0xff]  }
 0x6a1   : > { %v1479_v7 = vpop.xlane.xlu0 %1478 }
 0x6a2   : > { %v1483_v8 = vmul.f32 0.0078125, %v1479_v7  ;;  %v4402_v7 = vcombine.high %v1518_v5, %v1520_v6 }
 0x6a4   : > { %v5964_v9 = vsub.f32 %v1474_v56, %v1483_v8  ;;  %v4409_v56 = vcombine.low %v1526_v49, %v1528_v50  ;;  %v1521_v8 = vld [vmem:[%s5785_s7 + $0x48] sm:$0xff]  ;;  %v4457_v49 = vcombine.low %v1918_v36, %v1920_v37  ;;  %v4459_v50 = vcombine.low %v1919_v38, %v1921_v41  ;;  %v5098_v36 = vld [vmem:[%s5798_s17 + $0x178] sm:$0xff]  }
 0x6a5   : > { %v1481_v10 = vpop.xlane.xlu1 %1480  ;;  %v5099_v37 = vld [vmem:[%s5798_s17 + $0x1f8] sm:$0xff]  }
 0x6a6   : > { %v1484_v14 = vmul.f32 0.0078125, %v1481_v10  ;;  %v1487_v54 = vmul.f32 %v5964_v9, %v5964_v9  ;;  %1743 = vmatpush1.bf16.msra.mxu1 %v4409_v56  ;;  %v4401_v10 = vcombine.low %v1518_v5, %v1520_v6  ;;  %v1912_v56 = vld [vmem:[%s5785_s7 + $0x250] sm:$0xff]  ;;  %v4451_v6 = vcombine.low %v1911_v57, %v1913_v58  ;;  %v5100_v38 = vld [vmem:[%s5798_s17 + $0x138] sm:$0xff]  }
 0x6a7   : > { %1744 = vmatprep.subr.bf16.mxu1 %v4406_v63  ;;  %v4452_v63 = vcombine.high %v1911_v57, %v1913_v58  ;;  %v4449_v5 = vcombine.low %v1910_v55, %v1912_v56  ;;  %v5101_v41 = vld [vmem:[%s5798_s17 + $0x1b8] sm:$0xff]  }
 0x6a8   : > { %v5968_v15 = vsub.f32 %v1475_v61, %v1484_v14  ;;  %1489 = vadd.xlane.f32.xlu0 %v1487_v54  ;;  %v1523_v61 = vld [vmem:[%s5785_s7 + $0x88] sm:$0xff]  ;;  %v4403_v14 = vcombine.low %v1519_v53, %v1521_v8  ;;  %v4404_v54 = vcombine.high %v1519_v53, %v1521_v8  ;;  %v1902_v8 = vld [vmem:[%s5785_s7 + $0x110] sm:$0xff]  ;;  %v5114_v57 = vld [vmem:[%s5798_s17 + $0x158] sm:$0xff]  }
 0x6a9   : > { %v4407_v2 = vcombine.low %v1523_v61, %v1525_v0  ;;  %v4408_v4 = vcombine.high %v1523_v61, %v1525_v0  ;;  %v4450_v61 = vcombine.high %v1910_v55, %v1912_v56  ;;  %v1906_v0 = vld [vmem:[%s5785_s7 + $0x190] sm:$0xff]  ;;  %v5112_v55 = vld [vmem:[%s5798_s17 + $0x120] sm:$0xff]   ;;  %v5115_v58 = vld [vmem:[%s5798_s17 + $0x1d8] sm:$0xff]  }
 0x6aa   : > { %v1488_v16 = vmul.f32 %v5968_v15, %v5968_v15  ;;  %1745 = vmatpush1.bf16.msra.mxu1 %v4405_v1  ;;  %v1908_v1 = vld [vmem:[%s5785_s7 + $0x1d0] sm:$0xff]  ;;  %v5113_v56 = vld [vmem:[%s5798_s17 + $0x1a0] sm:$0xff]  }
 0x6ab   : > { %1787 = vmatprep.subr.bf16.mxu0 %v4408_v4  ;;  %1746 = vmatprep.subr.bf16.mxu1 %v4402_v7  ;;  %v1909_v4 = vld [vmem:[%s5785_s7 + $0x1d8] sm:$0xff]  ;;  %v4446_v53 = vcombine.high %v1906_v0, %v1908_v1 }
 0x6ac   : > { %1491 = vadd.xlane.f32.xlu1 %v1488_v16  ;;  %1788 = vmatpush1.bf16.msra.mxu0 %v4407_v2  ;;  %v1922_v16 = vld [vmem:[%s5785_s7 + $0x390] sm:$0xff]  ;;  %v1907_v2 = vld [vmem:[%s5785_s7 + $0x198] sm:$0xff] }
 0x6ad   : > { %1789 = vmatprep.subr.bf16.mxu0 %v4404_v54  ;;  %v4461_v62 = vcombine.low %v1922_v16, %v1924_v17  ;;  %v4462_v13 = vcombine.high %v1922_v16, %v1924_v17  ;;  %v4448_v7 = vcombine.high %v1907_v2, %v1909_v4  ;;  %v1905_v54 = vld [vmem:[%s5785_s7 + $0x158] sm:$0xff]  ;;  %v4445_v16 = vcombine.low %v1906_v0, %v1908_v1  ;;  %v5120_v0 = vld [vmem:[%s5798_s17 + $0x110] sm:$0xff]  }
 0x6ae   : > { %1747 = vmatpush1.bf16.msra.mxu1 %v4401_v10  ;;  %v1904_v10 = vld [vmem:[%s5785_s7 + $0x150] sm:$0xff]  ;;  %v4447_v17 = vcombine.low %v1907_v2, %v1909_v4  ;;  %v5122_v2 = vld [vmem:[%s5798_s17 + $0x148] sm:$0xff]  }
 0x6af   : > { %2108 = vmatprep.subr.bf16.mxu1 %v4462_v13  ;;  %v4442_v18 = vcombine.high %v1902_v8, %v1904_v10  ;;  %v1898_v13 = vld [vmem:[%s5785_s7 + $0x90] sm:$0xff]  ;;  %v5123_v4 = vld [vmem:[%s5798_s17 + $0x1c8] sm:$0xff]  }
 0x6b0   : > { %1790 = vmatpush1.bf16.msra.mxu0 %v4403_v14  ;;  %v1903_v14 = vld [vmem:[%s5785_s7 + $0x118] sm:$0xff]  ;;  %v5121_v1 = vld [vmem:[%s5798_s17 + $0x190] sm:$0xff]  }
 0x6b1   : > { %2151 = vmatprep.subr.bf16.mxu0 %v4464_v21  ;;  %v1901_v21 = vld [vmem:[%s5785_s7 + $0xd8] sm:$0xff] }
 0x731   : > { %v1490_v22 = vpop.xlane.xlu0 %1489 }
 0x732   : > { %v1493_v23 = vmul.f32 0.0078125, %v1490_v22  ;;  %v4441_v22 = vcombine.low %v1902_v8, %v1904_v10  ;;  %v5128_v8 = vld [vmem:[%s5798_s17 + $0x100] sm:$0xff]  }
 0x733   : > { %v5129_v10 = vld [vmem:[%s5798_s17 + $0x180] sm:$0xff]  }
 0x734   : > { %v1495_v24 = vadd.f32 1e-05, %v1493_v23  ;;  %v4443_v23 = vcombine.low %v1903_v14, %v1905_v54 }
 0x735   : > { %v1492_v25 = vpop.xlane.xlu1 %1491 }
 0x736   : > { %5258 = vrsqrt.f32 %v1495_v24  ;;  %v1494_v26 = vmul.f32 0.0078125, %v1492_v25  ;;  %v4438_v24 = vcombine.high %v1898_v13, %v1900_v19 }
 0x738   : > { %v1496_v27 = vadd.f32 1e-05, %v1494_v26  ;;  %v1894_v26 = vld [vmem:[%s5785_s7 + $0x10] sm:$0xff] }
 0x73a   : > { %5260 = vrsqrt.f32 %v1496_v27  ;;  %v1896_v27 = vld [vmem:[%s5785_s7 + $0x50] sm:$0xff] }
 0x743   : > { %v5259_v28 = vpop.eup %5258 }
 0x744   : > { %v1499_v29 = vmul.f32 %v5259_v28, %v5964_v9  ;;  %v1895_v28 = vld [vmem:[%s5785_s7 + $0x18] sm:$0xff] }
 0x746   : > { %v1507_v32 = vmul.f32 %v4399_v30, %v1499_v29  ;;  %v1897_v29 = vld [vmem:[%s5785_s7 + $0x58] sm:$0xff] }
 0x747   : > { %v5261_v31 = vpop.eup %5260 }
 0x748   : > { %v1500_v33 = vmul.f32 %v5261_v31, %v5968_v15  ;;  %v6012_v12 = vadd.f32 %v4400_v34, %v1507_v32  ;;  %v1916_v15 = vld [vmem:[%s5785_s7 + $0x2d0] sm:$0xff]  ;;  %v4434_v32 = vcombine.high %v1894_v26, %v1896_v27 }
 0x749   : > { %v4454_v51 = vcombine.high %v1914_v45, %v1916_v15  ;;  %v4453_v59 = vcombine.low %v1914_v45, %v1916_v15  ;;  %v5104_v45 = vld [vmem:[%s5798_s17 + $0x130] sm:$0xff]  }
 0x74a   : > { %v1508_v35 = vmul.f32 %v4399_v30, %v1500_v33  ;;  %v4437_v30 = vcombine.low %v1898_v13, %v1900_v19  ;;  %v4436_v33 = vcombine.high %v1895_v28, %v1897_v29  ;;  %v5105_v15 = vld [vmem:[%s5798_s17 + $0x1b0] sm:$0xff]  }
 0x74c   : > { %v6014_v42 = vadd.f32 %v4400_v34, %v1508_v35  ;;  %v4433_v34 = vcombine.low %v1894_v26, %v1896_v27  ;;  %v4435_v35 = vcombine.low %v1895_v28, %v1897_v29 }
 0x74e   : > { %v6018_v9 = vpack.c.bf16 %v6014_v42, %v6012_v12 }
 0x750   : > { %1765 = vmatmul.mubr.bf16.vlgmr.msra.gmra.mxu1 %v6018_v9  ;;  %1808 = vmatmul.mubr.bf16.vlgmr.msra.gmra.mxu0 %v6018_v9 }
 0x751   : > { %2109 = vmatpush1.bf16.msra.mxu1 %v4461_v62  ;;  %2152 = vmatpush1.bf16.msra.mxu0 %v4463_v20  ;;  %v4444_v62 = vcombine.high %v1903_v14, %v1905_v54  ;;  %v1899_v20 = vld [vmem:[%s5785_s7 + $0x98] sm:$0xff] }
 0x752   : > { %2110 = vmatprep.subr.bf16.mxu1 %v4458_v43  ;;  %2153 = vmatprep.subr.bf16.mxu0 %v4460_v44  ;;  %v4440_v25 = vcombine.high %v1899_v20, %v1901_v21  ;;  %v4439_v31 = vcombine.low %v1899_v20, %v1901_v21  ;;  %v5102_v43 = vld [vmem:[%s5798_s17 + $0x170] sm:$0xff]   ;;  %v5130_v14 = vld [vmem:[%s5798_s17 + $0x78] sm:$0xff]  }
 0x753   : > { %2140 = vmatprep.mubr.bf16.mxu1 %v5488_v11  ;;  %2183 = vmatprep.mubr.bf16.mxu0 %v5488_v11  ;;  %v5103_v44 = vld [vmem:[%s5798_s17 + $0x1f0] sm:$0xff]   ;;  %v5131_v54 = vld [vmem:[%s5798_s17 + $0xf8] sm:$0xff]  }
 0x755   : > { %2111 = vmatpush1.bf16.msra.mxu1 %v4457_v49  ;;  %2154 = vmatpush1.bf16.msra.mxu0 %v4459_v50  ;;  %v5108_v49 = vld [vmem:[%s5798_s17 + $0x128] sm:$0xff]  }
 0x756   : > { %2112 = vmatprep.subr.bf16.mxu1 %v4454_v51  ;;  %2155 = vmatprep.subr.bf16.mxu0 %v4456_v52  ;;  %v5109_v50 = vld [vmem:[%s5798_s17 + $0x1a8] sm:$0xff]   ;;  %v5110_v51 = vld [vmem:[%s5798_s17 + $0x160] sm:$0xff]  }
 0x757   : > { %v5111_v52 = vld [vmem:[%s5798_s17 + $0x1e0] sm:$0xff]  }
 0x759   : > { %2113 = vmatpush1.bf16.msra.mxu1 %v4453_v59  ;;  %2156 = vmatpush1.bf16.msra.mxu0 %v4455_v60  ;;  %v5116_v59 = vld [vmem:[%s5798_s17 + $0x118] sm:$0xff]  }
 0x75a   : > { %2114 = vmatprep.subr.bf16.mxu1 %v4450_v61  ;;  %2157 = vmatprep.subr.bf16.mxu0 %v4452_v63  ;;  %v5117_v60 = vld [vmem:[%s5798_s17 + $0x198] sm:$0xff]   ;;  %v5118_v61 = vld [vmem:[%s5798_s17 + $0x150] sm:$0xff]  }
 0x75b   : > { %v5119_v63 = vld [vmem:[%s5798_s17 + $0x1d0] sm:$0xff]  }
 0x75d   : > { %2115 = vmatpush1.bf16.msra.mxu1 %v4449_v5  ;;  %2158 = vmatpush1.bf16.msra.mxu0 %v4451_v6  ;;  %v5124_v5 = vld [vmem:[%s5798_s17 + $0x108] sm:$0xff]  }
 0x75e   : > { %2116 = vmatprep.subr.bf16.mxu1 %v4446_v53  ;;  %2159 = vmatprep.subr.bf16.mxu0 %v4448_v7  ;;  %v5125_v6 = vld [vmem:[%s5798_s17 + $0x188] sm:$0xff]   ;;  %v5126_v53 = vld [vmem:[%s5798_s17 + $0x140] sm:$0xff]  }
 0x75f   : > { %v5127_v7 = vld [vmem:[%s5798_s17 + $0x1c0] sm:$0xff]  }
 0x761   : > { %2117 = vmatpush1.bf16.msra.mxu1 %v4445_v16  ;;  %2160 = vmatpush1.bf16.msra.mxu0 %v4447_v17 }
 0x762   : > { %2118 = vmatprep.subr.bf16.mxu1 %v4442_v18  ;;  %2161 = vmatprep.subr.bf16.mxu0 %v4444_v62 }
 0x765   : > { %2119 = vmatpush1.bf16.msra.mxu1 %v4441_v22  ;;  %2162 = vmatpush1.bf16.msra.mxu0 %v4443_v23  ;;  %v6093_v22 = vsub.s32 3, %v5855_v39  ;;  %v1926_v23 = vld [vmem:[%s5796_s27 + $0xa] sm:$0xf] }
 0x766   : > { %2120 = vmatprep.subr.bf16.mxu1 %v4438_v24  ;;  %2163 = vmatprep.subr.bf16.mxu0 %v4440_v25  ;;  %v1935_v26 = vrot.slane %v1926_v23, %v5858_v40  ;;  %v1931_v28 = vrot.slane %v1926_v23, %v5866_v48  ;;  %v1939_v29 = vrot.slane %v1926_v23, %v5895_v3 }
 0x767   : > { %v1943_v27 = vrot.slane %v1926_v23, %v6093_v22  ;;  %v5138_v23 = vld [vmem:[%s5798_s17 + $0x68] sm:$0xff]  }
 0x769   : > { %2121 = vmatpush1.bf16.msra.mxu1 %v4437_v30  ;;  %2164 = vmatpush1.bf16.msra.mxu0 %v4439_v31 }
 0x76a   : > { %2122 = vmatprep.subr.bf16.mxu1 %v4434_v32  ;;  %2165 = vmatprep.subr.bf16.mxu0 %v4436_v33  ;;  %v6101_v32 = vld [vmem:[%s5796_s27 + $0x6] sm:$0xf] }
 0x76b   : > { %v1559_v33 = vrot.slane %v6101_v32, %v5858_v40  ;;  %v1567_v39 = vrot.slane %v6101_v32, %v6093_v22 }
 0x76d   : > { %2123 = vmatpush1.bf16.msra.mxu1 %v4433_v34  ;;  %2166 = vmatpush1.bf16.msra.mxu0 %v4435_v35 }
 0x76e   : > { %4705 = vmatprep.subr.bf16.mxu1 %v5098_v36  ;;  %4727 = vmatprep.subr.bf16.mxu0 %v5099_v37 }
 0x770   : > { %2141 = vmatmul.mubr.bf16.vlgmr.msra.gmra.mxu1 %v6018_v9  ;;  %2184 = vmatmul.mubr.bf16.vlgmr.msra.gmra.mxu0 %v6018_v9 }
 0x771   : > { %4706 = vmatpush3.bf16.msra.mxu1 %v5100_v38  ;;  %4728 = vmatpush3.bf16.msra.mxu0 %v5101_v41 }
 0x772   : > { %4707 = vmatprep.subr.bf16.mxu1 %v5102_v43  ;;  %4729 = vmatprep.subr.bf16.mxu0 %v5103_v44 }
 0x775   : > { %4708 = vmatpush3.bf16.msra.mxu1 %v5104_v45  ;;  %4730 = vmatpush3.bf16.msra.mxu0 %v5105_v15 }
 0x776   : > { %4709 = vmatprep.subr.bf16.mxu1 %v5106_v46  ;;  %4731 = vmatprep.subr.bf16.mxu0 %v5107_v47 }
 0x779   : > { %4710 = vmatpush3.bf16.msra.mxu1 %v5108_v49  ;;  %4732 = vmatpush3.bf16.msra.mxu0 %v5109_v50 }
 0x77a   : > { %4711 = vmatprep.subr.bf16.mxu1 %v5110_v51  ;;  %4733 = vmatprep.subr.bf16.mxu0 %v5111_v52 }
 0x77d   : > { %4712 = vmatpush3.bf16.msra.mxu1 %v5112_v55  ;;  %4734 = vmatpush3.bf16.msra.mxu0 %v5113_v56 }
 0x77e   : > { %4713 = vmatprep.subr.bf16.mxu1 %v5114_v57  ;;  %4735 = vmatprep.subr.bf16.mxu0 %v5115_v58 }
 0x781   : > { %4714 = vmatpush3.bf16.msra.mxu1 %v5116_v59  ;;  %4736 = vmatpush3.bf16.msra.mxu0 %v5117_v60 }
 0x782   : > { %4715 = vmatprep.subr.bf16.mxu1 %v5118_v61  ;;  %4737 = vmatprep.subr.bf16.mxu0 %v5119_v63 }
 0x785   : > { %4716 = vmatpush3.bf16.msra.mxu1 %v5120_v0  ;;  %4738 = vmatpush3.bf16.msra.mxu0 %v5121_v1 }
 0x786   : > { %4717 = vmatprep.subr.bf16.mxu1 %v5122_v2  ;;  %4739 = vmatprep.subr.bf16.mxu0 %v5123_v4 }
 0x789   : > { %4718 = vmatpush3.bf16.msra.mxu1 %v5124_v5  ;;  %4740 = vmatpush3.bf16.msra.mxu0 %v5125_v6  ;;  %v5132_v5 = vld [vmem:[%s5798_s17 + $0x38] sm:$0xff]  }
 0x78a   : > { %4719 = vmatprep.subr.bf16.mxu1 %v5126_v53  ;;  %4741 = vmatprep.subr.bf16.mxu0 %v5127_v7  ;;  %v5133_v6 = vld [vmem:[%s5798_s17 + $0xb8] sm:$0xff]  }
 0x78d   : > { %4720 = vmatpush3.bf16.msra.mxu1 %v5128_v8  ;;  %4742 = vmatpush3.bf16.msra.mxu0 %v5129_v10 }
 0x78e   : > { %4749 = vmatprep.subr.bf16.mxu1 %v5130_v14  ;;  %4771 = vmatprep.subr.bf16.mxu0 %v5131_v54  ;;  %v5134_v14 = vld [vmem:[%s5798_s17 + $0x70] sm:$0xff]  }
 0x78f   : > { %v5135_v54 = vld [vmem:[%s5798_s17 + $0xf0] sm:$0xff]  }
 0x810   : > { %v6084_v16 = vpop.f32.mrf.mxu1  ;;  %v6086_v17 = vpop.f32.mrf.mxu0 }
 0x812   : > { %v1768_v18 = vpop.f32.mrf.mxu1  ;;  %v1811_v62 = vpop.f32.mrf.mxu0 }
 0x813   : > { %v1769_v51 = vadd.f32 %v1768_v18, %v1559_v33  ;;  %v1812_v52 = vadd.f32 %v1811_v62, %v1567_v39 }
 0x814   : > { %v6088_v13 = vpop.f32.mrf.mxu1  ;;  %v6090_v19 = vpop.f32.mrf.mxu0 }
 0x815   : > { %v1819_v53 = vmax.f32 %v1769_v51, 0.0  ;;  %v1821_v7 = vmax.f32 %v1812_v52, 0.0  ;;  %v5159_v51 = vld [vmem:[%s5798_s17 + $0xc0] sm:$0xff]  }
 0x816   : > { %v1772_v20 = vpop.f32.mrf.mxu1  ;;  %v1815_v21 = vpop.f32.mrf.mxu0  ;;  %v2846_v52 = vld [vmem:[%s5785_s7 + $0x3a0] sm:$0xff] }
 0x817   : > { %v1773_v43 = vadd.f32 %v1772_v20, %v1559_v33  ;;  %v1816_v44 = vadd.f32 %v1815_v21, %v1567_v39  ;;  %v5136_v20 = vld [vmem:[%s5798_s17 + $0x30] sm:$0xff]   ;;  %v5147_v33 = vld [vmem:[%s5798_s17 + $0xd8] sm:$0xff]  }
 0x818   : > { %v5137_v21 = vld [vmem:[%s5798_s17 + $0xb0] sm:$0xff]   ;;  %v5148_v39 = vld [vmem:[%s5798_s17 + $0x18] sm:$0xff]  }
 0x819   : > { %v1823_v61 = vmax.f32 %v1773_v43, 0.0  ;;  %v1825_v63 = vmax.f32 %v1816_v44, 0.0  ;;  %v5155_v43 = vld [vmem:[%s5798_s17 + $0xc8] sm:$0xff]   ;;  %v1555_v44 = vrot.slane %v6101_v32, %v5866_v48 }
 0x81b   : > { %v1827_v18 = vpack.c.bf16 %v1823_v61, %v1819_v53  ;;  %v1829_v62 = vpack.c.bf16 %v1825_v63, %v1821_v7 }
 0x830   : > { %v2142_v24 = vpop.f32.mrf.mxu1  ;;  %v2185_v25 = vpop.f32.mrf.mxu0 }
 0x831   : > { %v2143_v45 = vadd.f32 %v2142_v24, %v1931_v28  ;;  %v2186_v15 = vadd.f32 %v2185_v25, %v1939_v29  ;;  %v5139_v24 = vld [vmem:[%s5798_s17 + $0xe8] sm:$0xff]  }
 0x832   : > { %v2144_v30 = vpop.f32.mrf.mxu1  ;;  %v2187_v31 = vpop.f32.mrf.mxu0  ;;  %v5140_v25 = vld [vmem:[%s5798_s17 + $0x28] sm:$0xff]  }
 0x833   : > { %v2145_v36 = vadd.f32 %v2144_v30, %v1935_v26  ;;  %v2188_v37 = vadd.f32 %v2187_v31, %v1943_v27  ;;  %v2194_v0 = vmax.f32 %v2143_v45, 0.0  ;;  %v2196_v1 = vmax.f32 %v2186_v15, 0.0  ;;  %v5145_v30 = vld [vmem:[%s5798_s17 + $0xa0] sm:$0xff]   ;;  %v5146_v31 = vld [vmem:[%s5798_s17 + $0x58] sm:$0xff]   ;;  %v5156_v15 = vld [vmem:[%s5798_s17 + $0x8] sm:$0xff]  }
 0x834   : > { %v2146_v34 = vpop.f32.mrf.mxu1  ;;  %v2189_v35 = vpop.f32.mrf.mxu0  ;;  %v1563_v45 = vrot.slane %v6101_v32, %v5895_v3  ;;  %v2849_v32 = vld [vmem:[%s5785_s7 + $0x3e8] sm:$0xff] }
 0x835   : > { %v2147_v38 = vadd.f32 %v2146_v34, %v1931_v28  ;;  %v2190_v41 = vadd.f32 %v2189_v35, %v1939_v29  ;;  %v2195_v57 = vmax.f32 %v2145_v36, 0.0  ;;  %v2197_v58 = vmax.f32 %v2188_v37, 0.0  ;;  %v5143_v28 = vld [vmem:[%s5798_s17 + $0xe0] sm:$0xff]   ;;  %v5149_v34 = vld [vmem:[%s5798_s17 + $0x98] sm:$0xff]   ;;  %v5150_v35 = vld [vmem:[%s5798_s17 + $0x50] sm:$0xff]  }
 0x836   : > { %v2148_v46 = vpop.f32.mrf.mxu1  ;;  %v2191_v47 = vpop.f32.mrf.mxu0  ;;  %v5144_v29 = vld [vmem:[%s5798_s17 + $0x20] sm:$0xff]   ;;  %v5151_v36 = vld [vmem:[%s5798_s17 + $0xd0] sm:$0xff]  }
 0x837   : > { %v2149_v49 = vadd.f32 %v2148_v46, %v1935_v26  ;;  %v2192_v50 = vadd.f32 %v2191_v47, %v1943_v27  ;;  %v2198_v55 = vmax.f32 %v2147_v38, 0.0  ;;  %v2200_v56 = vmax.f32 %v2190_v41, 0.0  ;;  %v5141_v26 = vld [vmem:[%s5798_s17 + $0xa8] sm:$0xff]   ;;  %v5142_v27 = vld [vmem:[%s5798_s17 + $0x60] sm:$0xff]   ;;  %v5152_v37 = vld [vmem:[%s5798_s17 + $0x10] sm:$0xff]  }
 0x838   : > { %v5153_v38 = vld [vmem:[%s5798_s17 + $0x90] sm:$0xff]   ;;  %v5154_v41 = vld [vmem:[%s5798_s17 + $0x48] sm:$0xff]   ;;  %v1771_v47 = vadd.f32 %v6088_v13, %v1555_v44  ;;  %v5160_v13 = vld [vmem:[%s5798_s17] sm:$0xff]  }
 0x839   : > { %v2199_v59 = vmax.f32 %v2149_v49, 0.0  ;;  %v2201_v60 = vmax.f32 %v2192_v50, 0.0  ;;  %v2202_v8 = vpack.c.bf16 %v2198_v55, %v2194_v0  ;;  %v2204_v10 = vpack.c.bf16 %v2200_v56, %v2196_v1  ;;  %v5157_v46 = vld [vmem:[%s5798_s17 + $0x88] sm:$0xff]   ;;  %v5158_v50 = vld [vmem:[%s5798_s17 + $0x40] sm:$0xff]  }
 0x83a   : > { %v1814_v49 = vadd.f32 %v6090_v19, %v1563_v45  ;;  %v2848_v55 = vld [vmem:[%s5785_s7 + $0x3e0] sm:$0xff]  ;;  %v2847_v56 = vld [vmem:[%s5785_s7 + $0x3a8] sm:$0xff] }
 0x83b   : > { %v2203_v2 = vpack.c.bf16 %v2199_v59, %v2195_v57  ;;  %v2205_v4 = vpack.c.bf16 %v2201_v60, %v2197_v58  ;;  %v1767_v57 = vadd.f32 %v6084_v16, %v1555_v44  ;;  %v1810_v58 = vadd.f32 %v6086_v17, %v1563_v45  ;;  %v5161_v19 = vld [vmem:[%s5798_s17 + $0x80] sm:$0xff]  }
 0x83c   : > { %v1822_v59 = vmax.f32 %v1771_v47, 0.0  ;;  %v1824_v60 = vmax.f32 %v1814_v49, 0.0  ;;  %v4558_v61 = vcombine.high %v2846_v52, %v2848_v55  ;;  %v4560_v63 = vcombine.high %v2847_v56, %v2849_v32  ;;  %v2842_v0 = vld [vmem:[%s5785_s7 + $0x320] sm:$0xff] }
 0x83d   : > { %2494 = vmatprep.mubr.bf16.mxu1 %v2203_v2  ;;  %2535 = vmatprep.mubr.bf16.mxu0 %v2205_v4  ;;  %v2844_v1 = vld [vmem:[%s5785_s7 + $0x360] sm:$0xff]  ;;  %v2843_v2 = vld [vmem:[%s5785_s7 + $0x328] sm:$0xff]  ;;  %v1818_v16 = vmax.f32 %v1767_v57, 0.0  ;;  %v1820_v17 = vmax.f32 %v1810_v58, 0.0 }
 0x83e   : > { %2495 = vmatmul.mubr.bf16.vlgmr.msra.gmra.mxu1 %v2202_v8  ;;  %2536 = vmatmul.mubr.bf16.vlgmr.msra.gmra.mxu0 %v2204_v10  ;;  %v2845_v4 = vld [vmem:[%s5785_s7 + $0x368] sm:$0xff]  ;;  %v4554_v53 = vcombine.high %v2842_v0, %v2844_v1  ;;  %v2826_v44 = vld [vmem:[%s5785_s7 + $0x120] sm:$0xff] }
 0x83f   : > { %4750 = vmatpush3.bf16.msra.mxu1 %v5132_v5  ;;  %4772 = vmatpush3.bf16.msra.mxu0 %v5133_v6  ;;  %v4557_v5 = vcombine.low %v2846_v52, %v2848_v55  ;;  %v4559_v6 = vcombine.low %v2847_v56, %v2849_v32  ;;  %v1826_v7 = vpack.c.bf16 %v1822_v59, %v1818_v16  ;;  %v2828_v45 = vld [vmem:[%s5785_s7 + $0x160] sm:$0xff]  ;;  %v2823_v56 = vld [vmem:[%s5785_s7 + $0xa8] sm:$0xff] }
 0x840   : > { %2768 = vmatprep.mubr.bf16.mxu1 %v1827_v18  ;;  %2809 = vmatprep.mubr.bf16.mxu0 %v1829_v62  ;;  %v1828_v8 = vpack.c.bf16 %v1824_v60, %v1820_v17  ;;  %v4556_v10 = vcombine.high %v2843_v2, %v2845_v4  ;;  %v2839_v18 = vld [vmem:[%s5785_s7 + $0x2a8] sm:$0xff]  ;;  %v2822_v52 = vld [vmem:[%s5785_s7 + $0xa0] sm:$0xff]  ;;  %v4537_v57 = vcombine.low %v2826_v44, %v2828_v45 }
 0x841   : > { %4751 = vmatprep.subr.bf16.mxu1 %v5134_v14  ;;  %4773 = vmatprep.subr.bf16.mxu0 %v5135_v54  ;;  %v2838_v14 = vld [vmem:[%s5785_s7 + $0x2a0] sm:$0xff]  ;;  %v2841_v62 = vld [vmem:[%s5785_s7 + $0x2e8] sm:$0xff] }
 0x842   : > { %v2840_v54 = vld [vmem:[%s5785_s7 + $0x2e0] sm:$0xff]  ;;  %v2825_v32 = vld [vmem:[%s5785_s7 + $0xe8] sm:$0xff] }
 0x843   : > { %4752 = vmatpush3.bf16.msra.mxu1 %v5136_v20  ;;  %4774 = vmatpush3.bf16.msra.mxu0 %v5137_v21  ;;  %v4553_v20 = vcombine.low %v2842_v0, %v2844_v1  ;;  %v4555_v21 = vcombine.low %v2843_v2, %v2845_v4  ;;  %v2824_v55 = vld [vmem:[%s5785_s7 + $0xe0] sm:$0xff]  ;;  %v4535_v1 = vcombine.low %v2823_v56, %v2825_v32 }
 0x844   : > { %4753 = vmatprep.subr.bf16.mxu1 %v5138_v23  ;;  %4775 = vmatprep.subr.bf16.mxu0 %v5139_v24  ;;  %v4550_v23 = vcombine.high %v2838_v14, %v2840_v54  ;;  %v4552_v24 = vcombine.high %v2839_v18, %v2841_v62  ;;  %v2818_v59 = vld [vmem:[%s5785_s7 + $0x20] sm:$0xff]  ;;  %v4533_v0 = vcombine.low %v2822_v52, %v2824_v55 }
 0x845   : > { %v2820_v60 = vld [vmem:[%s5785_s7 + $0x60] sm:$0xff] }
 0x846   : > { %v4530_v2 = vcombine.high %v2818_v59, %v2820_v60  ;;  %v4529_v16 = vcombine.low %v2818_v59, %v2820_v60 }
 0x847   : > { %4754 = vmatpush3.bf16.msra.mxu1 %v5140_v25  ;;  %4776 = vmatpush3.bf16.msra.mxu0 %v5141_v26  ;;  %v2834_v25 = vld [vmem:[%s5785_s7 + $0x220] sm:$0xff] }
 0x848   : > { %4755 = vmatprep.subr.bf16.mxu1 %v5142_v27  ;;  %4777 = vmatprep.subr.bf16.mxu0 %v5143_v28  ;;  %v2836_v26 = vld [vmem:[%s5785_s7 + $0x260] sm:$0xff]  ;;  %v2835_v27 = vld [vmem:[%s5785_s7 + $0x228] sm:$0xff] }
 0x849   : > { %v2837_v28 = vld [vmem:[%s5785_s7 + $0x268] sm:$0xff] }
 0x84b   : > { %4756 = vmatpush3.bf16.msra.mxu1 %v5144_v29  ;;  %4778 = vmatpush3.bf16.msra.mxu0 %v5145_v30  ;;  %v4549_v29 = vcombine.low %v2838_v14, %v2840_v54  ;;  %v4551_v30 = vcombine.low %v2839_v18, %v2841_v62  ;;  %v5168_v14 = vld [vmem:[%s5798_s17 + $0x230] sm:$0xff]   ;;  %v5170_v18 = vld [vmem:[%s5798_s17 + $0x268] sm:$0xff]  }
 0x84c   : > { %4757 = vmatprep.subr.bf16.mxu1 %v5146_v31  ;;  %4779 = vmatprep.subr.bf16.mxu0 %v5147_v33  ;;  %v4546_v31 = vcombine.high %v2834_v25, %v2836_v26  ;;  %v4548_v33 = vcombine.high %v2835_v27, %v2837_v28  ;;  %v5169_v54 = vld [vmem:[%s5798_s17 + $0x2b0] sm:$0xff]   ;;  %v5171_v62 = vld [vmem:[%s5798_s17 + $0x2e8] sm:$0xff]  }
 0x84f   : > { %4758 = vmatpush3.bf16.msra.mxu1 %v5148_v39  ;;  %4780 = vmatpush3.bf16.msra.mxu0 %v5149_v34  ;;  %v2830_v39 = vld [vmem:[%s5785_s7 + $0x1a0] sm:$0xff] }
 0x850   : > { %4759 = vmatprep.subr.bf16.mxu1 %v5150_v35  ;;  %4781 = vmatprep.subr.bf16.mxu0 %v5151_v36  ;;  %v2832_v34 = vld [vmem:[%s5785_s7 + $0x1e0] sm:$0xff]  ;;  %v2831_v35 = vld [vmem:[%s5785_s7 + $0x1a8] sm:$0xff] }
 0x851   : > { %v2833_v36 = vld [vmem:[%s5785_s7 + $0x1e8] sm:$0xff]  ;;  %v4541_v47 = vcombine.low %v2830_v39, %v2832_v34 }
 0x852   : > { %v4543_v49 = vcombine.low %v2831_v35, %v2833_v36 }
 0x853   : > { %4760 = vmatpush3.bf16.msra.mxu1 %v5152_v37  ;;  %4782 = vmatpush3.bf16.msra.mxu0 %v5153_v38  ;;  %v4545_v37 = vcombine.low %v2834_v25, %v2836_v26  ;;  %v4547_v38 = vcombine.low %v2835_v27, %v2837_v28  ;;  %v5176_v25 = vld [vmem:[%s5798_s17 + $0x220] sm:$0xff]   ;;  %v5178_v27 = vld [vmem:[%s5798_s17 + $0x258] sm:$0xff]  }
 0x854   : > { %4761 = vmatprep.subr.bf16.mxu1 %v5154_v41  ;;  %4783 = vmatprep.subr.bf16.mxu0 %v5155_v43  ;;  %v4542_v41 = vcombine.high %v2830_v39, %v2832_v34  ;;  %v4544_v43 = vcombine.high %v2831_v35, %v2833_v36  ;;  %v5177_v26 = vld [vmem:[%s5798_s17 + $0x2a0] sm:$0xff]   ;;  %v5179_v28 = vld [vmem:[%s5798_s17 + $0x2d8] sm:$0xff]   ;;  %v5184_v39 = vld [vmem:[%s5798_s17 + $0x210] sm:$0xff]  }
 0x855   : > { %v5185_v34 = vld [vmem:[%s5798_s17 + $0x290] sm:$0xff]   ;;  %v5186_v35 = vld [vmem:[%s5798_s17 + $0x248] sm:$0xff]  }
 0x856   : > { %v5187_v36 = vld [vmem:[%s5798_s17 + $0x2c8] sm:$0xff]  }
 0x857   : > { %4762 = vmatpush3.bf16.msra.mxu1 %v5156_v15  ;;  %4784 = vmatpush3.bf16.msra.mxu0 %v5157_v46  ;;  %v2827_v15 = vld [vmem:[%s5785_s7 + $0x128] sm:$0xff] }
 0x858   : > { %4763 = vmatprep.subr.bf16.mxu1 %v5158_v50  ;;  %4785 = vmatprep.subr.bf16.mxu0 %v5159_v51  ;;  %v2829_v46 = vld [vmem:[%s5785_s7 + $0x168] sm:$0xff]  ;;  %v4538_v50 = vcombine.high %v2826_v44, %v2828_v45  ;;  %v5192_v44 = vld [vmem:[%s5798_s17 + $0x200] sm:$0xff]  }
 0x859   : > { %v4540_v51 = vcombine.high %v2827_v15, %v2829_v46  ;;  %v4539_v58 = vcombine.low %v2827_v15, %v2829_v46  ;;  %v5193_v45 = vld [vmem:[%s5798_s17 + $0x280] sm:$0xff]   ;;  %v6214_v15 = vld [vmem:[%s5785_s7 + $0x3b0] sm:$0xff] }
 0x85a   : > { %v6217_v46 = vld [vmem:[%s5785_s7 + $0x3f0] sm:$0xff] }
 0x85b   : > { %4764 = vmatpush3.bf16.msra.mxu1 %v5160_v13  ;;  %4786 = vmatpush3.bf16.msra.mxu0 %v5161_v19  ;;  %v4534_v13 = vcombine.high %v2822_v52, %v2824_v55  ;;  %v4536_v19 = vcombine.high %v2823_v56, %v2825_v32 }
 0x85c   : > { %3032 = vmatprep.subr.bf16.mxu1 %v4558_v61  ;;  %3075 = vmatprep.subr.bf16.mxu0 %v4560_v63  ;;  %v2819_v61 = vld [vmem:[%s5785_s7 + $0x28] sm:$0xff] }
 0x85d   : > { %v2821_v63 = vld [vmem:[%s5785_s7 + $0x68] sm:$0xff] }
 0x85e   : > { %2769 = vmatmul.mubr.bf16.vlgmr.msra.gmra.mxu1 %v1826_v7  ;;  %2810 = vmatmul.mubr.bf16.vlgmr.msra.gmra.mxu0 %v1828_v8  ;;  %v4532_v4 = vcombine.high %v2819_v61, %v2821_v63  ;;  %v4531_v17 = vcombine.low %v2819_v61, %v2821_v63  ;;  %v5165_v7 = vld [vmem:[%s5798_s17 + $0x2b8] sm:$0xff]   ;;  %v5166_v8 = vld [vmem:[%s5798_s17 + $0x270] sm:$0xff]  }
 0x85f   : > { %3033 = vmatpush1.bf16.msra.mxu1 %v4557_v5  ;;  %3076 = vmatpush1.bf16.msra.mxu0 %v4559_v6  ;;  %v5162_v5 = vld [vmem:[%s5798_s17 + $0x278] sm:$0xff]  }
 0x860   : > { %3034 = vmatprep.subr.bf16.mxu1 %v4554_v53  ;;  %3077 = vmatprep.subr.bf16.mxu0 %v4556_v10  ;;  %v5163_v6 = vld [vmem:[%s5798_s17 + $0x2f8] sm:$0xff]   ;;  %v5167_v10 = vld [vmem:[%s5798_s17 + $0x2f0] sm:$0xff]  }
 0x861   : > { %3064 = vmatprep.mubr.bf16.mxu1 %v5488_v11  ;;  %3107 = vmatprep.mubr.bf16.mxu0 %v5488_v11  ;;  %v5164_v53 = vld [vmem:[%s5798_s17 + $0x238] sm:$0xff]  }
 0x863   : > { %3035 = vmatpush1.bf16.msra.mxu1 %v4553_v20  ;;  %3078 = vmatpush1.bf16.msra.mxu0 %v4555_v21  ;;  %v5172_v20 = vld [vmem:[%s5798_s17 + $0x228] sm:$0xff]  }
 0x864   : > { %3036 = vmatprep.subr.bf16.mxu1 %v4550_v23  ;;  %3079 = vmatprep.subr.bf16.mxu0 %v4552_v24  ;;  %v5173_v21 = vld [vmem:[%s5798_s17 + $0x2a8] sm:$0xff]   ;;  %v5174_v23 = vld [vmem:[%s5798_s17 + $0x260] sm:$0xff]  }
 0x865   : > { %v5175_v24 = vld [vmem:[%s5798_s17 + $0x2e0] sm:$0xff]  }
 0x867   : > { %3037 = vmatpush1.bf16.msra.mxu1 %v4549_v29  ;;  %3080 = vmatpush1.bf16.msra.mxu0 %v4551_v30  ;;  %v5180_v29 = vld [vmem:[%s5798_s17 + $0x218] sm:$0xff]  }
 0x868   : > { %3038 = vmatprep.subr.bf16.mxu1 %v4546_v31  ;;  %3081 = vmatprep.subr.bf16.mxu0 %v4548_v33  ;;  %v5181_v30 = vld [vmem:[%s5798_s17 + $0x298] sm:$0xff]   ;;  %v5182_v31 = vld [vmem:[%s5798_s17 + $0x250] sm:$0xff]  }
 0x869   : > { %v5183_v33 = vld [vmem:[%s5798_s17 + $0x2d0] sm:$0xff]  }
 0x86b   : > { %3039 = vmatpush1.bf16.msra.mxu1 %v4545_v37  ;;  %3082 = vmatpush1.bf16.msra.mxu0 %v4547_v38  ;;  %v5188_v37 = vld [vmem:[%s5798_s17 + $0x208] sm:$0xff]  }
 0x86c   : > { %3040 = vmatprep.subr.bf16.mxu1 %v4542_v41  ;;  %3083 = vmatprep.subr.bf16.mxu0 %v4544_v43  ;;  %v5189_v38 = vld [vmem:[%s5798_s17 + $0x288] sm:$0xff]   ;;  %v5190_v41 = vld [vmem:[%s5798_s17 + $0x240] sm:$0xff]  }
 0x86d   : > { %v5191_v43 = vld [vmem:[%s5798_s17 + $0x2c0] sm:$0xff]  }
 0x86f   : > { %3041 = vmatpush1.bf16.msra.mxu1 %v4541_v47  ;;  %3084 = vmatpush1.bf16.msra.mxu0 %v4543_v49  ;;  %v6220_v47 = vld [vmem:[%s5785_s7 + $0x3b8] sm:$0xff]  ;;  %v4622_v49 = vcombine.high %v6214_v15, %v6217_v46 }
 0x870   : > { %3042 = vmatprep.subr.bf16.mxu1 %v4538_v50  ;;  %3085 = vmatprep.subr.bf16.mxu0 %v4540_v51  ;;  %v6225_v50 = vld [vmem:[%s5785_s7 + $0x3f8] sm:$0xff]  ;;  %v4621_v51 = vcombine.low %v6214_v15, %v6217_v46 }
 0x871   : > { %v4623_v52 = vcombine.low %v6220_v47, %v6225_v50  ;;  %v4624_v55 = vcombine.high %v6220_v47, %v6225_v50 }
 0x873   : > { %3043 = vmatpush1.bf16.msra.mxu1 %v4537_v57  ;;  %3086 = vmatpush1.bf16.msra.mxu0 %v4539_v58 }
 0x874   : > { %3044 = vmatprep.subr.bf16.mxu1 %v4534_v13  ;;  %3087 = vmatprep.subr.bf16.mxu0 %v4536_v19 }
 0x877   : > { %3045 = vmatpush1.bf16.msra.mxu1 %v4533_v0  ;;  %3088 = vmatpush1.bf16.msra.mxu0 %v4535_v1 }
 0x878   : > { %3046 = vmatprep.subr.bf16.mxu1 %v4530_v2  ;;  %3089 = vmatprep.subr.bf16.mxu0 %v4532_v4 }
 0x87b   : > { %3047 = vmatpush1.bf16.msra.mxu1 %v4529_v16  ;;  %3090 = vmatpush1.bf16.msra.mxu0 %v4531_v17 }
 0x87c   : > { %4793 = vmatprep.subr.bf16.mxu1 %v5162_v5  ;;  %4815 = vmatprep.subr.bf16.mxu0 %v5163_v6 }
 0x87e   : > { %3065 = vmatmul.mubr.bf16.vlgmr.msra.gmra.mxu1 %v6018_v9  ;;  %3108 = vmatmul.mubr.bf16.vlgmr.msra.gmra.mxu0 %v6018_v9 }
 0x87f   : > { %4794 = vmatpush3.bf16.msra.mxu1 %v5164_v53  ;;  %4816 = vmatpush3.bf16.msra.mxu0 %v5165_v7 }
 0x880   : > { %4795 = vmatprep.subr.bf16.mxu1 %v5166_v8  ;;  %4817 = vmatprep.subr.bf16.mxu0 %v5167_v10 }
 0x883   : > { %4796 = vmatpush3.bf16.msra.mxu1 %v5168_v14  ;;  %4818 = vmatpush3.bf16.msra.mxu0 %v5169_v54 }
 0x884   : > { %4797 = vmatprep.subr.bf16.mxu1 %v5170_v18  ;;  %4819 = vmatprep.subr.bf16.mxu0 %v5171_v62 }
 0x887   : > { %4798 = vmatpush3.bf16.msra.mxu1 %v5172_v20  ;;  %4820 = vmatpush3.bf16.msra.mxu0 %v5173_v21 }
 0x888   : > { %4799 = vmatprep.subr.bf16.mxu1 %v5174_v23  ;;  %4821 = vmatprep.subr.bf16.mxu0 %v5175_v24 }
 0x88b   : > { %4800 = vmatpush3.bf16.msra.mxu1 %v5176_v25  ;;  %4822 = vmatpush3.bf16.msra.mxu0 %v5177_v26  ;;  %v2850_v25 = vld [vmem:[%s5796_s27 + $0xe] sm:$0xf] }
 0x88c   : > { %4801 = vmatprep.subr.bf16.mxu1 %v5178_v27  ;;  %4823 = vmatprep.subr.bf16.mxu0 %v5179_v28  ;;  %v2859_v28 = vrot.slane %v2850_v25, %v5858_v40 }
 0x88f   : > { %4802 = vmatpush3.bf16.msra.mxu1 %v5180_v29  ;;  %4824 = vmatpush3.bf16.msra.mxu0 %v5181_v30  ;;  %v2867_v29 = vrot.slane %v2850_v25, %v6093_v22  ;;  %v2855_v30 = vrot.slane %v2850_v25, %v5866_v48 }
 0x890   : > { %4803 = vmatprep.subr.bf16.mxu1 %v5182_v31  ;;  %4825 = vmatprep.subr.bf16.mxu0 %v5183_v33  ;;  %v2863_v31 = vrot.slane %v2850_v25, %v5895_v3  ;;  %v3488_v25 = vld [vmem:[%s5785_s7 + $0x270] sm:$0xff] }
 0x893   : > { %4804 = vmatpush3.bf16.msra.mxu1 %v5184_v39  ;;  %4826 = vmatpush3.bf16.msra.mxu0 %v5185_v34 }
 0x894   : > { %4805 = vmatprep.subr.bf16.mxu1 %v5186_v35  ;;  %4827 = vmatprep.subr.bf16.mxu0 %v5187_v36 }
 0x897   : > { %4806 = vmatpush3.bf16.msra.mxu1 %v5188_v37  ;;  %4828 = vmatpush3.bf16.msra.mxu0 %v5189_v38 }
 0x898   : > { %4807 = vmatprep.subr.bf16.mxu1 %v5190_v41  ;;  %4829 = vmatprep.subr.bf16.mxu0 %v5191_v43 }
 0x89b   : > { %4808 = vmatpush3.bf16.msra.mxu1 %v5192_v44  ;;  %4830 = vmatpush3.bf16.msra.mxu0 %v5193_v45 }
 0x89c   : > { %3684 = vmatprep.subr.bf16.mxu1 %v4622_v49  ;;  %3727 = vmatprep.subr.bf16.mxu0 %v4624_v55 }
 0x8fe   : > { %v4721_v56 = vpop.f32.mrf.mxu1  ;;  %v4743_v32 = vpop.f32.mrf.mxu0 }
 0x900   : > { %v4722_v57 = vpop.f32.mrf.mxu1  ;;  %v4744_v58 = vpop.f32.mrf.mxu0 }
 0x901   : > { %v4723_v13 = vadd.f32 %v4722_v57, %v4721_v56  ;;  %v4745_v19 = vadd.f32 %v4744_v58, %v4743_v32  ;;  %v3494_v58 = vld [vmem:[%s5785_s7 + $0x330] sm:$0xff] }
 0x902   : > { %v4724_v59 = vpop.f32.mrf.mxu1  ;;  %v4746_v60 = vpop.f32.mrf.mxu0 }
 0x903   : > { %v2538_v61 = vadd.f32 %v4745_v19, %v4723_v13  ;;  %v3496_v13 = vld [vmem:[%s5785_s7 + $0x370] sm:$0xff] }
 0x904   : > { %v4725_v63 = vpop.f32.mrf.mxu1  ;;  %v4747_v0 = vpop.f32.mrf.mxu0 }
 0x905   : > { %v4726_v1 = vadd.f32 %v4725_v63, %v4724_v59  ;;  %v4748_v2 = vadd.f32 %v4747_v0, %v4746_v60  ;;  %v3495_v63 = vld [vmem:[%s5785_s7 + $0x338] sm:$0xff] }
 0x906   : > { %v3497_v0 = vld [vmem:[%s5785_s7 + $0x378] sm:$0xff] }
 0x907   : > { %v2541_v4 = vadd.f32 %v4748_v2, %v4726_v1 }
 0x91e   : > { %v4765_v16 = vpop.f32.mrf.mxu1  ;;  %v4787_v17 = vpop.f32.mrf.mxu0 }
 0x920   : > { %v4766_v5 = vpop.f32.mrf.mxu1  ;;  %v4788_v6 = vpop.f32.mrf.mxu0 }
 0x921   : > { %v4767_v53 = vadd.f32 %v4766_v5, %v4765_v16  ;;  %v4789_v7 = vadd.f32 %v4788_v6, %v4787_v17  ;;  %v4618_v6 = vcombine.high %v3494_v58, %v3496_v13 }
 0x922   : > { %v4768_v8 = vpop.f32.mrf.mxu1  ;;  %v4790_v10 = vpop.f32.mrf.mxu0 }
 0x923   : > { %v2771_v14 = vadd.f32 %v4767_v53, %v2538_v61  ;;  %v4620_v53 = vcombine.high %v3495_v63, %v3497_v0 }
 0x924   : > { %v4769_v54 = vpop.f32.mrf.mxu1  ;;  %v4791_v18 = vpop.f32.mrf.mxu0 }
 0x925   : > { %v6233_v62 = vadd.f32 %v4789_v7, %v2771_v14  ;;  %v4770_v20 = vadd.f32 %v4769_v54, %v4768_v8  ;;  %v4792_v21 = vadd.f32 %v4791_v18, %v4790_v10  ;;  %v3490_v7 = vld [vmem:[%s5785_s7 + $0x2b0] sm:$0xff]  ;;  %v3491_v10 = vld [vmem:[%s5785_s7 + $0x2b8] sm:$0xff]  ;;  %v4617_v54 = vcombine.low %v3494_v58, %v3496_v13 }
 0x926   : > { %v3492_v8 = vld [vmem:[%s5785_s7 + $0x2f0] sm:$0xff]  ;;  %v3493_v14 = vld [vmem:[%s5785_s7 + $0x2f8] sm:$0xff]  ;;  %v4619_v18 = vcombine.low %v3495_v63, %v3497_v0 }
 0x927   : > { %v2774_v23 = vadd.f32 %v4770_v20, %v2541_v4  ;;  %v4614_v20 = vcombine.high %v3490_v7, %v3492_v8  ;;  %v4613_v15 = vcombine.low %v3490_v7, %v3492_v8  ;;  %v4615_v46 = vcombine.low %v3491_v10, %v3493_v14  ;;  %v3470_v13 = vld [vmem:[%s5785_s7 + $0x30] sm:$0xff] }
 0x928   : > { %v5199_v7 = vld [vmem:[%s5798_s17 + $0x3f0] sm:$0xff]  }
 0x929   : > { %v6235_v24 = vadd.f32 %v4792_v21, %v2774_v23  ;;  %v4616_v21 = vcombine.high %v3491_v10, %v3493_v14  ;;  %v3486_v23 = vld [vmem:[%s5785_s7 + $0x230] sm:$0xff]  ;;  %v5203_v14 = vld [vmem:[%s5798_s17 + $0x3e8] sm:$0xff]  }
 0x92a   : > { %v4610_v47 = vcombine.high %v3486_v23, %v3488_v25  ;;  %v5200_v8 = vld [vmem:[%s5798_s17 + $0x330] sm:$0xff]  }
 0x92b   : > { %v5201_v10 = vld [vmem:[%s5798_s17 + $0x3b0] sm:$0xff]  }
 0x93e   : > { %v3066_v26 = vpop.f32.mrf.mxu1  ;;  %v3109_v27 = vpop.f32.mrf.mxu0 }
 0x93f   : > { %v3067_v43 = vadd.f32 %v3066_v26, %v2855_v30  ;;  %v3110_v44 = vadd.f32 %v3109_v27, %v2863_v31  ;;  %v3487_v26 = vld [vmem:[%s5785_s7 + $0x238] sm:$0xff] }
 0x940   : > { %v3068_v33 = vpop.f32.mrf.mxu1  ;;  %v3111_v39 = vpop.f32.mrf.mxu0  ;;  %v3489_v27 = vld [vmem:[%s5785_s7 + $0x278] sm:$0xff] }
 0x941   : > { %v3069_v36 = vadd.f32 %v3068_v33, %v2859_v28  ;;  %v3112_v37 = vadd.f32 %v3111_v39, %v2867_v29  ;;  %v3118_v1 = vmax.f32 %v3067_v43, 0.0  ;;  %v3120_v2 = vmax.f32 %v3110_v44, 0.0  ;;  %v3478_v39 = vld [vmem:[%s5785_s7 + $0x130] sm:$0xff] }
 0x942   : > { %v3070_v34 = vpop.f32.mrf.mxu1  ;;  %v3113_v35 = vpop.f32.mrf.mxu0  ;;  %v4612_v50 = vcombine.high %v3487_v26, %v3489_v27  ;;  %v3474_v44 = vld [vmem:[%s5785_s7 + $0xb0] sm:$0xff] }
 0x943   : > { %v3071_v38 = vadd.f32 %v3070_v34, %v2855_v30  ;;  %v3114_v41 = vadd.f32 %v3113_v35, %v2863_v31  ;;  %v3119_v19 = vmax.f32 %v3069_v36, 0.0  ;;  %v3121_v59 = vmax.f32 %v3112_v37, 0.0  ;;  %v3480_v34 = vld [vmem:[%s5785_s7 + $0x170] sm:$0xff]  ;;  %v3479_v35 = vld [vmem:[%s5785_s7 + $0x138] sm:$0xff] }
 0x944   : > { %v3072_v45 = vpop.f32.mrf.mxu1  ;;  %v3115_v49 = vpop.f32.mrf.mxu0  ;;  %v4609_v30 = vcombine.low %v3486_v23, %v3488_v25  ;;  %v3481_v36 = vld [vmem:[%s5785_s7 + $0x178] sm:$0xff]  ;;  %v5208_v23 = vld [vmem:[%s5798_s17 + $0x320] sm:$0xff]  }
 0x945   : > { %v3073_v55 = vadd.f32 %v3072_v45, %v2859_v28  ;;  %v3116_v56 = vadd.f32 %v3115_v49, %v2867_v29  ;;  %v3122_v32 = vmax.f32 %v3071_v38, 0.0  ;;  %v3124_v57 = vmax.f32 %v3114_v41, 0.0  ;;  %v3483_v28 = vld [vmem:[%s5785_s7 + $0x1b8] sm:$0xff]  ;;  %v3476_v45 = vld [vmem:[%s5785_s7 + $0xf0] sm:$0xff]  ;;  %v5209_v25 = vld [vmem:[%s5798_s17 + $0x3a0] sm:$0xff]  }
 0x946   : > { %v3485_v29 = vld [vmem:[%s5785_s7 + $0x1f8] sm:$0xff]  ;;  %v4602_v41 = vcombine.high %v3478_v39, %v3480_v34  ;;  %v4604_v43 = vcombine.high %v3479_v35, %v3481_v36 }
 0x947   : > { %v3123_v60 = vmax.f32 %v3073_v55, 0.0  ;;  %v3125_v61 = vmax.f32 %v3116_v56, 0.0  ;;  %v3126_v17 = vpack.c.bf16 %v3122_v32, %v3118_v1  ;;  %v3128_v5 = vpack.c.bf16 %v3124_v57, %v3120_v2  ;;  %v3475_v49 = vld [vmem:[%s5785_s7 + $0xb8] sm:$0xff] }
 0x948   : > { %v4608_v33 = vcombine.high %v3483_v28, %v3485_v29  ;;  %v4607_v38 = vcombine.low %v3483_v28, %v3485_v29  ;;  %v3477_v55 = vld [vmem:[%s5785_s7 + $0xf8] sm:$0xff]  ;;  %v4601_v56 = vcombine.low %v3478_v39, %v3480_v34  ;;  %v4603_v32 = vcombine.low %v3479_v35, %v3481_v36  ;;  %v5218_v28 = vld [vmem:[%s5798_s17 + $0x348] sm:$0xff]   ;;  %v5224_v39 = vld [vmem:[%s5798_s17 + $0x300] sm:$0xff]  }
 0x949   : > { %v3127_v4 = vpack.c.bf16 %v3123_v60, %v3119_v19  ;;  %v3129_v16 = vpack.c.bf16 %v3125_v61, %v3121_v59  ;;  %v4598_v57 = vcombine.high %v3474_v44, %v3476_v45  ;;  %v4600_v58 = vcombine.high %v3475_v49, %v3477_v55  ;;  %v3472_v19 = vld [vmem:[%s5785_s7 + $0x70] sm:$0xff]  ;;  %v3471_v59 = vld [vmem:[%s5785_s7 + $0x38] sm:$0xff]  ;;  %v5219_v29 = vld [vmem:[%s5798_s17 + $0x3c8] sm:$0xff]  }
 0x94a   : > { %v3473_v60 = vld [vmem:[%s5785_s7 + $0x78] sm:$0xff]  ;;  %v4597_v61 = vcombine.low %v3474_v44, %v3476_v45  ;;  %v4599_v63 = vcombine.low %v3475_v49, %v3477_v55  ;;  %v4594_v0 = vcombine.high %v3470_v13, %v3472_v19  ;;  %v4593_v2 = vcombine.low %v3470_v13, %v3472_v19  ;;  %v5225_v34 = vld [vmem:[%s5798_s17 + $0x380] sm:$0xff]  }
 0x94b   : > { %3418 = vmatprep.mubr.bf16.mxu1 %v3127_v4  ;;  %3459 = vmatprep.mubr.bf16.mxu0 %v3129_v16  ;;  %v4596_v1 = vcombine.high %v3471_v59, %v3473_v60  ;;  %v4595_v4 = vcombine.low %v3471_v59, %v3473_v60  ;;  %v5194_v16 = vld [vmem:[%s5798_s17 + $0x378] sm:$0xff]  }
 0x94c   : > { %3419 = vmatmul.mubr.bf16.vlgmr.msra.gmra.mxu1 %v3126_v17  ;;  %3460 = vmatmul.mubr.bf16.vlgmr.msra.gmra.mxu0 %v3128_v5  ;;  %v5195_v17 = vld [vmem:[%s5798_s17 + $0x3f8] sm:$0xff]  }
 0x94d   : > { %3685 = vmatpush1.bf16.msra.mxu1 %v4621_v51  ;;  %3728 = vmatpush1.bf16.msra.mxu0 %v4623_v52  ;;  %v3482_v51 = vld [vmem:[%s5785_s7 + $0x1b0] sm:$0xff]  ;;  %v5196_v5 = vld [vmem:[%s5798_s17 + $0x338] sm:$0xff]  }
 0x94e   : > { %3686 = vmatprep.subr.bf16.mxu1 %v4618_v6  ;;  %3729 = vmatprep.subr.bf16.mxu0 %v4620_v53  ;;  %v3484_v52 = vld [vmem:[%s5785_s7 + $0x1f0] sm:$0xff]  ;;  %v5197_v6 = vld [vmem:[%s5798_s17 + $0x3b8] sm:$0xff]  }
 0x94f   : > { %3716 = vmatprep.mubr.bf16.mxu1 %v5488_v11  ;;  %3759 = vmatprep.mubr.bf16.mxu0 %v5488_v11  ;;  %v4611_v11 = vcombine.low %v3487_v26, %v3489_v27  ;;  %v4606_v31 = vcombine.high %v3482_v51, %v3484_v52  ;;  %v4605_v37 = vcombine.low %v3482_v51, %v3484_v52  ;;  %v5198_v53 = vld [vmem:[%s5798_s17 + $0x370] sm:$0xff]   ;;  %v5210_v26 = vld [vmem:[%s5798_s17 + $0x358] sm:$0xff]  }
 0x950   : > { %v5211_v27 = vld [vmem:[%s5798_s17 + $0x3d8] sm:$0xff]   ;;  %v5216_v51 = vld [vmem:[%s5798_s17 + $0x310] sm:$0xff]  }
 0x951   : > { %3687 = vmatpush1.bf16.msra.mxu1 %v4617_v54  ;;  %3730 = vmatpush1.bf16.msra.mxu0 %v4619_v18  ;;  %v5204_v54 = vld [vmem:[%s5798_s17 + $0x328] sm:$0xff]   ;;  %v5217_v52 = vld [vmem:[%s5798_s17 + $0x390] sm:$0xff]   ;;  %v3502_v59 = vld [vmem:[%s5796_s27 + $0x12] sm:$0xf] }
 0x952   : > { %3688 = vmatprep.subr.bf16.mxu1 %v4614_v20  ;;  %3731 = vmatprep.subr.bf16.mxu0 %v4616_v21  ;;  %v5205_v18 = vld [vmem:[%s5798_s17 + $0x3a8] sm:$0xff]   ;;  %v5206_v20 = vld [vmem:[%s5798_s17 + $0x360] sm:$0xff]  }
 0x953   : > { %v5207_v21 = vld [vmem:[%s5798_s17 + $0x3e0] sm:$0xff]  }
 0x955   : > { %3689 = vmatpush1.bf16.msra.mxu1 %v4613_v15  ;;  %3732 = vmatpush1.bf16.msra.mxu0 %v4615_v46  ;;  %v5212_v15 = vld [vmem:[%s5798_s17 + $0x318] sm:$0xff]  }
 0x956   : > { %3690 = vmatprep.subr.bf16.mxu1 %v4610_v47  ;;  %3733 = vmatprep.subr.bf16.mxu0 %v4612_v50  ;;  %v5213_v46 = vld [vmem:[%s5798_s17 + $0x398] sm:$0xff]   ;;  %v5214_v47 = vld [vmem:[%s5798_s17 + $0x350] sm:$0xff]  }
 0x957   : > { %v5215_v50 = vld [vmem:[%s5798_s17 + $0x3d0] sm:$0xff]  }
 0x959   : > { %3691 = vmatpush1.bf16.msra.mxu1 %v4609_v30  ;;  %3734 = vmatpush1.bf16.msra.mxu0 %v4611_v11  ;;  %v5220_v30 = vld [vmem:[%s5798_s17 + $0x308] sm:$0xff]  }
 0x95a   : > { %3692 = vmatprep.subr.bf16.mxu1 %v4606_v31  ;;  %3735 = vmatprep.subr.bf16.mxu0 %v4608_v33  ;;  %v5221_v11 = vld [vmem:[%s5798_s17 + $0x388] sm:$0xff]   ;;  %v5222_v31 = vld [vmem:[%s5798_s17 + $0x340] sm:$0xff]  }
 0x95b   : > { %v5223_v33 = vld [vmem:[%s5798_s17 + $0x3c0] sm:$0xff]  }
 0x95d   : > { %3693 = vmatpush1.bf16.msra.mxu1 %v4605_v37  ;;  %3736 = vmatpush1.bf16.msra.mxu0 %v4607_v38 }
 0x95e   : > { %3694 = vmatprep.subr.bf16.mxu1 %v4602_v41  ;;  %3737 = vmatprep.subr.bf16.mxu0 %v4604_v43 }
 0x961   : > { %3695 = vmatpush1.bf16.msra.mxu1 %v4601_v56  ;;  %3738 = vmatpush1.bf16.msra.mxu0 %v4603_v32 }
 0x962   : > { %3696 = vmatprep.subr.bf16.mxu1 %v4598_v57  ;;  %3739 = vmatprep.subr.bf16.mxu0 %v4600_v58 }
 0x965   : > { %3697 = vmatpush1.bf16.msra.mxu1 %v4597_v61  ;;  %3740 = vmatpush1.bf16.msra.mxu0 %v4599_v63  ;;  %v3511_v63 = vrot.slane %v3502_v59, %v5858_v40 }
 0x966   : > { %3698 = vmatprep.subr.bf16.mxu1 %v4594_v0  ;;  %3741 = vmatprep.subr.bf16.mxu0 %v4596_v1  ;;  %v3519_v0 = vrot.slane %v3502_v59, %v6093_v22  ;;  %v3507_v1 = vrot.slane %v3502_v59, %v5866_v48 }
 0x969   : > { %3699 = vmatpush1.bf16.msra.mxu1 %v4593_v2  ;;  %3742 = vmatpush1.bf16.msra.mxu0 %v4595_v4  ;;  %v3515_v2 = vrot.slane %v3502_v59, %v5895_v3 }
 0x96a   : > { %4837 = vmatprep.subr.bf16.mxu1 %v5194_v16  ;;  %4859 = vmatprep.subr.bf16.mxu0 %v5195_v17 }
 0x96c   : > { %3717 = vmatmul.mubr.bf16.vlgmr.msra.gmra.mxu1 %v6018_v9  ;;  %3760 = vmatmul.mubr.bf16.vlgmr.msra.gmra.mxu0 %v6018_v9  ;;  %v5202_v9 = vld [vmem:[%s5798_s17 + $0x368] sm:$0xff]  }
 0x96d   : > { %4838 = vmatpush3.bf16.msra.mxu1 %v5196_v5  ;;  %4860 = vmatpush3.bf16.msra.mxu0 %v5197_v6 }
 0x96e   : > { %4839 = vmatprep.subr.bf16.mxu1 %v5198_v53  ;;  %4861 = vmatprep.subr.bf16.mxu0 %v5199_v7 }
 0x971   : > { %4840 = vmatpush3.bf16.msra.mxu1 %v5200_v8  ;;  %4862 = vmatpush3.bf16.msra.mxu0 %v5201_v10 }
 0x972   : > { %4841 = vmatprep.subr.bf16.mxu1 %v5202_v9  ;;  %4863 = vmatprep.subr.bf16.mxu0 %v5203_v14 }
 0x975   : > { %4842 = vmatpush3.bf16.msra.mxu1 %v5204_v54  ;;  %4864 = vmatpush3.bf16.msra.mxu0 %v5205_v18 }
 0x976   : > { %4843 = vmatprep.subr.bf16.mxu1 %v5206_v20  ;;  %4865 = vmatprep.subr.bf16.mxu0 %v5207_v21 }
 0x979   : > { %4844 = vmatpush3.bf16.msra.mxu1 %v5208_v23  ;;  %4866 = vmatpush3.bf16.msra.mxu0 %v5209_v25 }
 0x97a   : > { %4845 = vmatprep.subr.bf16.mxu1 %v5210_v26  ;;  %4867 = vmatprep.subr.bf16.mxu0 %v5211_v27 }
 0x97d   : > { %4846 = vmatpush3.bf16.msra.mxu1 %v5212_v15  ;;  %4868 = vmatpush3.bf16.msra.mxu0 %v5213_v46 }
 0x97e   : > { %4847 = vmatprep.subr.bf16.mxu1 %v5214_v47  ;;  %4869 = vmatprep.subr.bf16.mxu0 %v5215_v50 }
 0x981   : > { %4848 = vmatpush3.bf16.msra.mxu1 %v5216_v51  ;;  %4870 = vmatpush3.bf16.msra.mxu0 %v5217_v52 }
 0x982   : > { %4849 = vmatprep.subr.bf16.mxu1 %v5218_v28  ;;  %4871 = vmatprep.subr.bf16.mxu0 %v5219_v29 }
 0x985   : > { %4850 = vmatpush3.bf16.msra.mxu1 %v5220_v30  ;;  %4872 = vmatpush3.bf16.msra.mxu0 %v5221_v11 }
 0x986   : > { %4851 = vmatprep.subr.bf16.mxu1 %v5222_v31  ;;  %4873 = vmatprep.subr.bf16.mxu0 %v5223_v33 }
 0x989   : > { %4852 = vmatpush3.bf16.msra.mxu1 %v5224_v39  ;;  %4874 = vmatpush3.bf16.msra.mxu0 %v5225_v34  ;;  %v4657_v39 = vld [vmem:[%s5796_s27 + $0x16] ss:$0 sm:$0xff] }
 0xa0c   : > { %v4809_v35 = vpop.f32.mrf.mxu1  ;;  %v4831_v36 = vpop.f32.mrf.mxu0 }
 0xa0e   : > { %v4810_v37 = vpop.f32.mrf.mxu1  ;;  %v4832_v38 = vpop.f32.mrf.mxu0 }
 0xa0f   : > { %v4811_v41 = vadd.f32 %v4810_v37, %v4809_v35  ;;  %v4833_v43 = vadd.f32 %v4832_v38, %v4831_v36 }
 0xa10   : > { %v4812_v44 = vpop.f32.mrf.mxu1  ;;  %v4834_v45 = vpop.f32.mrf.mxu0 }
 0xa11   : > { %v3462_v49 = vadd.f32 %v4833_v43, %v4811_v41 }
 0xa12   : > { %v4813_v55 = vpop.f32.mrf.mxu1  ;;  %v4835_v56 = vpop.f32.mrf.mxu0 }
 0xa13   : > { %v3468_v32 = vadd.f32 %v3462_v49, %v6233_v62  ;;  %v4814_v57 = vadd.f32 %v4813_v55, %v4812_v44  ;;  %v4836_v58 = vadd.f32 %v4835_v56, %v4834_v45 }
 0xa15   : > { %v3465_v13 = vadd.f32 %v4836_v58, %v4814_v57 }
 0xa17   : > { %v3469_v19 = vadd.f32 %v3465_v13, %v6235_v24 }
 0xa2c   : > { %v3718_v60 = vpop.f32.mrf.mxu1  ;;  %v3761_v61 = vpop.f32.mrf.mxu0 }
 0xa2d   : > { %v3719_v24 = vadd.f32 %v3718_v60, %v3507_v1  ;;  %v3762_v8 = vadd.f32 %v3761_v61, %v3515_v2 }
 0xa2e   : > { %v3720_v4 = vpop.f32.mrf.mxu1  ;;  %v3763_v16 = vpop.f32.mrf.mxu0 }
 0xa2f   : > { %v3721_v5 = vadd.f32 %v3720_v4, %v3511_v63  ;;  %v3764_v6 = vadd.f32 %v3763_v16, %v3519_v0  ;;  %v3770_v21 = vmax.f32 %v3719_v24, 0.0  ;;  %v3772_v23 = vmax.f32 %v3762_v8, 0.0  ;;  %v4659_v4 = vld [vmem:[%s5796_s27 + $0x18] ss:$0 sm:$0xff] }
 0xa30   : > { %v3722_v17 = vpop.f32.mrf.mxu1  ;;  %v3765_v62 = vpop.f32.mrf.mxu0 }
 0xa31   : > { %v3723_v53 = vadd.f32 %v3722_v17, %v3507_v1  ;;  %v3766_v7 = vadd.f32 %v3765_v62, %v3515_v2  ;;  %v3771_v18 = vmax.f32 %v3721_v5, 0.0  ;;  %v3773_v48 = vmax.f32 %v3764_v6, 0.0  ;;  %v4658_v1 = vld [vmem:[%s5796_s27 + $0x17] ss:$0 sm:$0xff] }
 0xa32   : > { %v3724_v10 = vpop.f32.mrf.mxu1  ;;  %v3767_v9 = vpop.f32.mrf.mxu0 }
 0xa33   : > { %v3725_v14 = vadd.f32 %v3724_v10, %v3511_v63  ;;  %v3768_v40 = vadd.f32 %v3767_v9, %v3519_v0  ;;  %v3774_v54 = vmax.f32 %v3723_v53, 0.0  ;;  %v3776_v22 = vmax.f32 %v3766_v7, 0.0 }
 0xa35   : > { %v3775_v20 = vmax.f32 %v3725_v14, 0.0  ;;  %v3777_v3 = vmax.f32 %v3768_v40, 0.0  ;;  %v3778_v27 = vpack.c.bf16 %v3774_v54, %v3770_v21  ;;  %v3780_v15 = vpack.c.bf16 %v3776_v22, %v3772_v23 }
 0xa37   : > { %v3779_v25 = vpack.c.bf16 %v3775_v20, %v3771_v18  ;;  %v3781_v26 = vpack.c.bf16 %v3777_v3, %v3773_v48 }
 0xa39   : > { %4070 = vmatprep.mubr.bf16.mxu1 %v3779_v25  ;;  %4111 = vmatprep.mubr.bf16.mxu0 %v3781_v26 }
 0xa3a   : > { %4071 = vmatmul.mubr.bf16.vlgmr.msra.gmra.mxu1 %v3778_v27  ;;  %4112 = vmatmul.mubr.bf16.vlgmr.msra.gmra.mxu0 %v3780_v15 }
 0xafa   : > { %v4853_v46 = vpop.f32.mrf.mxu1  ;;  %v4875_v47 = vpop.f32.mrf.mxu0 }
 0xafc   : > { %v4854_v50 = vpop.f32.mrf.mxu1  ;;  %v4876_v51 = vpop.f32.mrf.mxu0 }
 0xafd   : > { %v4855_v52 = vadd.f32 %v4854_v50, %v4853_v46  ;;  %v4877_v28 = vadd.f32 %v4876_v51, %v4875_v47 }
 0xafe   : > { %v4856_v29 = vpop.f32.mrf.mxu1  ;;  %v4878_v30 = vpop.f32.mrf.mxu0 }
 0xaff   : > { %v4114_v11 = vadd.f32 %v4877_v28, %v4855_v52 }
 0xb00   : > { %v4857_v31 = vpop.f32.mrf.mxu1  ;;  %v4879_v33 = vpop.f32.mrf.mxu0 }
 0xb01   : > { %v4120_v34 = vadd.f32 %v4114_v11, %v3468_v32  ;;  %v4858_v35 = vadd.f32 %v4857_v31, %v4856_v29  ;;  %v4880_v36 = vadd.f32 %v4879_v33, %v4878_v30 }
 0xb03   : > { %v4117_v37 = vadd.f32 %v4880_v36, %v4858_v35  ;;  %v4129_v38 = vadd.f32 %v4657_v39, %v4120_v34 }
 0xb05   : > { %v4121_v41 = vadd.f32 %v4117_v37, %v3469_v19  ;;  %v4131_v43 = vadd.f32 %v4129_v38, %v6012_v12 }
 0xb07   : > { %4135 = vadd.xlane.f32.xlu0 %v4131_v43  ;;  %v4130_v44 = vadd.f32 %v4657_v39, %v4121_v41 }
 0xb09   : > { %v4132_v45 = vadd.f32 %v4130_v44, %v6014_v42 }
 0xb0b   : > { %4137 = vadd.xlane.f32.xlu1 %v4132_v45 }
 0xb90   : > { %v4136_v49 = vpop.xlane.xlu0 %4135 }
 0xb91   : > { %v4139_v55 = vmul.f32 0.0078125, %v4136_v49 }
 0xb93   : > { %v4141_v56 = vsub.f32 %v4131_v43, %v4139_v55 }
 0xb94   : > { %v4138_v57 = vpop.xlane.xlu1 %4137 }
 0xb95   : > { %v4140_v58 = vmul.f32 0.0078125, %v4138_v57  ;;  %v4143_v13 = vmul.f32 %v4141_v56, %v4141_v56 }
 0xb97   : > { %v4142_v32 = vsub.f32 %v4132_v45, %v4140_v58  ;;  %4145 = vadd.xlane.f32.xlu0 %v4143_v13 }
 0xb99   : > { %v4144_v59 = vmul.f32 %v4142_v32, %v4142_v32 }
 0xb9b   : > { %4147 = vadd.xlane.f32.xlu1 %v4144_v59 }
 0xc20   : > { %v4146_v19 = vpop.xlane.xlu0 %4145 }
 0xc21   : > { %v4149_v60 = vmul.f32 0.0078125, %v4146_v19 }
 0xc23   : > { %v4151_v12 = vadd.f32 1e-05, %v4149_v60 }
 0xc24   : > { %v4148_v61 = vpop.xlane.xlu1 %4147 }
 0xc25   : > { %5262 = vrsqrt.f32 %v4151_v12  ;;  %v4150_v63 = vmul.f32 0.0078125, %v4148_v61 }
 0xc27   : > { %v4152_v42 = vadd.f32 1e-05, %v4150_v63 }
 0xc29   : > { %5264 = vrsqrt.f32 %v4152_v42 }
 0xc32   : > { %v5263_v0 = vpop.eup %5262 }
 0xc33   : > { %v4155_v2 = vmul.f32 %v5263_v0, %v4141_v56 }
 0xc35   : > { %v4163_v16 = vmul.f32 %v4658_v1, %v4155_v2 }
 0xc36   : > { %v5265_v17 = vpop.eup %5264 }
 0xc37   : > { %v4171_v62 = vadd.f32 %v4659_v4, %v4163_v16  ;;  %v4156_v5 = vmul.f32 %v5265_v17, %v4142_v32 }
 0xc39   : > { %4173 = vst [vmem:[#allocation2] sm:$0xff] %v4171_v62  ;;  %v4164_v6 = vmul.f32 %v4658_v1, %v4156_v5  ;;  %4178 = sbr.rel (%p4660_p13) target bundleno = 3150 (0xc4e), region = 88 }
 0xc3b   : > { %v4172_v53 = vadd.f32 %v4659_v4, %v4164_v6 }
 0xc3d   : > { %4174 = vst [vmem:[#allocation2 + $0x8] sm:$0xff] %v4172_v53 }
 0xc3e   : > { %v4179_v7 = vrot.slane %v4171_v62, 4  ;;  %v4185_v24 = vrot.slane %v4172_v53, 4  ;;  %vm4191_vm4 = vcmask 1040384  }
 0xc40   : > { %v4180_v8 = vadd.f32 %v4179_v7, %v4171_v62  ;;  %v4186_v10 = vadd.f32 %v4185_v24, %v4172_v53 }
 0xc42   : > { %v4181_v9 = vrot.slane %v4180_v8, 2  ;;  %v4187_v14 = vrot.slane %v4186_v10, 2 }
 0xc44   : > { %v4182_v40 = vadd.f32 %v4181_v9, %v4180_v8  ;;  %v4188_v54 = vadd.f32 %v4187_v14, %v4186_v10 }
 0xc46   : > { %v4183_v22 = vrot.slane %v4182_v40, 1  ;;  %v4189_v18 = vrot.slane %v4188_v54, 1 }
 0xc48   : > { %v4184_v48 = vadd.f32 %v4183_v22, %v4182_v40  ;;  %v4190_v20 = vadd.f32 %v4189_v18, %v4188_v54 }
 0xc4a   : > { %v4192_v3 = vsel %vm4191_vm4, %v4184_v48, %v4190_v20 }
 0xc4b   : > { %v4193_v21 = vmul.f32 0.125, %v4192_v3 }
 0xc4d   : > { %4194 = vst [vmem:[#allocation12] sm:$0x3] %v4193_v21 }
 0xc4e PF: > { %p5014_p6 = scmp.eq.s32.totalorder %s5679_s12, 2  ;;  %s5491_s30 = smov [#allocation12]  }
 0xc4f   : > { %s4202_s7 = sshll.u32 %s5491_s30, 4  ;;  %s4203_s7 = int_to_ptr.vmem [resolvable:$true] %s4202_s7 }
 0xc50   : > { %s5406_s22 = scalar_lea.vmem %s4203_s7, 32  ;;  %p5413_p8 = scmp.lt.s32.totalorder %s4203_s7, %s4203_s7 }
 0xc51   : > { %p5407_p12 = scmp.ne.s32.totalorder %s4203_s7, %s5406_s22  ;;  %p5414_p9 = scmp.lt.s32.totalorder %s5406_s22, %s5406_s22 }
 0xc53   : > { %p5408_p0 = pnand %p5407_p12, %p5014_p6  ;;  %p5415_p2 = por %p5414_p9, %p5413_p8 }
 0xc55   : > { %p5409_p4 = pneg %p5408_p0 }
 0xc57   : > { %p5416_p7 = pnand %p5415_p2, %p5409_p4 }
 0xc59   : > { %5419 = shalt.err (!%p5416_p7)
}
 0xc5a   : > { %4991 = dma.vmem_to_hbm [thread:$0]  (%p5014_p6), %s4203_s7, 32, %s6360_s10, [#allocation5]  }
 0xc5b   : > { %5459 = dma.done.wait (%p5014_p6), [#allocation5], 32  }
 0xc5c   : > { %5461 = vsyncadd (%p5014_p6), [#allocation5], 4294967264 }
 0xc5d PF: > { %s6389_s16 = sld [smem:[#allocation18_spill]]  ;;  %s6392_s13 = smov %s5468_s14 }
 0xc5e   : > { %s6390_s17 = sld [smem:[#allocation17_spill]] }
 0xc5f   : > { %s6391_s15 = sld [smem:[#allocation19_spill]] }
 0xc63   : > { %p25_p1 = scmp.ge.s32.totalorder %s6389_s16, 5  }
 0xc64   : > { %s6393_s14 = smov %s6390_s17 }
 0xc65   :  { %27 = sbr.rel (!%p25_p1) target bundleno = 10 (0xa), region = 148 }
 0xc6a   :  { %4215 = vsyncpa [#allocation4], 1 }
 0xc6b   :  { %4217 = vsyncpa [#allocation4 + $0x1], 1 }
 0xc6c   :  { %4218 = vsyncpa [#allocation7], 1 }
 0xc6d   :  { %4220 = vsyncpa [#allocation7 + $0x1], 1 }
 0xc6e   :  { %4221 = vsyncpa [#allocation10], 1 }
 0xc6f   :  { %4223 = vsyncpa [#allocation10 + $0x1], 1 }
 0xc70   :  { %4224 = vsyncpa [#allocation5], 1 }
 0xc71   :  { %4226 = vsyncpa [#allocation5 + $0x1], 1 }

</bundles_post_ra>
